<compile_context>
chip_gen: v7x
topology: tpu7x:2x2x1
jax: 0.10.0
libtpu: 0.0.40
codegen_flags: <defaults>
</compile_context>

<pallas_src>
import functools

import numpy as np
import jax
import jax.numpy as jnp
from jax.experimental import pallas as pl
from jax.experimental.pallas import tpu as pltpu


_SQRT_2_OVER_PI = 0.7978845608028654


def _gelu_tanh(x):
    # tanh approximation of GELU (see TODO above).
    return 0.5 * x * (1.0 + jnp.tanh(_SQRT_2_OVER_PI * (x + 0.044715 * x * x * x)))


def _round_up(v, m):
    return (v + m - 1) // m * m


# ---------------------------------------------------------------------------
# Fused kernel: all conv blocks (conv + bias + channel-LN + GELU + residual)
# and the final linear projection, per batch element.
# ---------------------------------------------------------------------------
def _fused_decoder_kernel(x_ref, *rest, cins, cdec, c0, H, W, k, pad, wp,
                          n_rows, c_pad, eps, res_flags):
    """Refs (in order after x_ref):
         per layer l: w_l (k*k*c_pad, cdec), b_l (1, cdec)
         proj_w_t (cdec, c0), proj_b (1, c0)
         out (1, H*W, c0)
         img scratch (n_buf_rows, c_pad)   -- zero-padded flattened image
    """
    n_layers = len(cins)
    conv_w_refs = rest[0:2 * n_layers:2]
    conv_b_refs = rest[1:2 * n_layers:2]
    pw_ref = rest[2 * n_layers]
    pb_ref = rest[2 * n_layers + 1]
    out_ref = rest[2 * n_layers + 2]
    img_ref = rest[2 * n_layers + 3]

    # Zero once: padding rows/cols stay zero for every layer; interior rows are
    # overwritten each layer on the channels that layer actually uses.  Stale
    # channels >= cin_l are multiplied by zero weight rows -> exact.
    img_ref[...] = jnp.zeros_like(img_ref)

    act = None     # current activation, padded-width layout (n_rows, cdec), f32
    res = None     # residual in the same layout (or None)

    for l in range(n_layers):
        cin = cins[l]

        # 1) Scatter the valid columns of the current activation into the
        #    zero-padded image buffer (static row slices; H tiny writes).
        for h in range(H):
            dst_rows = pl.ds((pad + h) * wp + pad, W)
            if act is None:
                src = x_ref[0, pl.ds(h * W, W), :]
            else:
                src = act[h * wp:h * wp + W, :cin]
            img_ref[dst_rows, pl.ds(0, cin)] = src.astype(img_ref.dtype)

        # 2) Flattened im2col: k*k lane-aligned, full-width (c_pad) tap slices,
        #    concatenated along the lane axis -> (n_rows, k*k*c_pad).
        taps = [img_ref[pl.ds(dy * wp + dx, n_rows), :]
                for dy in range(k) for dx in range(k)]
        patch = jnp.concatenate(taps, axis=-1)

        # 3) Single MXU matmul (K = k*k*c_pad) + conv bias, f32 accumulation.
        y = jnp.dot(patch, conv_w_refs[l][...],
                    preferred_element_type=jnp.float32)
        y = y + conv_b_refs[l][...].astype(jnp.float32)

        # 4) LayerNorm over the channel dim (elementwise_affine=False) + GELU.
        mean = jnp.mean(y, axis=-1, keepdims=True)
        cent = y - mean
        var = jnp.mean(cent * cent, axis=-1, keepdims=True)
        y = cent * jax.lax.rsqrt(var + eps)
        y = _gelu_tanh(y)

        # 5) Residual add (only when channel counts match, as in add_residual).
        if res_flags[l]:
            if res is None:
                # Residual is the original input, in padded-width layout.
                r = jnp.zeros((n_rows, cdec), jnp.float32)
                for h in range(H):
                    r = jax.lax.dynamic_update_slice(
                        r, x_ref[0, pl.ds(h * W, W), :].astype(jnp.float32),
                        (h * wp, 0))
                res = r
            y = y + res

        act = y
        res = act

    # 6) Final projection, then store only the valid (non-garbage) columns.
    proj = jnp.dot(act.astype(pw_ref.dtype), pw_ref[...],
                   preferred_element_type=jnp.float32)
    proj = proj + pb_ref[...].astype(jnp.float32)
    for h in range(H):
        out_ref[0, pl.ds(h * W, W), :] = (
            proj[h * wp:h * wp + W, :].astype(out_ref.dtype))


# ---------------------------------------------------------------------------
# Host-side, one-time parameter packing (hoisted out of the forward trace).
# ---------------------------------------------------------------------------
def prepare_decoder_params(conv_ws, conv_bs, proj_w, proj_b, *, groups, kernel):
    """Torch-layout params -> packed Pallas params.

    conv w (Cout, Cin/groups, k, k) -> (k*k*C_pad, Cout) block-diagonal dense
    weight with tap-major row ordering (C_pad = max Cin rounded up to 128 so
    every in-kernel tap slice is a full lane-aligned load).  proj_w (Cout, Cdec)
    -> transposed (Cdec, Cout)."""
    cins = []
    for w in conv_ws:
        c_out, cin_g, kh, kw = np.asarray(w).shape
        cins.append(cin_g * groups)
    c_pad = _round_up(max(cins), 128)

    packed_ws = []
    for w in conv_ws:
        wn = np.asarray(w, dtype=np.float32)
        c_out, cin_g, kh, kw = wn.shape
        assert kh == kernel and kw == kernel
        cout_g = c_out // groups
        dense = np.zeros((kh * kw, c_pad, c_out), np.float32)
        for g in range(groups):
            blk = np.transpose(wn[g * cout_g:(g + 1) * cout_g], (2, 3, 1, 0))
            blk = blk.reshape(kh * kw, cin_g, cout_g)
            dense[:, g * cin_g:(g + 1) * cin_g,
                  g * cout_g:(g + 1) * cout_g] = blk
        packed_ws.append(jnp.asarray(dense.reshape(kh * kw * c_pad, c_out)))

    packed_bs = [jnp.asarray(np.asarray(b, np.float32)) for b in conv_bs]
    proj_w_t = jnp.asarray(np.asarray(proj_w, np.float32).T)
    proj_b_j = jnp.asarray(np.asarray(proj_b, np.float32))
    return packed_ws, packed_bs, proj_w_t, proj_b_j


# ---------------------------------------------------------------------------
# Full Decoder2d forward (single fused pallas_call).
# ---------------------------------------------------------------------------
def decoder2d_forward(x, conv_ws_packed, conv_bs, proj_w_t, proj_b, *,
                      h_size, w_size, kernel, decoder_residual=True,
                      ln_eps=1e-5, compute_dtype=jnp.float32):
    """x: (B, T, input_dim), T == h_size*w_size -> (B, T, input_dim)."""
    B, T, c0 = x.shape
    assert T == h_size * w_size
    n_layers = len(conv_ws_packed)
    cdec = conv_ws_packed[0].shape[1]
    cins = [c0] + [cdec] * (n_layers - 1)
    k = kernel
    c_pad = conv_ws_packed[0].shape[0] // (k * k)
    assert c_pad >= max(cins)
    pad = k // 2
    H, W = h_size, w_size
    wp = _round_up(W + 2 * pad, 8)                # sublane-aligned flat row stride
    n_rows = H * wp                               # padded-width output rows
    n_buf_rows = _round_up(n_rows + (k - 1) * (wp + 1), 8)
    res_flags = tuple(decoder_residual and (cins[l] == cdec)
                      for l in range(n_layers))

    inputs = [x.astype(compute_dtype)]
    in_specs = [pl.BlockSpec((1, T, c0), lambda i: (i, 0, 0))]
    for l in range(n_layers):
        w_l = conv_ws_packed[l].astype(compute_dtype)
        b_l = conv_bs[l].reshape(1, cdec).astype(jnp.float32)
        inputs += [w_l, b_l]
        in_specs += [pl.BlockSpec((w_l.shape[0], cdec), lambda i: (0, 0)),
                     pl.BlockSpec((1, cdec), lambda i: (0, 0))]
    inputs += [proj_w_t.astype(compute_dtype),
               proj_b.reshape(1, c0).astype(jnp.float32)]
    in_specs += [pl.BlockSpec((cdec, c0), lambda i: (0, 0)),
                 pl.BlockSpec((1, c0), lambda i: (0, 0))]

    kernel_fn = functools.partial(
        _fused_decoder_kernel, cins=tuple(cins), cdec=cdec, c0=c0, H=H, W=W,
        k=k, pad=pad, wp=wp, n_rows=n_rows, c_pad=c_pad, eps=ln_eps,
        res_flags=res_flags)

    flops = int(2 * B * n_rows * (n_layers * k * k * c_pad * cdec + cdec * c0))
    transcendentals = int(B * n_layers * n_rows * cdec)
    bytes_accessed = int(4 * (2 * B * T * c0
                              + sum(int(w.size) for w in conv_ws_packed)
                              + n_layers * cdec + cdec * c0 + c0))

    return pl.pallas_call(
        kernel_fn,
        out_shape=jax.ShapeDtypeStruct((B, T, c0), jnp.float32),
        grid=(B,),
        in_specs=in_specs,
        out_specs=pl.BlockSpec((1, T, c0), lambda i: (i, 0, 0)),
        scratch_shapes=[pltpu.VMEM((n_buf_rows, c_pad), compute_dtype)],
        compiler_params=pltpu.CompilerParams(
            dimension_semantics=("parallel",)),
        cost_estimate=pl.CostEstimate(flops=flops,
                                      transcendentals=transcendentals,
                                      bytes_accessed=bytes_accessed),
    )(*inputs)


# ---------------------------------------------------------------------------
# Pure-JAX reference of the PyTorch forward (independent conv / LN / proj path)
# ---------------------------------------------------------------------------
def _reference_forward(x, conv_ws, conv_bs, proj_w, proj_b, *, h_size, w_size,
                       kernel, groups, decoder_residual=True, ln_eps=1e-5):
    B, T, c0 = x.shape
    pad = kernel // 2
    h = jnp.transpose(x, (0, 2, 1)).reshape(B, c0, h_size, w_size)
    res = h
    for w, b in zip(conv_ws, conv_bs):
        y = jax.lax.conv_general_dilated(
            h, w, window_strides=(1, 1),
            padding=[(pad, pad), (pad, pad)],
            feature_group_count=groups,
            dimension_numbers=("NCHW", "OIHW", "NCHW"),
            precision=jax.lax.Precision.HIGHEST)
        y = y + b[None, :, None, None]
        if kernel % 2 == 0:                       # SamePad2d
            y = y[:, :, :h_size, :w_size]
        mean = jnp.mean(y, axis=1, keepdims=True)
        var = jnp.mean((y - mean) ** 2, axis=1, keepdims=True)
        y = (y - mean) / jnp.sqrt(var + ln_eps)
        y = _gelu_tanh(y)
        if decoder_residual and res.shape[1] == y.shape[1]:
            y = y + res
        h = y
        res = h
    cdec = h.shape[1]
    h = jnp.transpose(h.reshape(B, cdec, T), (0, 2, 1))
    return (jnp.einsum("btd,od->bto", h, proj_w,
                       precision=jax.lax.Precision.HIGHEST)
            + proj_b[None, None, :])


if __name__ == "__main__":
    # Small config consistent with Decoder2d(cfg, input_dim, h_size, w_size).
    B = 2
    input_dim = 48
    h_size = w_size = 8
    T = h_size * w_size
    decoder_dim = 32
    decoder_kernel = 3
    decoder_groups = 4
    decoder_layers = 2
    decoder_residual = True

    key = jax.random.PRNGKey(0)
    keys = jax.random.split(key, 3 + 2 * decoder_layers)
    x = jax.random.normal(keys[0], (B, T, input_dim), dtype=jnp.float32)

    conv_ws, conv_bs = [], []
    for i in range(decoder_layers):
        cin = input_dim if i == 0 else decoder_dim
        conv_ws.append(0.1 * jax.random.normal(
            keys[1 + 2 * i],
            (decoder_dim, cin // decoder_groups, decoder_kernel, decoder_kernel),
            dtype=jnp.float32))
        conv_bs.append(0.1 * jax.random.normal(
            keys[2 + 2 * i], (decoder_dim,), dtype=jnp.float32))
    pk1, pk2 = jax.random.split(keys[-1])
    proj_w = 0.1 * jax.random.normal(pk1, (input_dim, decoder_dim), dtype=jnp.float32)
    proj_b = 0.1 * jax.random.normal(pk2, (input_dim,), dtype=jnp.float32)

    # One-time parameter packing (outside the jitted forward).
    packed_ws, packed_bs, proj_w_t, proj_b_j = prepare_decoder_params(
        conv_ws, conv_bs, proj_w, proj_b,
        groups=decoder_groups, kernel=decoder_kernel)

    fwd = jax.jit(functools.partial(
        decoder2d_forward, h_size=h_size, w_size=w_size, kernel=decoder_kernel,
        decoder_residual=decoder_residual))
    out = jax.block_until_ready(fwd(x, packed_ws, packed_bs, proj_w_t, proj_b_j))

    ref = _reference_forward(x, conv_ws, conv_bs, proj_w, proj_b,
                             h_size=h_size, w_size=w_size, kernel=decoder_kernel,
                             groups=decoder_groups,
                             decoder_residual=decoder_residual)
    ref = jax.block_until_ready(ref)

    assert out.shape == (B, T, input_dim), out.shape
    np.testing.assert_allclose(np.asarray(out), np.asarray(ref),
                               rtol=1e-3, atol=1e-3)
    print("KERNEL_OK")
</pallas_src>

<mosaic_0001>
module attributes {stable_mosaic.version = 11 : i64} {
  func.func @_fused_decoder_kernel(%arg0: i32, %arg1: memref<1x64x48xf32, #tpu.memory_space<vmem>>, %arg2: memref<1152x32xf32, #tpu.memory_space<vmem>>, %arg3: memref<1x32xf32, #tpu.memory_space<vmem>>, %arg4: memref<1152x32xf32, #tpu.memory_space<vmem>>, %arg5: memref<1x32xf32, #tpu.memory_space<vmem>>, %arg6: memref<32x48xf32, #tpu.memory_space<vmem>>, %arg7: memref<1x48xf32, #tpu.memory_space<vmem>>, %arg8: memref<1x64x48xf32, #tpu.memory_space<vmem>>, %arg9: memref<168x128xf32, #tpu.memory_space<vmem>>) attributes {dimension_semantics = [#tpu.dimension_semantics<parallel>], iteration_bounds = array<i64: 2>, scalar_prefetch = 0 : i64, scratch_operands = 1 : i64, tpu.core_type = #tpu.core_type<tc>, window_params = [{transform_indices = @transform_0, window_bounds = array<i64: 1, 64, 48>}, {pipeline_mode = #tpu.pipeline_mode<synchronous>, transform_indices = @transform_1, window_bounds = array<i64: 1152, 32>}, {pipeline_mode = #tpu.pipeline_mode<synchronous>, transform_indices = @transform_2, window_bounds = array<i64: 1, 32>}, {pipeline_mode = #tpu.pipeline_mode<synchronous>, transform_indices = @transform_3, window_bounds = array<i64: 1152, 32>}, {pipeline_mode = #tpu.pipeline_mode<synchronous>, transform_indices = @transform_4, window_bounds = array<i64: 1, 32>}, {pipeline_mode = #tpu.pipeline_mode<synchronous>, transform_indices = @transform_5, window_bounds = array<i64: 32, 48>}, {pipeline_mode = #tpu.pipeline_mode<synchronous>, transform_indices = @transform_6, window_bounds = array<i64: 1, 48>}, {transform_indices = @transform_7, window_bounds = array<i64: 1, 64, 48>}]} {
    %cst = arith.constant 0.000000e+00 : f32
    %0 = vector.broadcast %cst : f32 to vector<168x128xf32>
    %c0 = arith.constant 0 : index
    %c0_0 = arith.constant 0 : index
    %1 = vector.load %arg9[%c0, %c0_0] : memref<168x128xf32, #tpu.memory_space<vmem>>, vector<168x128xf32>
    tpu.vector_store %arg9[%c0, %c0_0], %0 {strides = array<i32>} : memref<168x128xf32, #tpu.memory_space<vmem>>, vector<168x128xf32>,
    %c0_1 = arith.constant 0 : index
    %c0_2 = arith.constant 0 : index
    %c0_3 = arith.constant 0 : index
    %2 = vector.load %arg1[%c0_1, %c0_2, %c0_3] : memref<1x64x48xf32, #tpu.memory_space<vmem>>, vector<1x8x48xf32>
    %3 = vector.shape_cast %2 : vector<1x8x48xf32> to vector<8x48xf32>
    %c17 = arith.constant 17 : index
    %c0_4 = arith.constant 0 : index
    %4 = vector.load %arg9[%c17, %c0_4] : memref<168x128xf32, #tpu.memory_space<vmem>>, vector<8x48xf32>
    tpu.vector_store %arg9[%c17, %c0_4], %3 {strides = array<i32>} : memref<168x128xf32, #tpu.memory_space<vmem>>, vector<8x48xf32>,
    %c0_5 = arith.constant 0 : index
    %c8 = arith.constant 8 : index
    %c0_6 = arith.constant 0 : index
    %5 = vector.load %arg1[%c0_5, %c8, %c0_6] : memref<1x64x48xf32, #tpu.memory_space<vmem>>, vector<1x8x48xf32>
    %6 = vector.shape_cast %5 : vector<1x8x48xf32> to vector<8x48xf32>
    %c33 = arith.constant 33 : index
    %c0_7 = arith.constant 0 : index
    %7 = vector.load %arg9[%c33, %c0_7] : memref<168x128xf32, #tpu.memory_space<vmem>>, vector<8x48xf32>
    tpu.vector_store %arg9[%c33, %c0_7], %6 {strides = array<i32>} : memref<168x128xf32, #tpu.memory_space<vmem>>, vector<8x48xf32>,
    %c0_8 = arith.constant 0 : index
    %c16 = arith.constant 16 : index
    %c0_9 = arith.constant 0 : index
    %8 = vector.load %arg1[%c0_8, %c16, %c0_9] : memref<1x64x48xf32, #tpu.memory_space<vmem>>, vector<1x8x48xf32>
    %9 = vector.shape_cast %8 : vector<1x8x48xf32> to vector<8x48xf32>
    %c49 = arith.constant 49 : index
    %c0_10 = arith.constant 0 : index
    %10 = vector.load %arg9[%c49, %c0_10] : memref<168x128xf32, #tpu.memory_space<vmem>>, vector<8x48xf32>
    tpu.vector_store %arg9[%c49, %c0_10], %9 {strides = array<i32>} : memref<168x128xf32, #tpu.memory_space<vmem>>, vector<8x48xf32>,
    %c0_11 = arith.constant 0 : index
    %c24 = arith.constant 24 : index
    %c0_12 = arith.constant 0 : index
    %11 = vector.load %arg1[%c0_11, %c24, %c0_12] : memref<1x64x48xf32, #tpu.memory_space<vmem>>, vector<1x8x48xf32>
    %12 = vector.shape_cast %11 : vector<1x8x48xf32> to vector<8x48xf32>
    %c65 = arith.constant 65 : index
    %c0_13 = arith.constant 0 : index
    %13 = vector.load %arg9[%c65, %c0_13] : memref<168x128xf32, #tpu.memory_space<vmem>>, vector<8x48xf32>
    tpu.vector_store %arg9[%c65, %c0_13], %12 {strides = array<i32>} : memref<168x128xf32, #tpu.memory_space<vmem>>, vector<8x48xf32>,
    %c0_14 = arith.constant 0 : index
    %c32 = arith.constant 32 : index
    %c0_15 = arith.constant 0 : index
    %14 = vector.load %arg1[%c0_14, %c32, %c0_15] : memref<1x64x48xf32, #tpu.memory_space<vmem>>, vector<1x8x48xf32>
    %15 = vector.shape_cast %14 : vector<1x8x48xf32> to vector<8x48xf32>
    %c81 = arith.constant 81 : index
    %c0_16 = arith.constant 0 : index
    %16 = vector.load %arg9[%c81, %c0_16] : memref<168x128xf32, #tpu.memory_space<vmem>>, vector<8x48xf32>
    tpu.vector_store %arg9[%c81, %c0_16], %15 {strides = array<i32>} : memref<168x128xf32, #tpu.memory_space<vmem>>, vector<8x48xf32>,
    %c0_17 = arith.constant 0 : index
    %c40 = arith.constant 40 : index
    %c0_18 = arith.constant 0 : index
    %17 = vector.load %arg1[%c0_17, %c40, %c0_18] : memref<1x64x48xf32, #tpu.memory_space<vmem>>, vector<1x8x48xf32>
    %18 = vector.shape_cast %17 : vector<1x8x48xf32> to vector<8x48xf32>
    %c97 = arith.constant 97 : index
    %c0_19 = arith.constant 0 : index
    %19 = vector.load %arg9[%c97, %c0_19] : memref<168x128xf32, #tpu.memory_space<vmem>>, vector<8x48xf32>
    tpu.vector_store %arg9[%c97, %c0_19], %18 {strides = array<i32>} : memref<168x128xf32, #tpu.memory_space<vmem>>, vector<8x48xf32>,
    %c0_20 = arith.constant 0 : index
    %c48 = arith.constant 48 : index
    %c0_21 = arith.constant 0 : index
    %20 = vector.load %arg1[%c0_20, %c48, %c0_21] : memref<1x64x48xf32, #tpu.memory_space<vmem>>, vector<1x8x48xf32>
    %21 = vector.shape_cast %20 : vector<1x8x48xf32> to vector<8x48xf32>
    %c113 = arith.constant 113 : index
    %c0_22 = arith.constant 0 : index
    %22 = vector.load %arg9[%c113, %c0_22] : memref<168x128xf32, #tpu.memory_space<vmem>>, vector<8x48xf32>
    tpu.vector_store %arg9[%c113, %c0_22], %21 {strides = array<i32>} : memref<168x128xf32, #tpu.memory_space<vmem>>, vector<8x48xf32>,
    %c0_23 = arith.constant 0 : index
    %c56 = arith.constant 56 : index
    %c0_24 = arith.constant 0 : index
    %23 = vector.load %arg1[%c0_23, %c56, %c0_24] : memref<1x64x48xf32, #tpu.memory_space<vmem>>, vector<1x8x48xf32>
    %24 = vector.shape_cast %23 : vector<1x8x48xf32> to vector<8x48xf32>
    %c129 = arith.constant 129 : index
    %c0_25 = arith.constant 0 : index
    %25 = vector.load %arg9[%c129, %c0_25] : memref<168x128xf32, #tpu.memory_space<vmem>>, vector<8x48xf32>
    tpu.vector_store %arg9[%c129, %c0_25], %24 {strides = array<i32>} : memref<168x128xf32, #tpu.memory_space<vmem>>, vector<8x48xf32>,
    %c0_26 = arith.constant 0 : index
    %c0_27 = arith.constant 0 : index
    %26 = vector.load %arg9[%c0_26, %c0_27] : memref<168x128xf32, #tpu.memory_space<vmem>>, vector<128x128xf32>
    %c1 = arith.constant 1 : index
    %c0_28 = arith.constant 0 : index
    %27 = vector.load %arg9[%c1, %c0_28] : memref<168x128xf32, #tpu.memory_space<vmem>>, vector<128x128xf32>
    %c2 = arith.constant 2 : index
    %c0_29 = arith.constant 0 : index
    %28 = vector.load %arg9[%c2, %c0_29] : memref<168x128xf32, #tpu.memory_space<vmem>>, vector<128x128xf32>
    %c16_30 = arith.constant 16 : index
    %c0_31 = arith.constant 0 : index
    %29 = vector.load %arg9[%c16_30, %c0_31] : memref<168x128xf32, #tpu.memory_space<vmem>>, vector<128x128xf32>
    %c17_32 = arith.constant 17 : index
    %c0_33 = arith.constant 0 : index
    %30 = vector.load %arg9[%c17_32, %c0_33] : memref<168x128xf32, #tpu.memory_space<vmem>>, vector<128x128xf32>
    %c18 = arith.constant 18 : index
    %c0_34 = arith.constant 0 : index
    %31 = vector.load %arg9[%c18, %c0_34] : memref<168x128xf32, #tpu.memory_space<vmem>>, vector<128x128xf32>
    %c32_35 = arith.constant 32 : index
    %c0_36 = arith.constant 0 : index
    %32 = vector.load %arg9[%c32_35, %c0_36] : memref<168x128xf32, #tpu.memory_space<vmem>>, vector<128x128xf32>
    %c33_37 = arith.constant 33 : index
    %c0_38 = arith.constant 0 : index
    %33 = vector.load %arg9[%c33_37, %c0_38] : memref<168x128xf32, #tpu.memory_space<vmem>>, vector<128x128xf32>
    %c34 = arith.constant 34 : index
    %c0_39 = arith.constant 0 : index
    %34 = vector.load %arg9[%c34, %c0_39] : memref<168x128xf32, #tpu.memory_space<vmem>>, vector<128x128xf32>
    %35 = tpu.concatenate %26, %27, %28, %29, %30, %31, %32, %33, %34 in 1 : vector<128x128xf32>, vector<128x128xf32>, vector<128x128xf32>, vector<128x128xf32>, vector<128x128xf32>, vector<128x128xf32>, vector<128x128xf32>, vector<128x128xf32>, vector<128x128xf32> -> vector<128x1152xf32>
    %c0_40 = arith.constant 0 : index
    %c0_41 = arith.constant 0 : index
    %36 = vector.load %arg2[%c0_40, %c0_41] : memref<1152x32xf32, #tpu.memory_space<vmem>>, vector<1152x32xf32>
    %cst_42 = arith.constant dense<0.000000e+00> : vector<128x32xf32>
    %37 = tpu.matmul %35, %36, %cst_42 {dimension_numbers = #tpu.dot_dimension_numbers<[1], [0], [0], [1], [0, 0, 1, 1], [], []>} : vector<128x1152xf32>, vector<1152x32xf32>, vector<128x32xf32> -> vector<128x32xf32>
    %c0_43 = arith.constant 0 : index
    %c0_44 = arith.constant 0 : index
    %38 = vector.load %arg3[%c0_43, %c0_44] : memref<1x32xf32, #tpu.memory_space<vmem>>, vector<1x32xf32>
    %39 = vector.broadcast %38 : vector<1x32xf32> to vector<128x32xf32>
    %40 = arith.addf %37, %39 : vector<128x32xf32>
    %cst_45 = arith.constant dense<0.000000e+00> : vector<128xf32>
    %41 = vector.multi_reduction <add>, %40, %cst_45 [1] : vector<128x32xf32> to vector<128xf32>
    %42 = vector.shape_cast %41 : vector<128xf32> to vector<128x1xf32>
    %cst_46 = arith.constant 3.200000e+01 : f32
    %43 = vector.broadcast %cst_46 : f32 to vector<128x1xf32>
    %44 = arith.divf %42, %43 : vector<128x1xf32>
    %45 = vector.broadcast %44 : vector<128x1xf32> to vector<128x32xf32>
    %46 = arith.subf %40, %45 : vector<128x32xf32>
    %47 = arith.mulf %46, %46 : vector<128x32xf32>
    %cst_47 = arith.constant dense<0.000000e+00> : vector<128xf32>
    %48 = vector.multi_reduction <add>, %47, %cst_47 [1] : vector<128x32xf32> to vector<128xf32>
    %49 = vector.shape_cast %48 : vector<128xf32> to vector<128x1xf32>
    %cst_48 = arith.constant 3.200000e+01 : f32
    %50 = vector.broadcast %cst_48 : f32 to vector<128x1xf32>
    %51 = arith.divf %49, %50 : vector<128x1xf32>
    %cst_49 = arith.constant 9.99999974E-6 : f32
    %52 = vector.broadcast %cst_49 : f32 to vector<128x1xf32>
    %53 = arith.addf %51, %52 : vector<128x1xf32>
    %54 = math.rsqrt %53 : vector<128x1xf32>
    %55 = vector.broadcast %54 : vector<128x1xf32> to vector<128x32xf32>
    %56 = arith.mulf %46, %55 : vector<128x32xf32>
    %cst_50 = arith.constant 5.000000e-01 : f32
    %57 = vector.broadcast %cst_50 : f32 to vector<128x32xf32>
    %58 = arith.mulf %57, %56 : vector<128x32xf32>
    %cst_51 = arith.constant 4.471500e-02 : f32
    %59 = vector.broadcast %cst_51 : f32 to vector<128x32xf32>
    %60 = arith.mulf %59, %56 : vector<128x32xf32>
    %61 = arith.mulf %60, %56 : vector<128x32xf32>
    %62 = arith.mulf %61, %56 : vector<128x32xf32>
    %63 = arith.addf %56, %62 : vector<128x32xf32>
    %cst_52 = arith.constant 0.797884583 : f32
    %64 = vector.broadcast %cst_52 : f32 to vector<128x32xf32>
    %65 = arith.mulf %64, %63 : vector<128x32xf32>
    %66 = math.tanh %65 : vector<128x32xf32>
    %cst_53 = arith.constant 1.000000e+00 : f32
    %67 = vector.broadcast %cst_53 : f32 to vector<128x32xf32>
    %68 = arith.addf %67, %66 : vector<128x32xf32>
    %69 = arith.mulf %58, %68 : vector<128x32xf32>
    %70 = vector.extract_strided_slice %69 {offsets = [0, 0], sizes = [8, 32], strides = [1, 1]} : vector<128x32xf32> to vector<8x32xf32>
    %c17_54 = arith.constant 17 : index
    %c0_55 = arith.constant 0 : index
    %71 = vector.load %arg9[%c17_54, %c0_55] : memref<168x128xf32, #tpu.memory_space<vmem>>, vector<8x32xf32>
    tpu.vector_store %arg9[%c17_54, %c0_55], %70 {strides = array<i32>} : memref<168x128xf32, #tpu.memory_space<vmem>>, vector<8x32xf32>,
    %72 = vector.extract_strided_slice %69 {offsets = [16, 0], sizes = [8, 32], strides = [1, 1]} : vector<128x32xf32> to vector<8x32xf32>
    %c33_56 = arith.constant 33 : index
    %c0_57 = arith.constant 0 : index
    %73 = vector.load %arg9[%c33_56, %c0_57] : memref<168x128xf32, #tpu.memory_space<vmem>>, vector<8x32xf32>
    tpu.vector_store %arg9[%c33_56, %c0_57], %72 {strides = array<i32>} : memref<168x128xf32, #tpu.memory_space<vmem>>, vector<8x32xf32>,
    %74 = vector.extract_strided_slice %69 {offsets = [32, 0], sizes = [8, 32], strides = [1, 1]} : vector<128x32xf32> to vector<8x32xf32>
    %c49_58 = arith.constant 49 : index
    %c0_59 = arith.constant 0 : index
    %75 = vector.load %arg9[%c49_58, %c0_59] : memref<168x128xf32, #tpu.memory_space<vmem>>, vector<8x32xf32>
    tpu.vector_store %arg9[%c49_58, %c0_59], %74 {strides = array<i32>} : memref<168x128xf32, #tpu.memory_space<vmem>>, vector<8x32xf32>,
    %76 = vector.extract_strided_slice %69 {offsets = [48, 0], sizes = [8, 32], strides = [1, 1]} : vector<128x32xf32> to vector<8x32xf32>
    %c65_60 = arith.constant 65 : index
    %c0_61 = arith.constant 0 : index
    %77 = vector.load %arg9[%c65_60, %c0_61] : memref<168x128xf32, #tpu.memory_space<vmem>>, vector<8x32xf32>
    tpu.vector_store %arg9[%c65_60, %c0_61], %76 {strides = array<i32>} : memref<168x128xf32, #tpu.memory_space<vmem>>, vector<8x32xf32>,
    %78 = vector.extract_strided_slice %69 {offsets = [64, 0], sizes = [8, 32], strides = [1, 1]} : vector<128x32xf32> to vector<8x32xf32>
    %c81_62 = arith.constant 81 : index
    %c0_63 = arith.constant 0 : index
    %79 = vector.load %arg9[%c81_62, %c0_63] : memref<168x128xf32, #tpu.memory_space<vmem>>, vector<8x32xf32>
    tpu.vector_store %arg9[%c81_62, %c0_63], %78 {strides = array<i32>} : memref<168x128xf32, #tpu.memory_space<vmem>>, vector<8x32xf32>,
    %80 = vector.extract_strided_slice %69 {offsets = [80, 0], sizes = [8, 32], strides = [1, 1]} : vector<128x32xf32> to vector<8x32xf32>
    %c97_64 = arith.constant 97 : index
    %c0_65 = arith.constant 0 : index
    %81 = vector.load %arg9[%c97_64, %c0_65] : memref<168x128xf32, #tpu.memory_space<vmem>>, vector<8x32xf32>
    tpu.vector_store %arg9[%c97_64, %c0_65], %80 {strides = array<i32>} : memref<168x128xf32, #tpu.memory_space<vmem>>, vector<8x32xf32>,
    %82 = vector.extract_strided_slice %69 {offsets = [96, 0], sizes = [8, 32], strides = [1, 1]} : vector<128x32xf32> to vector<8x32xf32>
    %c113_66 = arith.constant 113 : index
    %c0_67 = arith.constant 0 : index
    %83 = vector.load %arg9[%c113_66, %c0_67] : memref<168x128xf32, #tpu.memory_space<vmem>>, vector<8x32xf32>
    tpu.vector_store %arg9[%c113_66, %c0_67], %82 {strides = array<i32>} : memref<168x128xf32, #tpu.memory_space<vmem>>, vector<8x32xf32>,
    %84 = vector.extract_strided_slice %69 {offsets = [112, 0], sizes = [8, 32], strides = [1, 1]} : vector<128x32xf32> to vector<8x32xf32>
    %c129_68 = arith.constant 129 : index
    %c0_69 = arith.constant 0 : index
    %85 = vector.load %arg9[%c129_68, %c0_69] : memref<168x128xf32, #tpu.memory_space<vmem>>, vector<8x32xf32>
    tpu.vector_store %arg9[%c129_68, %c0_69], %84 {strides = array<i32>} : memref<168x128xf32, #tpu.memory_space<vmem>>, vector<8x32xf32>,
    %c0_70 = arith.constant 0 : index
    %c0_71 = arith.constant 0 : index
    %86 = vector.load %arg9[%c0_70, %c0_71] : memref<168x128xf32, #tpu.memory_space<vmem>>, vector<128x128xf32>
    %c1_72 = arith.constant 1 : index
    %c0_73 = arith.constant 0 : index
    %87 = vector.load %arg9[%c1_72, %c0_73] : memref<168x128xf32, #tpu.memory_space<vmem>>, vector<128x128xf32>
    %c2_74 = arith.constant 2 : index
    %c0_75 = arith.constant 0 : index
    %88 = vector.load %arg9[%c2_74, %c0_75] : memref<168x128xf32, #tpu.memory_space<vmem>>, vector<128x128xf32>
    %c16_76 = arith.constant 16 : index
    %c0_77 = arith.constant 0 : index
    %89 = vector.load %arg9[%c16_76, %c0_77] : memref<168x128xf32, #tpu.memory_space<vmem>>, vector<128x128xf32>
    %c17_78 = arith.constant 17 : index
    %c0_79 = arith.constant 0 : index
    %90 = vector.load %arg9[%c17_78, %c0_79] : memref<168x128xf32, #tpu.memory_space<vmem>>, vector<128x128xf32>
    %c18_80 = arith.constant 18 : index
    %c0_81 = arith.constant 0 : index
    %91 = vector.load %arg9[%c18_80, %c0_81] : memref<168x128xf32, #tpu.memory_space<vmem>>, vector<128x128xf32>
    %c32_82 = arith.constant 32 : index
    %c0_83 = arith.constant 0 : index
    %92 = vector.load %arg9[%c32_82, %c0_83] : memref<168x128xf32, #tpu.memory_space<vmem>>, vector<128x128xf32>
    %c33_84 = arith.constant 33 : index
    %c0_85 = arith.constant 0 : index
    %93 = vector.load %arg9[%c33_84, %c0_85] : memref<168x128xf32, #tpu.memory_space<vmem>>, vector<128x128xf32>
    %c34_86 = arith.constant 34 : index
    %c0_87 = arith.constant 0 : index
    %94 = vector.load %arg9[%c34_86, %c0_87] : memref<168x128xf32, #tpu.memory_space<vmem>>, vector<128x128xf32>
    %95 = tpu.concatenate %86, %87, %88, %89, %90, %91, %92, %93, %94 in 1 : vector<128x128xf32>, vector<128x128xf32>, vector<128x128xf32>, vector<128x128xf32>, vector<128x128xf32>, vector<128x128xf32>, vector<128x128xf32>, vector<128x128xf32>, vector<128x128xf32> -> vector<128x1152xf32>
    %c0_88 = arith.constant 0 : index
    %c0_89 = arith.constant 0 : index
    %96 = vector.load %arg4[%c0_88, %c0_89] : memref<1152x32xf32, #tpu.memory_space<vmem>>, vector<1152x32xf32>
    %cst_90 = arith.constant dense<0.000000e+00> : vector<128x32xf32>
    %97 = tpu.matmul %95, %96, %cst_90 {dimension_numbers = #tpu.dot_dimension_numbers<[1], [0], [0], [1], [0, 0, 1, 1], [], []>} : vector<128x1152xf32>, vector<1152x32xf32>, vector<128x32xf32> -> vector<128x32xf32>
    %c0_91 = arith.constant 0 : index
    %c0_92 = arith.constant 0 : index
    %98 = vector.load %arg5[%c0_91, %c0_92] : memref<1x32xf32, #tpu.memory_space<vmem>>, vector<1x32xf32>
    %99 = vector.broadcast %98 : vector<1x32xf32> to vector<128x32xf32>
    %100 = arith.addf %97, %99 : vector<128x32xf32>
    %cst_93 = arith.constant dense<0.000000e+00> : vector<128xf32>
    %101 = vector.multi_reduction <add>, %100, %cst_93 [1] : vector<128x32xf32> to vector<128xf32>
    %102 = vector.shape_cast %101 : vector<128xf32> to vector<128x1xf32>
    %cst_94 = arith.constant 3.200000e+01 : f32
    %103 = vector.broadcast %cst_94 : f32 to vector<128x1xf32>
    %104 = arith.divf %102, %103 : vector<128x1xf32>
    %105 = vector.broadcast %104 : vector<128x1xf32> to vector<128x32xf32>
    %106 = arith.subf %100, %105 : vector<128x32xf32>
    %107 = arith.mulf %106, %106 : vector<128x32xf32>
    %cst_95 = arith.constant dense<0.000000e+00> : vector<128xf32>
    %108 = vector.multi_reduction <add>, %107, %cst_95 [1] : vector<128x32xf32> to vector<128xf32>
    %109 = vector.shape_cast %108 : vector<128xf32> to vector<128x1xf32>
    %cst_96 = arith.constant 3.200000e+01 : f32
    %110 = vector.broadcast %cst_96 : f32 to vector<128x1xf32>
    %111 = arith.divf %109, %110 : vector<128x1xf32>
    %cst_97 = arith.constant 9.99999974E-6 : f32
    %112 = vector.broadcast %cst_97 : f32 to vector<128x1xf32>
    %113 = arith.addf %111, %112 : vector<128x1xf32>
    %114 = math.rsqrt %113 : vector<128x1xf32>
    %115 = vector.broadcast %114 : vector<128x1xf32> to vector<128x32xf32>
    %116 = arith.mulf %106, %115 : vector<128x32xf32>
    %cst_98 = arith.constant 5.000000e-01 : f32
    %117 = vector.broadcast %cst_98 : f32 to vector<128x32xf32>
    %118 = arith.mulf %117, %116 : vector<128x32xf32>
    %cst_99 = arith.constant 4.471500e-02 : f32
    %119 = vector.broadcast %cst_99 : f32 to vector<128x32xf32>
    %120 = arith.mulf %119, %116 : vector<128x32xf32>
    %121 = arith.mulf %120, %116 : vector<128x32xf32>
    %122 = arith.mulf %121, %116 : vector<128x32xf32>
    %123 = arith.addf %116, %122 : vector<128x32xf32>
    %cst_100 = arith.constant 0.797884583 : f32
    %124 = vector.broadcast %cst_100 : f32 to vector<128x32xf32>
    %125 = arith.mulf %124, %123 : vector<128x32xf32>
    %126 = math.tanh %125 : vector<128x32xf32>
    %cst_101 = arith.constant 1.000000e+00 : f32
    %127 = vector.broadcast %cst_101 : f32 to vector<128x32xf32>
    %128 = arith.addf %127, %126 : vector<128x32xf32>
    %129 = arith.mulf %118, %128 : vector<128x32xf32>
    %130 = arith.addf %129, %69 : vector<128x32xf32>
    %c0_102 = arith.constant 0 : index
    %c0_103 = arith.constant 0 : index
    %131 = vector.load %arg6[%c0_102, %c0_103] : memref<32x48xf32, #tpu.memory_space<vmem>>, vector<32x48xf32>
    %cst_104 = arith.constant dense<0.000000e+00> : vector<128x48xf32>
    %132 = tpu.matmul %130, %131, %cst_104 {dimension_numbers = #tpu.dot_dimension_numbers<[1], [0], [0], [1], [0, 0, 1, 1], [], []>} : vector<128x32xf32>, vector<32x48xf32>, vector<128x48xf32> -> vector<128x48xf32>
    %c0_105 = arith.constant 0 : index
    %c0_106 = arith.constant 0 : index
    %133 = vector.load %arg7[%c0_105, %c0_106] : memref<1x48xf32, #tpu.memory_space<vmem>>, vector<1x48xf32>
    %134 = vector.broadcast %133 : vector<1x48xf32> to vector<128x48xf32>
    %135 = arith.addf %132, %134 : vector<128x48xf32>
    %136 = vector.extract_strided_slice %135 {offsets = [0, 0], sizes = [8, 48], strides = [1, 1]} : vector<128x48xf32> to vector<8x48xf32>
    %c0_107 = arith.constant 0 : index
    %c0_108 = arith.constant 0 : index
    %c0_109 = arith.constant 0 : index
    %137 = vector.load %arg8[%c0_107, %c0_108, %c0_109] : memref<1x64x48xf32, #tpu.memory_space<vmem>>, vector<1x8x48xf32>
    %138 = vector.shape_cast %137 : vector<1x8x48xf32> to vector<8x48xf32>
    %139 = vector.shape_cast %136 : vector<8x48xf32> to vector<1x8x48xf32>
    tpu.vector_store %arg8[%c0_107, %c0_108, %c0_109], %139 {strides = array<i32>} : memref<1x64x48xf32, #tpu.memory_space<vmem>>, vector<1x8x48xf32>,
    %140 = vector.extract_strided_slice %135 {offsets = [16, 0], sizes = [8, 48], strides = [1, 1]} : vector<128x48xf32> to vector<8x48xf32>
    %c0_110 = arith.constant 0 : index
    %c8_111 = arith.constant 8 : index
    %c0_112 = arith.constant 0 : index
    %141 = vector.load %arg8[%c0_110, %c8_111, %c0_112] : memref<1x64x48xf32, #tpu.memory_space<vmem>>, vector<1x8x48xf32>
    %142 = vector.shape_cast %141 : vector<1x8x48xf32> to vector<8x48xf32>
    %143 = vector.shape_cast %140 : vector<8x48xf32> to vector<1x8x48xf32>
    tpu.vector_store %arg8[%c0_110, %c8_111, %c0_112], %143 {strides = array<i32>} : memref<1x64x48xf32, #tpu.memory_space<vmem>>, vector<1x8x48xf32>,
    %144 = vector.extract_strided_slice %135 {offsets = [32, 0], sizes = [8, 48], strides = [1, 1]} : vector<128x48xf32> to vector<8x48xf32>
    %c0_113 = arith.constant 0 : index
    %c16_114 = arith.constant 16 : index
    %c0_115 = arith.constant 0 : index
    %145 = vector.load %arg8[%c0_113, %c16_114, %c0_115] : memref<1x64x48xf32, #tpu.memory_space<vmem>>, vector<1x8x48xf32>
    %146 = vector.shape_cast %145 : vector<1x8x48xf32> to vector<8x48xf32>
    %147 = vector.shape_cast %144 : vector<8x48xf32> to vector<1x8x48xf32>
    tpu.vector_store %arg8[%c0_113, %c16_114, %c0_115], %147 {strides = array<i32>} : memref<1x64x48xf32, #tpu.memory_space<vmem>>, vector<1x8x48xf32>,
    %148 = vector.extract_strided_slice %135 {offsets = [48, 0], sizes = [8, 48], strides = [1, 1]} : vector<128x48xf32> to vector<8x48xf32>
    %c0_116 = arith.constant 0 : index
    %c24_117 = arith.constant 24 : index
    %c0_118 = arith.constant 0 : index
    %149 = vector.load %arg8[%c0_116, %c24_117, %c0_118] : memref<1x64x48xf32, #tpu.memory_space<vmem>>, vector<1x8x48xf32>
    %150 = vector.shape_cast %149 : vector<1x8x48xf32> to vector<8x48xf32>
    %151 = vector.shape_cast %148 : vector<8x48xf32> to vector<1x8x48xf32>
    tpu.vector_store %arg8[%c0_116, %c24_117, %c0_118], %151 {strides = array<i32>} : memref<1x64x48xf32, #tpu.memory_space<vmem>>, vector<1x8x48xf32>,
    %152 = vector.extract_strided_slice %135 {offsets = [64, 0], sizes = [8, 48], strides = [1, 1]} : vector<128x48xf32> to vector<8x48xf32>
    %c0_119 = arith.constant 0 : index
    %c32_120 = arith.constant 32 : index
    %c0_121 = arith.constant 0 : index
    %153 = vector.load %arg8[%c0_119, %c32_120, %c0_121] : memref<1x64x48xf32, #tpu.memory_space<vmem>>, vector<1x8x48xf32>
    %154 = vector.shape_cast %153 : vector<1x8x48xf32> to vector<8x48xf32>
    %155 = vector.shape_cast %152 : vector<8x48xf32> to vector<1x8x48xf32>
    tpu.vector_store %arg8[%c0_119, %c32_120, %c0_121], %155 {strides = array<i32>} : memref<1x64x48xf32, #tpu.memory_space<vmem>>, vector<1x8x48xf32>,
    %156 = vector.extract_strided_slice %135 {offsets = [80, 0], sizes = [8, 48], strides = [1, 1]} : vector<128x48xf32> to vector<8x48xf32>
    %c0_122 = arith.constant 0 : index
    %c40_123 = arith.constant 40 : index
    %c0_124 = arith.constant 0 : index
    %157 = vector.load %arg8[%c0_122, %c40_123, %c0_124] : memref<1x64x48xf32, #tpu.memory_space<vmem>>, vector<1x8x48xf32>
    %158 = vector.shape_cast %157 : vector<1x8x48xf32> to vector<8x48xf32>
    %159 = vector.shape_cast %156 : vector<8x48xf32> to vector<1x8x48xf32>
    tpu.vector_store %arg8[%c0_122, %c40_123, %c0_124], %159 {strides = array<i32>} : memref<1x64x48xf32, #tpu.memory_space<vmem>>, vector<1x8x48xf32>,
    %160 = vector.extract_strided_slice %135 {offsets = [96, 0], sizes = [8, 48], strides = [1, 1]} : vector<128x48xf32> to vector<8x48xf32>
    %c0_125 = arith.constant 0 : index
    %c48_126 = arith.constant 48 : index
    %c0_127 = arith.constant 0 : index
    %161 = vector.load %arg8[%c0_125, %c48_126, %c0_127] : memref<1x64x48xf32, #tpu.memory_space<vmem>>, vector<1x8x48xf32>
    %162 = vector.shape_cast %161 : vector<1x8x48xf32> to vector<8x48xf32>
    %163 = vector.shape_cast %160 : vector<8x48xf32> to vector<1x8x48xf32>
    tpu.vector_store %arg8[%c0_125, %c48_126, %c0_127], %163 {strides = array<i32>} : memref<1x64x48xf32, #tpu.memory_space<vmem>>, vector<1x8x48xf32>,
    %164 = vector.extract_strided_slice %135 {offsets = [112, 0], sizes = [8, 48], strides = [1, 1]} : vector<128x48xf32> to vector<8x48xf32>
    %c0_128 = arith.constant 0 : index
    %c56_129 = arith.constant 56 : index
    %c0_130 = arith.constant 0 : index
    %165 = vector.load %arg8[%c0_128, %c56_129, %c0_130] : memref<1x64x48xf32, #tpu.memory_space<vmem>>, vector<1x8x48xf32>
    %166 = vector.shape_cast %165 : vector<1x8x48xf32> to vector<8x48xf32>
    %167 = vector.shape_cast %164 : vector<8x48xf32> to vector<1x8x48xf32>
    tpu.vector_store %arg8[%c0_128, %c56_129, %c0_130], %167 {strides = array<i32>} : memref<1x64x48xf32, #tpu.memory_space<vmem>>, vector<1x8x48xf32>,
    return
  }
  func.func @transform_0(%arg0: i32) -> (i32, i32, i32) {
    %c0_i32 = arith.constant 0 : i32
    %c0_i32_0 = arith.constant 0 : i32
    %c0_i32_1 = arith.constant 0 : i32
    return %arg0, %c0_i32, %c0_i32_0 : i32, i32, i32
  }
  func.func @transform_1(%arg0: i32) -> (i32, i32) {
    %c0_i32 = arith.constant 0 : i32
    %c0_i32_0 = arith.constant 0 : i32
    %c0_i32_1 = arith.constant 0 : i32
    return %c0_i32, %c0_i32_0 : i32, i32
  }
  func.func @transform_2(%arg0: i32) -> (i32, i32) {
    %c0_i32 = arith.constant 0 : i32
    %c0_i32_0 = arith.constant 0 : i32
    %c0_i32_1 = arith.constant 0 : i32
    return %c0_i32, %c0_i32_0 : i32, i32
  }
  func.func @transform_3(%arg0: i32) -> (i32, i32) {
    %c0_i32 = arith.constant 0 : i32
    %c0_i32_0 = arith.constant 0 : i32
    %c0_i32_1 = arith.constant 0 : i32
    return %c0_i32, %c0_i32_0 : i32, i32
  }
  func.func @transform_4(%arg0: i32) -> (i32, i32) {
    %c0_i32 = arith.constant 0 : i32
    %c0_i32_0 = arith.constant 0 : i32
    %c0_i32_1 = arith.constant 0 : i32
    return %c0_i32, %c0_i32_0 : i32, i32
  }
  func.func @transform_5(%arg0: i32) -> (i32, i32) {
    %c0_i32 = arith.constant 0 : i32
    %c0_i32_0 = arith.constant 0 : i32
    %c0_i32_1 = arith.constant 0 : i32
    return %c0_i32, %c0_i32_0 : i32, i32
  }
  func.func @transform_6(%arg0: i32) -> (i32, i32) {
    %c0_i32 = arith.constant 0 : i32
    %c0_i32_0 = arith.constant 0 : i32
    %c0_i32_1 = arith.constant 0 : i32
    return %c0_i32, %c0_i32_0 : i32, i32
  }
  func.func @transform_7(%arg0: i32) -> (i32, i32, i32) {
    %c0_i32 = arith.constant 0 : i32
    %c0_i32_0 = arith.constant 0 : i32
    %c0_i32_1 = arith.constant 0 : i32
    return %arg0, %c0_i32, %c0_i32_0 : i32, i32, i32
  }
}

</mosaic_0001>

<bundles_post_ra>
// kernel: decoder2d_forward.1
= control target key start
LH: loop header
LB: loop body
LE: loop exit
PB: predicated region body
PF: predicated region fallthrough
CT: control target
= control target key end

     0   :  { %s4598_s24 = smov 0   ;;  %s6867_s0 = inlined_call_operand.vmem [shape: f32[2,64,48], index: 0, kind: input, shape index: {}]   ;;  %s6868_s1 = inlined_call_operand.vmem [shape: f32[1152,32], index: 1, kind: input, shape index: {}]   ;;  %s6869_s2 = inlined_call_operand.vmem [shape: f32[1,32], index: 2, kind: input, shape index: {}]   ;;  %s6870_s3 = inlined_call_operand.vmem [shape: f32[1152,32], index: 3, kind: input, shape index: {}]   ;;  %s6871_s4 = inlined_call_operand.vmem [shape: f32[1,32], index: 4, kind: input, shape index: {}]   ;;  %s6872_s5 = inlined_call_operand.vmem [shape: f32[32,48], index: 5, kind: input, shape index: {}]   ;;  %s6873_s6 = inlined_call_operand.vmem [shape: f32[1,48], index: 6, kind: input, shape index: {}]   ;;  %s6874_s7 = inlined_call_operand.vmem [shape: f32[2,64,48], index: 7, kind: output, shape index: {}]  }
   0x1 LB: > { %s3178_s25 = sadd.s32 4294967295, %s4555_s24   ;;  %p3182_p0 = scmp.ge.s32.totalorder %s4555_s24, 1  ;;  %s4555_s24 = sphi %s4598_s24, %s17_s24  }
   0x2   : > { %p237_p1 = scmp.lt.s32.totalorder %s4555_s24, 3 }
   0x4   : > { %p238_p2 = pnand %p3182_p0, %p237_p1 }
   0x5   : > { %v393_v0 = vld [vmem:[%s6868_s1 + $0x80] sm:$0xff] (!%p238_p2)  ;;  %v394_v1 = vld [vmem:[%s6868_s1 + $0x88] sm:$0xff] (!%p238_p2)  ;;  %v4557_v7 = vmov (!%p238_p2), 0.0   ;;  %v395_v12 = vld [vmem:[%s6868_s1 + $0x90] sm:$0xff] (!%p238_p2)  ;;  %p4710_p3 = scmp.lt.s32.totalorder (!%p238_p2), %s3178_s25, 1  ;;  %vm301_vm0 = vcmask (!%p238_p2), 392192  }
   0x6   : > { %241 = sbr.rel (%p238_p2) target bundleno = 1658 (0x67a), region = 48  ;;  %v377_v2 = vld [vmem:[%s6868_s1] sm:$0xff] (!%p238_p2)  ;;  %v4078_v3 = vpack.c.bf16 (!%p238_p2), %v394_v1, %v393_v0  ;;  %v378_v4 = vld [vmem:[%s6868_s1 + $0x8] sm:$0xff] (!%p238_p2)  ;;  %279 = vst [vmem:[#allocation2] sm:$0xff] (!%p238_p2), %v4557_v7  ;;  %280 = vst [vmem:[#allocation2 + $0x8] sm:$0xff] (!%p238_p2), %v4557_v7  ;;  %vm1253_vm1 = vcmask (!%p238_p2), 261120  }
   0x7   : > { %v425_v5 = vld [vmem:[%s6868_s1 + $0x180] sm:$0xff] (!%p238_p2)  ;;  %v426_v6 = vld [vmem:[%s6868_s1 + $0x188] sm:$0xff] (!%p238_p2)  ;;  %281 = vst [vmem:[#allocation2 + $0x10] sm:$0xff] (!%p238_p2), %v4557_v7  ;;  %282 = vst [vmem:[#allocation2 + $0x18] sm:$0xff] (!%p238_p2), %v4557_v7  ;;  %v4080_v8 = vpack.c.bf16 (!%p238_p2), %v378_v4, %v377_v2 }
   0x8   : > { %283 = vst [vmem:[#allocation2 + $0x20] sm:$0xff] (!%p238_p2), %v4557_v7  ;;  %284 = vst [vmem:[#allocation2 + $0x28] sm:$0xff] (!%p238_p2), %v4557_v7  ;;  %v4110_v9 = vpack.c.bf16 (!%p238_p2), %v426_v6, %v425_v5  ;;  %v409_v10 = vld [vmem:[%s6868_s1 + $0x100] sm:$0xff] (!%p238_p2)  ;;  %v410_v11 = vld [vmem:[%s6868_s1 + $0x108] sm:$0xff] (!%p238_p2)  ;;  %4079 = vmatprep.subr.bf16.mxu0 (!%p238_p2), %v4078_v3 }
   0x9   : > { %285 = vst [vmem:[#allocation2 + $0x30] sm:$0xff] (!%p238_p2), %v4557_v7  ;;  %286 = vst [vmem:[#allocation2 + $0x38] sm:$0xff] (!%p238_p2), %v4557_v7  ;;  %v4112_v13 = vpack.c.bf16 (!%p238_p2), %v410_v11, %v409_v10  ;;  %v396_v14 = vld [vmem:[%s6868_s1 + $0x98] sm:$0xff] (!%p238_p2)  ;;  %v379_v15 = vld [vmem:[%s6868_s1 + $0x10] sm:$0xff] (!%p238_p2)  ;;  %4081 = vmatpush3.bf16.msra.mxu0 (!%p238_p2), %v4080_v8 }
   0xa   : > { %287 = vst [vmem:[#allocation2 + $0x40] sm:$0xff] (!%p238_p2), %v4557_v7  ;;  %288 = vst [vmem:[#allocation2 + $0x48] sm:$0xff] (!%p238_p2), %v4557_v7  ;;  %v380_v16 = vld [vmem:[%s6868_s1 + $0x18] sm:$0xff] (!%p238_p2)  ;;  %4111 = vmatprep.subr.bf16.mxu1 (!%p238_p2), %v4110_v9  ;;  %v4082_v17 = vpack.c.bf16 (!%p238_p2), %v396_v14, %v395_v12  ;;  %v427_v19 = vld [vmem:[%s6868_s1 + $0x190] sm:$0xff] (!%p238_p2) }
   0xb   : > { %289 = vst [vmem:[#allocation2 + $0x50] sm:$0xff] (!%p238_p2), %v4557_v7  ;;  %290 = vst [vmem:[#allocation2 + $0x58] sm:$0xff] (!%p238_p2), %v4557_v7  ;;  %v4084_v18 = vpack.c.bf16 (!%p238_p2), %v380_v16, %v379_v15  ;;  %v428_v20 = vld [vmem:[%s6868_s1 + $0x198] sm:$0xff] (!%p238_p2)  ;;  %v411_v21 = vld [vmem:[%s6868_s1 + $0x110] sm:$0xff] (!%p238_p2)  ;;  %4113 = vmatpush3.bf16.msra.mxu1 (!%p238_p2), %v4112_v13 }
   0xc   : > { %291 = vst [vmem:[#allocation2 + $0x60] sm:$0xff] (!%p238_p2), %v4557_v7  ;;  %292 = vst [vmem:[#allocation2 + $0x68] sm:$0xff] (!%p238_p2), %v4557_v7  ;;  %v4114_v22 = vpack.c.bf16 (!%p238_p2), %v428_v20, %v427_v19  ;;  %v412_v23 = vld [vmem:[%s6868_s1 + $0x118] sm:$0xff] (!%p238_p2)  ;;  %v397_v24 = vld [vmem:[%s6868_s1 + $0xa0] sm:$0xff] (!%p238_p2)  ;;  %4083 = vmatprep.subr.bf16.mxu0 (!%p238_p2), %v4082_v17 }
   0xd   : > { %293 = vst [vmem:[#allocation2 + $0x70] sm:$0xff] %v4557_v7  ;;  %294 = vst [vmem:[#allocation2 + $0x78] sm:$0xff] %v4557_v7  ;;  %v398_v25 = vld [vmem:[%s6868_s1 + $0xa8] sm:$0xff]  ;;  %v4116_v26 = vpack.c.bf16 %v412_v23, %v411_v21  ;;  %v381_v28 = vld [vmem:[%s6868_s1 + $0x20] sm:$0xff]  ;;  %4085 = vmatpush3.bf16.msra.mxu0 %v4084_v18  ;;  %s6877_s25 = smov (!%p4710_p3, %s3178_s25), 1 }
   0xe   : > { %295 = vst [vmem:[#allocation2 + $0x80] sm:$0xff] %v4557_v7  ;;  %296 = vst [vmem:[#allocation2 + $0x88] sm:$0xff] %v4557_v7  ;;  %v4086_v27 = vpack.c.bf16 %v398_v25, %v397_v24  ;;  %v382_v29 = vld [vmem:[%s6868_s1 + $0x28] sm:$0xff]  ;;  %v429_v30 = vld [vmem:[%s6868_s1 + $0x1a0] sm:$0xff]  ;;  %4115 = vmatprep.subr.bf16.mxu1 %v4114_v22  ;;  %s3208_s8 = sshll.u32 %s6877_s25, 6 }
   0xf   : > { %297 = vst [vmem:[#allocation2 + $0x90] sm:$0xff] %v4557_v7  ;;  %298 = vst [vmem:[#allocation2 + $0x98] sm:$0xff] %v4557_v7  ;;  %v430_v31 = vld [vmem:[%s6868_s1 + $0x1a8] sm:$0xff]  ;;  %v413_v32 = vld [vmem:[%s6868_s1 + $0x120] sm:$0xff]  ;;  %v4088_v34 = vpack.c.bf16 %v382_v29, %v381_v28  ;;  %4117 = vmatpush3.bf16.msra.mxu1 %v4116_v26  ;;  %s4801_s29 = scalar_lea.vmem %s6867_s0, %s3208_s8 }
  0x10   : > { %299 = vst [vmem:[#allocation2 + $0xa0] sm:$0xff] %v4557_v7  ;;  %v414_v33 = vld [vmem:[%s6868_s1 + $0x128] sm:$0xff]  ;;  %v4118_v35 = vpack.c.bf16 %v430_v31, %v429_v30  ;;  %v399_v36 = vld [vmem:[%s6868_s1 + $0xb0] sm:$0xff]  ;;  %v400_v37 = vld [vmem:[%s6868_s1 + $0xb8] sm:$0xff]  ;;  %4087 = vmatprep.subr.bf16.mxu0 %v4086_v27 }
  0x11   : > { %v383_v38 = vld [vmem:[%s6868_s1 + $0x30] sm:$0xff]  ;;  %v4120_v39 = vpack.c.bf16 %v414_v33, %v413_v32  ;;  %v4090_v40 = vpack.c.bf16 %v400_v37, %v399_v36  ;;  %v384_v41 = vld [vmem:[%s6868_s1 + $0x38] sm:$0xff]  ;;  %v401_v47 = vld [vmem:[%s6868_s1 + $0xc0] sm:$0xff]  ;;  %4089 = vmatpush3.bf16.msra.mxu0 %v4088_v34 }
  0x12   : > { %v431_v42 = vld [vmem:[%s6868_s1 + $0x1b0] sm:$0xff]  ;;  %v432_v43 = vld [vmem:[%s6868_s1 + $0x1b8] sm:$0xff]  ;;  %4119 = vmatprep.subr.bf16.mxu1 %v4118_v35  ;;  %v402_v48 = vld [vmem:[%s6868_s1 + $0xc8] sm:$0xff]  ;;  %v4092_v49 = vpack.c.bf16 %v384_v41, %v383_v38 }
  0x13   : > { %v4122_v44 = vpack.c.bf16 %v432_v43, %v431_v42  ;;  %v415_v45 = vld [vmem:[%s6868_s1 + $0x130] sm:$0xff]  ;;  %v416_v46 = vld [vmem:[%s6868_s1 + $0x138] sm:$0xff]  ;;  %v433_v50 = vld [vmem:[%s6868_s1 + $0x1c0] sm:$0xff]  ;;  %4121 = vmatpush3.bf16.msra.mxu1 %v4120_v39  ;;  %4091 = vmatprep.subr.bf16.mxu0 %v4090_v40  ;;  %v4094_v53 = vpack.c.bf16 %v402_v48, %v401_v47 }
  0x14   : > { %v434_v51 = vld [vmem:[%s6868_s1 + $0x1c8] sm:$0xff]  ;;  %v4124_v52 = vpack.c.bf16 %v416_v46, %v415_v45  ;;  %v385_v54 = vld [vmem:[%s6868_s1 + $0x40] sm:$0xff]  ;;  %v403_v59 = vld [vmem:[%s6868_s1 + $0xd0] sm:$0xff] }
  0x15   : > { %v386_v55 = vld [vmem:[%s6868_s1 + $0x48] sm:$0xff]  ;;  %v417_v56 = vld [vmem:[%s6868_s1 + $0x140] sm:$0xff]  ;;  %4123 = vmatprep.subr.bf16.mxu1 %v4122_v44  ;;  %v4126_v57 = vpack.c.bf16 %v434_v51, %v433_v50  ;;  %v404_v60 = vld [vmem:[%s6868_s1 + $0xd8] sm:$0xff]  ;;  %4093 = vmatpush3.bf16.msra.mxu0 %v4092_v49 }
  0x16   : > { %v418_v58 = vld [vmem:[%s6868_s1 + $0x148] sm:$0xff]  ;;  %v435_v61 = vld [vmem:[%s6868_s1 + $0x1d0] sm:$0xff]  ;;  %v436_v62 = vld [vmem:[%s6868_s1 + $0x1d8] sm:$0xff]  ;;  %v4096_v63 = vpack.c.bf16 %v386_v55, %v385_v54  ;;  %4095 = vmatprep.subr.bf16.mxu0 %v4094_v53  ;;  %v4098_v1 = vpack.c.bf16 %v404_v60, %v403_v59 }
  0x17   : > { %4125 = vmatpush3.bf16.msra.mxu1 %v4124_v52  ;;  %v4128_v0 = vpack.c.bf16 %v418_v58, %v417_v56  ;;  %v387_v2 = vld [vmem:[%s6868_s1 + $0x50] sm:$0xff]  ;;  %v388_v3 = vld [vmem:[%s6868_s1 + $0x58] sm:$0xff]  ;;  %v4130_v5 = vpack.c.bf16 %v436_v62, %v435_v61  ;;  %v405_v8 = vld [vmem:[%s6868_s1 + $0xe0] sm:$0xff] }
  0x18   : > { %v419_v4 = vld [vmem:[%s6868_s1 + $0x150] sm:$0xff]  ;;  %4127 = vmatprep.subr.bf16.mxu1 %v4126_v57  ;;  %v420_v6 = vld [vmem:[%s6868_s1 + $0x158] sm:$0xff]  ;;  %v406_v9 = vld [vmem:[%s6868_s1 + $0xe8] sm:$0xff]  ;;  %v4100_v12 = vpack.c.bf16 %v388_v3, %v387_v2 }
  0x19   : > { %v437_v10 = vld [vmem:[%s6868_s1 + $0x1e0] sm:$0xff]  ;;  %v438_v11 = vld [vmem:[%s6868_s1 + $0x1e8] sm:$0xff]  ;;  %4097 = vmatpush3.bf16.msra.mxu0 %v4096_v63  ;;  %v4132_v15 = vpack.c.bf16 %v420_v6, %v419_v4  ;;  %v4102_v16 = vpack.c.bf16 %v406_v9, %v405_v8  ;;  %v407_v21 = vld [vmem:[%s6868_s1 + $0xf0] sm:$0xff] }
  0x1a   : > { %v389_v13 = vld [vmem:[%s6868_s1 + $0x60] sm:$0xff]  ;;  %4099 = vmatprep.subr.bf16.mxu0 %v4098_v1  ;;  %v390_v17 = vld [vmem:[%s6868_s1 + $0x68] sm:$0xff]  ;;  %v4134_v20 = vpack.c.bf16 %v438_v11, %v437_v10  ;;  %v408_v22 = vld [vmem:[%s6868_s1 + $0xf8] sm:$0xff] }
  0x1b   : > { %v333_v14 = vld [vmem:[#allocation2 + $0x1] sm:$0xff]  ;;  %4129 = vmatpush3.bf16.msra.mxu1 %v4128_v0  ;;  %v439_v24 = vld [vmem:[%s6868_s1 + $0x1f0] sm:$0xff]  ;;  %v440_v25 = vld [vmem:[%s6868_s1 + $0x1f8] sm:$0xff]  ;;  %v4104_v26 = vpack.c.bf16 %v390_v17, %v389_v13  ;;  %v4106_v30 = vpack.c.bf16 %v408_v22, %v407_v21 }
  0x1c   : > { %v421_v18 = vld [vmem:[%s6868_s1 + $0x160] sm:$0xff]  ;;  %v422_v19 = vld [vmem:[%s6868_s1 + $0x168] sm:$0xff]  ;;  %4131 = vmatprep.subr.bf16.mxu1 %v4130_v5  ;;  %592 = vmatprep.mubr.f32.mxu0 %v333_v14  ;;  %v391_v27 = vld [vmem:[%s6868_s1 + $0x70] sm:$0xff]  ;;  %v4138_v34 = vpack.c.bf16 %v440_v25, %v439_v24 }
  0x1d   : > { %v300_v23 = vld [vmem:[%s4801_s29] sm:$0xff]  ;;  %4101 = vmatpush3.bf16.msra.mxu0 %v4100_v12  ;;  %v303_v28 = vld [vmem:[%s4801_s29 + $0x8] sm:$0xff]  ;;  %v4136_v29 = vpack.c.bf16 %v422_v19, %v421_v18  ;;  %v392_v31 = vld [vmem:[%s6868_s1 + $0x78] sm:$0xff] }
  0x1e   : > { %302 = vst.msk [vmem:[#allocation2 + $0x11] sm:$0xff] %vm301_vm0, %v300_v23  ;;  %4103 = vmatprep.subr.bf16.mxu0 %v4102_v16  ;;  %v423_v32 = vld [vmem:[%s6868_s1 + $0x170] sm:$0xff]  ;;  %v424_v33 = vld [vmem:[%s6868_s1 + $0x178] sm:$0xff]  ;;  %304 = vst.msk [vmem:[#allocation2 + $0x21] sm:$0xff] %vm301_vm0, %v303_v28  ;;  %v4108_v38 = vpack.c.bf16 %v392_v31, %v391_v27 }
  0x1f   : > { %4133 = vmatpush3.bf16.msra.mxu1 %v4132_v15  ;;  %v457_v35 = vld [vmem:[%s6868_s1 + $0x280] sm:$0xff]  ;;  %v458_v36 = vld [vmem:[%s6868_s1 + $0x288] sm:$0xff]  ;;  %v305_v37 = vld [vmem:[%s4801_s29 + $0x10] sm:$0xff]  ;;  %v4140_v40 = vpack.c.bf16 %v424_v33, %v423_v32 }
  0x20   : > { %4135 = vmatprep.subr.bf16.mxu1 %v4134_v20  ;;  %306 = vst.msk [vmem:[#allocation2 + $0x31] sm:$0xff] %vm301_vm0, %v305_v37  ;;  %v307_v39 = vld [vmem:[%s4801_s29 + $0x18] sm:$0xff]  ;;  %v4142_v41 = vpack.c.bf16 %v458_v36, %v457_v35  ;;  %v441_v42 = vld [vmem:[%s6868_s1 + $0x200] sm:$0xff]  ;;  %v442_v43 = vld [vmem:[%s6868_s1 + $0x208] sm:$0xff] }
  0x21   : > { %4105 = vmatpush3.bf16.msra.mxu0 %v4104_v26  ;;  %308 = vst.msk [vmem:[#allocation2 + $0x41] sm:$0xff] %vm301_vm0, %v307_v39  ;;  %v459_v45 = vld [vmem:[%s6868_s1 + $0x290] sm:$0xff]  ;;  %v460_v46 = vld [vmem:[%s6868_s1 + $0x298] sm:$0xff]  ;;  %v4144_v47 = vpack.c.bf16 %v442_v43, %v441_v42  ;;  %v349_v48 = vld [vmem:[#allocation2 + $0x2] sm:$0xff] }
  0x22   : > { %4107 = vmatprep.subr.bf16.mxu0 %v4106_v30  ;;  %v334_v49 = vld [vmem:[#allocation2 + $0x9] sm:$0xff]  ;;  %v4146_v51 = vpack.c.bf16 %v460_v46, %v459_v45  ;;  %v444_v53 = vld [vmem:[%s6868_s1 + $0x218] sm:$0xff]  ;;  %v461_v54 = vld [vmem:[%s6868_s1 + $0x2a0] sm:$0xff] }
  0x23   : > { %4137 = vmatpush3.bf16.msra.mxu1 %v4136_v29  ;;  %v443_v52 = vld [vmem:[%s6868_s1 + $0x210] sm:$0xff]  ;;  %v462_v55 = vld [vmem:[%s6868_s1 + $0x2a8] sm:$0xff]  ;;  %v309_v56 = vld [vmem:[%s4801_s29 + $0x20] sm:$0xff] }
  0x24   : > { %4139 = vmatprep.subr.bf16.mxu1 %v4138_v34  ;;  %v445_v57 = vld [vmem:[%s6868_s1 + $0x220] sm:$0xff]  ;;  %v446_v58 = vld [vmem:[%s6868_s1 + $0x228] sm:$0xff]  ;;  %310 = vst.msk [vmem:[#allocation2 + $0x51] sm:$0xff] %vm301_vm0, %v309_v56  ;;  %v4148_v61 = vpack.c.bf16 %v444_v53, %v443_v52  ;;  %v463_v62 = vld [vmem:[%s6868_s1 + $0x2b0] sm:$0xff]  ;;  %v4150_v0 = vpack.c.bf16 %v462_v55, %v461_v54 }
  0x25   : > { %v319_v44 = vld [vmem:[#allocation2 + $0x10] sm:$0xff]  ;;  %4109 = vmatpush3.bf16.msra.mxu0 %v4108_v38  ;;  %v4865_v50 = vld [vmem:[#allocation2 + $0x18] sm:$0xff]  ;;  %v4894_v63 = vld [vmem:[#allocation2 + $0x20] sm:$0xff]  ;;  %v4152_v14 = vpack.c.bf16 %v446_v58, %v445_v57 }
  0x26   : > { %737 = vmatprep.mubr.f32.mxu1 %v319_v44  ;;  %4143 = vmatprep.subr.bf16.mxu0 %v4142_v41  ;;  %v350_v59 = vld [vmem:[#allocation2 + $0xa] sm:$0xff]  ;;  %v489_v1 = vld [vmem:[%s6868_s1 + $0x380] sm:$0xff]  ;;  %v464_v4 = vld [vmem:[%s6868_s1 + $0x2b8] sm:$0xff] }
  0x27   : > { %4141 = vmatpush3.bf16.msra.mxu1 %v4140_v40  ;;  %v4889_v60 = vld [vmem:[#allocation2 + $0x11] sm:$0xff]  ;;  %v490_v2 = vld [vmem:[%s6868_s1 + $0x388] sm:$0xff]  ;;  %v4903_v3 = vld [vmem:[#allocation2 + $0x19] sm:$0xff]  ;;  %v4154_v18 = vpack.c.bf16 %v464_v4, %v463_v62 }
  0x28   : > { %593 = vmatmul.mubr.f32.vlgmr.msra.gmra.mrb[0].mxu0 %v4557_v7  ;;  %v4174_v5 = vpack.c.bf16 %v490_v2, %v489_v1  ;;  %v473_v6 = vld [vmem:[%s6868_s1 + $0x300] sm:$0xff]  ;;  %v474_v8 = vld [vmem:[%s6868_s1 + $0x308] sm:$0xff]  ;;  %v491_v10 = vld [vmem:[%s6868_s1 + $0x390] sm:$0xff] }
  0x29   : > { %4145 = vmatpush3.bf16.msra.mxu0 %v4144_v47  ;;  %597 = vmatprep.mubr.f32.mxu0 %v334_v49  ;;  %v4176_v9 = vpack.c.bf16 %v474_v8, %v473_v6  ;;  %v492_v11 = vld [vmem:[%s6868_s1 + $0x398] sm:$0xff]  ;;  %v475_v12 = vld [vmem:[%s6868_s1 + $0x310] sm:$0xff]  ;;  %v4933_v17 = vld [vmem:[#allocation2 + $0x28] sm:$0xff] }
  0x2a   : > { %738 = vmatmul.mubr.f32.vlgmr.msra.gmra.mrb[0].mxu1 %v349_v48  ;;  %4147 = vmatprep.subr.bf16.mxu0 %v4146_v51  ;;  %v4925_v13 = vld [vmem:[#allocation2 + $0x12] sm:$0xff]  ;;  %v4178_v20 = vpack.c.bf16 %v492_v11, %v491_v10  ;;  %v311_v21 = vld [vmem:[%s4801_s29 + $0x28] sm:$0xff]  ;;  %v4939_v22 = vld [vmem:[#allocation2 + $0x1a] sm:$0xff] }
  0x2b   : > { %742 = vmatprep.mubr.f32.mxu1 %v4865_v50  ;;  %v447_v15 = vld [vmem:[%s6868_s1 + $0x230] sm:$0xff]  ;;  %v476_v16 = vld [vmem:[%s6868_s1 + $0x318] sm:$0xff]  ;;  %4175 = vmatprep.subr.bf16.mxu1 %v4174_v5  ;;  %v465_v23 = vld [vmem:[%s6868_s1 + $0x2c0] sm:$0xff]  ;;  %312 = vst.msk [vmem:[#allocation2 + $0x61] sm:$0xff] %vm301_vm0, %v311_v21 }
  0x2c   : > { %598 = vmatmul.mubr.f32.gmra.mrb[2].mxu0 %v4557_v7  ;;  %v448_v19 = vld [vmem:[%s6868_s1 + $0x238] sm:$0xff]  ;;  %v466_v24 = vld [vmem:[%s6868_s1 + $0x2c8] sm:$0xff]  ;;  %4177 = vmatpush3.bf16.msra.mxu1 %v4176_v9  ;;  %v4180_v25 = vpack.c.bf16 %v476_v16, %v475_v12  ;;  %v4952_v27 = vld [vmem:[#allocation2 + $0x30] sm:$0xff] }
  0x2d   : > { %602 = vmatprep.mubr.f32.mxu0 %v4889_v60  ;;  %4149 = vmatpush3.bf16.msra.mxu0 %v4148_v61  ;;  %v4950_v26 = vld [vmem:[#allocation2 + $0x21] sm:$0xff]  ;;  %v4156_v29 = vpack.c.bf16 %v448_v19, %v447_v15  ;;  %v4158_v33 = vpack.c.bf16 %v466_v24, %v465_v23  ;;  %v467_v35 = vld [vmem:[%s6868_s1 + $0x2d0] sm:$0xff]  ;;  %v468_v38 = vld [vmem:[%s6868_s1 + $0x2d8] sm:$0xff] }
  0x2e   : > { %743 = vmatmul.mubr.f32.gmra.mrb[2].mxu1 %v350_v59  ;;  %4151 = vmatprep.subr.bf16.mxu0 %v4150_v0  ;;  %v493_v28 = vld [vmem:[%s6868_s1 + $0x3a0] sm:$0xff]  ;;  %v494_v31 = vld [vmem:[%s6868_s1 + $0x3a8] sm:$0xff]  ;;  %v495_v40 = vld [vmem:[%s6868_s1 + $0x3b0] sm:$0xff]  ;;  %v4162_v49 = vpack.c.bf16 %v468_v38, %v467_v35 }
  0x2f   : > { %747 = vmatprep.mubr.f32.mxu1 %v4894_v63  ;;  %v449_v30 = vld [vmem:[%s6868_s1 + $0x240] sm:$0xff]  ;;  %v450_v34 = vld [vmem:[%s6868_s1 + $0x248] sm:$0xff]  ;;  %4179 = vmatprep.subr.bf16.mxu1 %v4178_v20  ;;  %v4182_v36 = vpack.c.bf16 %v494_v31, %v493_v28  ;;  %v496_v41 = vld [vmem:[%s6868_s1 + $0x3b8] sm:$0xff] }
  0x30   : > { %603 = vmatmul.mubr.f32.gmra.mrb[4].mxu0 %v319_v44  ;;  %v477_v32 = vld [vmem:[%s6868_s1 + $0x320] sm:$0xff]  ;;  %v478_v37 = vld [vmem:[%s6868_s1 + $0x328] sm:$0xff]  ;;  %4181 = vmatpush3.bf16.msra.mxu1 %v4180_v25  ;;  %v479_v42 = vld [vmem:[%s6868_s1 + $0x330] sm:$0xff]  ;;  %v4160_v48 = vpack.c.bf16 %v450_v34, %v449_v30  ;;  %v4186_v52 = vpack.c.bf16 %v496_v41, %v495_v40 }
  0x31   : > { %607 = vmatprep.mubr.f32.mxu0 %v4903_v3  ;;  %4153 = vmatpush3.bf16.msra.mxu0 %v4152_v14  ;;  %v4184_v39 = vpack.c.bf16 %v478_v37, %v477_v32  ;;  %v480_v43 = vld [vmem:[%s6868_s1 + $0x338] sm:$0xff]  ;;  %v313_v44 = vld [vmem:[%s4801_s29 + $0x30] sm:$0xff]  ;;  %v4996_v45 = vld [vmem:[#allocation2 + $0x22] sm:$0xff] }
  0x32   : > { %748 = vmatmul.mubr.f32.gmra.mrb[4].mxu1 %v4925_v13  ;;  %4155 = vmatprep.subr.bf16.mxu0 %v4154_v18  ;;  %v4998_v46 = vld [vmem:[#allocation2 + $0x29] sm:$0xff]  ;;  %v5000_v47 = vld [vmem:[#allocation2 + $0x38] sm:$0xff]  ;;  %314 = vst.msk [vmem:[#allocation2 + $0x71] sm:$0xff] %vm301_vm0, %v313_v44  ;;  %v469_v53 = vld [vmem:[%s6868_s1 + $0x2e0] sm:$0xff]  ;;  %v4188_v54 = vpack.c.bf16 %v480_v43, %v479_v42 }
  0x33   : > { %752 = vmatprep.mubr.f32.mxu1 %v4933_v17  ;;  %v452_v51 = vld [vmem:[%s6868_s1 + $0x258] sm:$0xff]  ;;  %4183 = vmatprep.subr.bf16.mxu1 %v4182_v36  ;;  %v470_v55 = vld [vmem:[%s6868_s1 + $0x2e8] sm:$0xff]  ;;  %v497_v56 = vld [vmem:[%s6868_s1 + $0x3c0] sm:$0xff] }
  0x34   : > { %608 = vmatmul.mubr.f32.gmra.mrb[6].mxu0 %v4865_v50  ;;  %v451_v50 = vld [vmem:[%s6868_s1 + $0x250] sm:$0xff]  ;;  %4185 = vmatpush3.bf16.msra.mxu1 %v4184_v39  ;;  %v498_v57 = vld [vmem:[%s6868_s1 + $0x3c8] sm:$0xff]  ;;  %v481_v59 = vld [vmem:[%s6868_s1 + $0x340] sm:$0xff]  ;;  %v4166_v4 = vpack.c.bf16 %v470_v55, %v469_v53 }
  0x35   : > { %612 = vmatprep.mubr.f32.mxu0 %v4950_v26  ;;  %4157 = vmatpush3.bf16.msra.mxu0 %v4156_v29  ;;  %v5024_v58 = vld [vmem:[#allocation2 + $0x2a] sm:$0xff]  ;;  %v5035_v0 = vld [vmem:[#allocation2 + $0x40] sm:$0xff]  ;;  %v4164_v1 = vpack.c.bf16 %v452_v51, %v451_v50  ;;  %v4190_v6 = vpack.c.bf16 %v498_v57, %v497_v56  ;;  %v315_v9 = vld [vmem:[%s4801_s29 + $0x38] sm:$0xff]  ;;  %s6846_s29 = scalar_lea.vmem %s6874_s7, %s3208_s8 }
  0x36   : > { %753 = vmatmul.mubr.f32.gmra.mrb[6].mxu1 %v4939_v22  ;;  %4159 = vmatprep.subr.bf16.mxu0 %v4158_v33  ;;  %v482_v61 = vld [vmem:[%s6868_s1 + $0x348] sm:$0xff]  ;;  %v5033_v62 = vld [vmem:[#allocation2 + $0x31] sm:$0xff]  ;;  %v453_v2 = vld [vmem:[%s6868_s1 + $0x260] sm:$0xff]  ;;  %316 = vst.msk [vmem:[#allocation2 + $0x81] sm:$0xff] %vm301_vm0, %v315_v9 }
  0x37   : > { %757 = vmatprep.mubr.f32.mxu1 %v4952_v27  ;;  %4187 = vmatprep.subr.bf16.mxu1 %v4186_v52  ;;  %v454_v5 = vld [vmem:[%s6868_s1 + $0x268] sm:$0xff]  ;;  %v499_v8 = vld [vmem:[%s6868_s1 + $0x3d0] sm:$0xff]  ;;  %v4192_v10 = vpack.c.bf16 %v482_v61, %v481_v59  ;;  %v500_v11 = vld [vmem:[%s6868_s1 + $0x3d8] sm:$0xff] }
  0x38   : > { %613 = vmatmul.mubr.f32.gmra.mrb[8].mxu0 %v4894_v63  ;;  %4189 = vmatpush3.bf16.msra.mxu1 %v4188_v54  ;;  %v471_v12 = vld [vmem:[%s6868_s1 + $0x2f0] sm:$0xff]  ;;  %v472_v14 = vld [vmem:[%s6868_s1 + $0x2f8] sm:$0xff]  ;;  %v4168_v20 = vpack.c.bf16 %v454_v5, %v453_v2  ;;  %v5071_v21 = vld [vmem:[#allocation2 + $0x48] sm:$0xff]  ;;  %v4194_v23 = vpack.c.bf16 %v500_v11, %v499_v8 }
  0x39   : > { %617 = vmatprep.mubr.f32.mxu0 %v4998_v46  ;;  %4161 = vmatpush3.bf16.msra.mxu0 %v4160_v48  ;;  %v483_v15 = vld [vmem:[%s6868_s1 + $0x350] sm:$0xff]  ;;  %v484_v16 = vld [vmem:[%s6868_s1 + $0x358] sm:$0xff]  ;;  %v4170_v24 = vpack.c.bf16 %v472_v14, %v471_v12  ;;  %v501_v30 = vld [vmem:[%s6868_s1 + $0x3e0] sm:$0xff] }
  0x3a   : > { %758 = vmatmul.mubr.f32.gmra.mrb[8].mxu1 %v4996_v45  ;;  %4163 = vmatprep.subr.bf16.mxu0 %v4162_v49  ;;  %v5067_v18 = vld [vmem:[#allocation2 + $0x32] sm:$0xff]  ;;  %v4196_v29 = vpack.c.bf16 %v484_v16, %v483_v15  ;;  %v502_v31 = vld [vmem:[%s6868_s1 + $0x3e8] sm:$0xff]  ;;  %v485_v32 = vld [vmem:[%s6868_s1 + $0x360] sm:$0xff] }
  0x3b   : > { %762 = vmatprep.mubr.f32.mxu1 %v5000_v47  ;;  %v5069_v19 = vld [vmem:[#allocation2 + $0x39] sm:$0xff]  ;;  %4191 = vmatprep.subr.bf16.mxu1 %v4190_v6  ;;  %v455_v25 = vld [vmem:[%s6868_s1 + $0x270] sm:$0xff]  ;;  %v486_v33 = vld [vmem:[%s6868_s1 + $0x368] sm:$0xff]  ;;  %v4198_v40 = vpack.c.bf16 %v502_v31, %v501_v30 }
  0x3c   : > { %618 = vmatmul.mubr.f32.gmra.mrb[10].mxu0 %v4933_v17  ;;  %v456_v28 = vld [vmem:[%s6868_s1 + $0x278] sm:$0xff]  ;;  %4193 = vmatpush3.bf16.msra.mxu1 %v4192_v10  ;;  %v505_v34 = vld [vmem:[%s6868_s1 + $0x400] sm:$0xff]  ;;  %v506_v35 = vld [vmem:[%s6868_s1 + $0x408] sm:$0xff]  ;;  %v4200_v44 = vpack.c.bf16 %v486_v33, %v485_v32 }
  0x3d   : > { %622 = vmatprep.mubr.f32.mxu0 %v5033_v62  ;;  %4165 = vmatpush3.bf16.msra.mxu0 %v4164_v1  ;;  %v5101_v36 = vld [vmem:[#allocation2 + $0x3a] sm:$0xff]  ;;  %v4172_v38 = vpack.c.bf16 %v456_v28, %v455_v25  ;;  %v5105_v39 = vld [vmem:[#allocation2 + $0x50] sm:$0xff]  ;;  %v5113_v43 = vpack.c.bf16 %v506_v35, %v505_v34  ;;  %v5125_v50 = vld [vmem:[#allocation2 + $0x42] sm:$0xff] }
  0x3e   : > { %763 = vmatmul.mubr.f32.gmra.mrb[10].mxu1 %v5024_v58  ;;  %4167 = vmatprep.subr.bf16.mxu0 %v4166_v4  ;;  %v5103_v37 = vld [vmem:[#allocation2 + $0x41] sm:$0xff]  ;;  %v503_v41 = vld [vmem:[%s6868_s1 + $0x3f0] sm:$0xff]  ;;  %v504_v42 = vld [vmem:[%s6868_s1 + $0x3f8] sm:$0xff] }
  0x3f   : > { %767 = vmatprep.mubr.f32.mxu1 %v5035_v0  ;;  %4195 = vmatprep.subr.bf16.mxu1 %v4194_v23  ;;  %v487_v48 = vld [vmem:[%s6868_s1 + $0x370] sm:$0xff]  ;;  %v488_v49 = vld [vmem:[%s6868_s1 + $0x378] sm:$0xff]  ;;  %v4202_v52 = vpack.c.bf16 %v504_v42, %v503_v41  ;;  %v5140_v57 = vld [vmem:[#allocation2 + $0x60] sm:$0xff] }
  0x40   : > { %623 = vmatmul.mubr.f32.gmra.mrb[12].mxu0 %v4952_v27  ;;  %4197 = vmatpush3.bf16.msra.mxu1 %v4196_v29  ;;  %v5127_v51 = vld [vmem:[#allocation2 + $0x49] sm:$0xff]  ;;  %v5129_v53 = vld [vmem:[#allocation2 + $0x58] sm:$0xff]  ;;  %v4204_v54 = vpack.c.bf16 %v488_v49, %v487_v48  ;;  %v5158_v4 = vld [vmem:[#allocation2 + $0x61] sm:$0xff] }
  0x41   : > { %627 = vmatprep.mubr.f32.mxu0 %v5069_v19  ;;  %4169 = vmatpush3.bf16.msra.mxu0 %v4168_v20  ;;  %v5136_v55 = vld [vmem:[#allocation2 + $0x4a] sm:$0xff]  ;;  %v5146_v59 = vld [vmem:[#allocation2 + $0x52] sm:$0xff]  ;;  %v5156_v2 = vld [vmem:[#allocation2 + $0x5a] sm:$0xff] }
  0x42   : > { %768 = vmatmul.mubr.f32.gmra.mrb[12].mxu1 %v5067_v18  ;;  %4171 = vmatprep.subr.bf16.mxu0 %v4170_v24  ;;  %v5138_v56 = vld [vmem:[#allocation2 + $0x51] sm:$0xff]  ;;  %v5148_v61 = vld [vmem:[#allocation2 + $0x59] sm:$0xff]  ;;  %v5150_v1 = vld [vmem:[#allocation2 + $0x68] sm:$0xff] }
  0x43   : > { %772 = vmatprep.mubr.f32.mxu1 %v5071_v21  ;;  %4199 = vmatprep.subr.bf16.mxu1 %v4198_v40  ;;  %v5160_v5 = vld [vmem:[#allocation2 + $0x70] sm:$0xff]  ;;  %v5166_v6 = vld [vmem:[#allocation2 + $0x62] sm:$0xff]  ;;  %v5170_v9 = vld [vmem:[#allocation2 + $0x78] sm:$0xff] }
  0x44   : > { %628 = vmatmul.mubr.f32.gmra.mrb[14].mxu0 %v5000_v47  ;;  %4201 = vmatpush3.bf16.msra.mxu1 %v4200_v44  ;;  %v5168_v8 = vld [vmem:[#allocation2 + $0x69] sm:$0xff]  ;;  %v5178_v11 = vld [vmem:[#allocation2 + $0x71] sm:$0xff]  ;;  %v5180_v12 = vld [vmem:[#allocation2 + $0x80] sm:$0xff] }
  0x45   : > { %632 = vmatprep.mubr.f32.mxu0 %v5103_v37  ;;  %4173 = vmatpush3.bf16.msra.mxu0 %v4172_v38  ;;  %v5176_v10 = vld [vmem:[#allocation2 + $0x6a] sm:$0xff]  ;;  %v5186_v14 = vld [vmem:[#allocation2 + $0x72] sm:$0xff]  ;;  %v5196_v20 = vld [vmem:[#allocation2 + $0x7a] sm:$0xff] }
  0x46   : > { %773 = vmatmul.mubr.f32.gmra.mrb[14].mxu1 %v5101_v36  ;;  %4207 = vmatprep.subr.bf16.mxu0 %v5113_v43  ;;  %v5188_v15 = vld [vmem:[#allocation2 + $0x79] sm:$0xff]  ;;  %v5190_v16 = vld [vmem:[#allocation2 + $0x88] sm:$0xff]  ;;  %v507_v23 = vld [vmem:[%s6868_s1 + $0x410] sm:$0xff] }
  0x47   : > { %777 = vmatprep.mubr.f32.mxu1 %v5105_v39  ;;  %4203 = vmatprep.subr.bf16.mxu1 %v4202_v52  ;;  %v508_v24 = vld [vmem:[%s6868_s1 + $0x418] sm:$0xff]  ;;  %v509_v28 = vld [vmem:[%s6868_s1 + $0x420] sm:$0xff]  ;;  %v510_v29 = vld [vmem:[%s6868_s1 + $0x428] sm:$0xff] }
  0x48   : > { %633 = vmatmul.mubr.f32.gmra.mrb[16].mxu0 %v5035_v0  ;;  %4205 = vmatpush3.bf16.msra.mxu1 %v4204_v54  ;;  %v4210_v25 = vpack.c.bf16 %v508_v24, %v507_v23  ;;  %v512_v30 = vld [vmem:[%s6868_s1 + $0x438] sm:$0xff]  ;;  %v518_v32 = vld [vmem:[%s6868_s1 + $0x468] sm:$0xff] }
  0x49   : > { %637 = vmatprep.mubr.f32.mxu0 %v5127_v51  ;;  %v516_v31 = vld [vmem:[%s6868_s1 + $0x458] sm:$0xff]  ;;  %v369_v34 = vld [vmem:[#allocation2 + $0x82] sm:$0xff] }
  0x4a   : > { %778 = vmatmul.mubr.f32.gmra.mrb[16].mxu1 %v5125_v50  ;;  %v520_v33 = vld [vmem:[%s6868_s1 + $0x478] sm:$0xff] }
  0x4b   : > { %782 = vmatprep.mubr.f32.mxu1 %v5129_v53  ;;  %v373_v35 = vld [vmem:[#allocation2 + $0x91] sm:$0xff]  ;;  %v374_v38 = vld [vmem:[#allocation2 + $0x99] sm:$0xff] }
  0x4c   : > { %638 = vmatmul.mubr.f32.gmra.mrb[18].mxu0 %v5071_v21 }
  0x4d   : > { %642 = vmatprep.mubr.f32.mxu0 %v5138_v56 }
  0x4e   : > { %783 = vmatmul.mubr.f32.gmra.mrb[18].mxu1 %v5136_v55 }
  0x4f   : > { %787 = vmatprep.mubr.f32.mxu1 %v5140_v57 }
  0x50   : > { %643 = vmatmul.mubr.f32.gmra.mrb[20].mxu0 %v5105_v39 }
  0x51   : > { %647 = vmatprep.mubr.f32.mxu0 %v5148_v61 }
  0x52   : > { %788 = vmatmul.mubr.f32.gmra.mrb[20].mxu1 %v5146_v59 }
  0x53   : > { %792 = vmatprep.mubr.f32.mxu1 %v5150_v1 }
  0x54   : > { %648 = vmatmul.mubr.f32.gmra.mrb[22].mxu0 %v5129_v53 }
  0x55   : > { %652 = vmatprep.mubr.f32.mxu0 %v5158_v4 }
  0x56   : > { %793 = vmatmul.mubr.f32.gmra.mrb[22].mxu1 %v5156_v2 }
  0x57   : > { %797 = vmatprep.mubr.f32.mxu1 %v5160_v5 }
  0x58   : > { %653 = vmatmul.mubr.f32.gmra.mrb[24].mxu0 %v5140_v57 }
  0x59   : > { %657 = vmatprep.mubr.f32.mxu0 %v5168_v8 }
  0x5a   : > { %798 = vmatmul.mubr.f32.gmra.mrb[24].mxu1 %v5166_v6 }
  0x5b   : > { %802 = vmatprep.mubr.f32.mxu1 %v5170_v9 }
  0x5c   : > { %658 = vmatmul.mubr.f32.gmra.mrb[26].mxu0 %v5150_v1 }
  0x5d   : > { %662 = vmatprep.mubr.f32.mxu0 %v5178_v11 }
  0x5e   : > { %803 = vmatmul.mubr.f32.gmra.mrb[26].mxu1 %v5176_v10 }
  0x5f   : > { %807 = vmatprep.mubr.f32.mxu1 %v5180_v12 }
  0x60   : > { %663 = vmatmul.mubr.f32.gmra.mrb[28].mxu0 %v5160_v5 }
  0x61   : > { %667 = vmatprep.mubr.f32.mxu0 %v5188_v15 }
  0x62   : > { %808 = vmatmul.mubr.f32.gmra.mrb[28].mxu1 %v5186_v14 }
  0x63   : > { %812 = vmatprep.mubr.f32.mxu1 %v5190_v16 }
  0x64   : > { %668 = vmatmul.mubr.f32.gmra.mrb[30].mxu0 %v5170_v9 }
  0x65   : > { %882 = vmatprep.mubr.f32.mxu0 %v4925_v13  ;;  %v4214_v13 = vpack.c.bf16 %v510_v29, %v509_v28 }
  0x66   : > { %813 = vmatmul.mubr.f32.gmra.mrb[30].mxu1 %v5196_v20 }
  0x67   : > { %1027 = vmatprep.mubr.f32.mxu1 %v4950_v26 }
  0x68   : > { %883 = vmatmul.mubr.f32.vlgmr.msra.gmra.mrb[32].mxu0 %v4889_v60  ;;  %v511_v60 = vld [vmem:[%s6868_s1 + $0x430] sm:$0xff] }
  0x69   : > { %4209 = vmatpush3.bf16.msra.mxu0 %v5113_v43  ;;  %887 = vmatprep.mubr.f32.mxu0 %v4939_v22  ;;  %v514_v22 = vld [vmem:[%s6868_s1 + $0x448] sm:$0xff] }
  0x6a   : > { %1028 = vmatmul.mubr.f32.vlgmr.msra.gmra.mrb[32].mxu1 %v4894_v63  ;;  %4211 = vmatprep.subr.bf16.mxu0 %v4210_v25  ;;  %v4218_v63 = vpack.c.bf16 %v512_v30, %v511_v60 }
  0x6b   : > { %1032 = vmatprep.mubr.f32.mxu1 %v4998_v46 }
  0x6c   : > { %888 = vmatmul.mubr.f32.gmra.mrb[34].mxu0 %v4903_v3  ;;  %v513_v3 = vld [vmem:[%s6868_s1 + $0x440] sm:$0xff] }
  0x6d   : > { %892 = vmatprep.mubr.f32.mxu0 %v4996_v45  ;;  %4213 = vmatpush3.bf16.msra.mxu0 %v4210_v25 }
  0x6e   : > { %1033 = vmatmul.mubr.f32.gmra.mrb[34].mxu1 %v4933_v17  ;;  %4215 = vmatprep.subr.bf16.mxu0 %v4214_v13  ;;  %v4222_v17 = vpack.c.bf16 %v514_v22, %v513_v3 }
  0x6f   : > { %1037 = vmatprep.mubr.f32.mxu1 %v5033_v62 }
  0x70   : > { %893 = vmatmul.mubr.f32.gmra.mrb[36].mxu0 %v4950_v26  ;;  %v515_v26 = vld [vmem:[%s6868_s1 + $0x450] sm:$0xff] }
  0x71   : > { %897 = vmatprep.mubr.f32.mxu0 %v5024_v58  ;;  %4217 = vmatpush3.bf16.msra.mxu0 %v4214_v13 }
  0x72   : > { %1038 = vmatmul.mubr.f32.gmra.mrb[36].mxu1 %v4952_v27  ;;  %4219 = vmatprep.subr.bf16.mxu0 %v4218_v63  ;;  %v4226_v27 = vpack.c.bf16 %v516_v31, %v515_v26 }
  0x73   : > { %1042 = vmatprep.mubr.f32.mxu1 %v5069_v19 }
  0x74   : > { %898 = vmatmul.mubr.f32.gmra.mrb[38].mxu0 %v4998_v46  ;;  %v517_v46 = vld [vmem:[%s6868_s1 + $0x460] sm:$0xff] }
  0x75   : > { %902 = vmatprep.mubr.f32.mxu0 %v5067_v18  ;;  %4221 = vmatpush3.bf16.msra.mxu0 %v4218_v63 }
  0x76   : > { %1043 = vmatmul.mubr.f32.gmra.mrb[38].mxu1 %v5000_v47  ;;  %4223 = vmatprep.subr.bf16.mxu0 %v4222_v17  ;;  %v4230_v47 = vpack.c.bf16 %v518_v32, %v517_v46 }
  0x77   : > { %1047 = vmatprep.mubr.f32.mxu1 %v5103_v37 }
  0x78   : > { %903 = vmatmul.mubr.f32.gmra.mrb[40].mxu0 %v5033_v62  ;;  %v519_v62 = vld [vmem:[%s6868_s1 + $0x470] sm:$0xff] }
  0x79   : > { %907 = vmatprep.mubr.f32.mxu0 %v5101_v36  ;;  %4225 = vmatpush3.bf16.msra.mxu0 %v4222_v17 }
  0x7a   : > { %1048 = vmatmul.mubr.f32.gmra.mrb[40].mxu1 %v5035_v0  ;;  %4227 = vmatprep.subr.bf16.mxu0 %v4226_v27  ;;  %v4234_v0 = vpack.c.bf16 %v520_v33, %v519_v62 }
  0x7b   : > { %1052 = vmatprep.mubr.f32.mxu1 %v5127_v51 }
  0x7c   : > { %908 = vmatmul.mubr.f32.gmra.mrb[42].mxu0 %v5069_v19  ;;  %v367_v19 = vld [vmem:[#allocation2 + $0x81] sm:$0xff] }
  0x7d   : > { %912 = vmatprep.mubr.f32.mxu0 %v5125_v50  ;;  %4229 = vmatpush3.bf16.msra.mxu0 %v4226_v27 }
  0x7e   : > { %1053 = vmatmul.mubr.f32.gmra.mrb[42].mxu1 %v5071_v21  ;;  %4231 = vmatprep.subr.bf16.mxu0 %v4230_v47  ;;  %v368_v21 = vld [vmem:[#allocation2 + $0x89] sm:$0xff] }
  0x7f   : > { %1057 = vmatprep.mubr.f32.mxu1 %v5138_v56 }
  0x80   : > { %913 = vmatmul.mubr.f32.gmra.mrb[44].mxu0 %v5103_v37  ;;  %v370_v37 = vld [vmem:[#allocation2 + $0x8a] sm:$0xff] }
  0x81   : > { %917 = vmatprep.mubr.f32.mxu0 %v5136_v55  ;;  %4233 = vmatpush3.bf16.msra.mxu0 %v4230_v47 }
  0x82   : > { %1058 = vmatmul.mubr.f32.gmra.mrb[44].mxu1 %v5105_v39  ;;  %4235 = vmatprep.subr.bf16.mxu0 %v4234_v0  ;;  %v5298_v39 = vld [vmem:[#allocation2] sm:$0xff] }
  0x83   : > { %1062 = vmatprep.mubr.f32.mxu1 %v5148_v61 }
  0x84   : > { %918 = vmatmul.mubr.f32.gmra.mrb[46].mxu0 %v5127_v51 }
  0x85   : > { %922 = vmatprep.mubr.f32.mxu0 %v5146_v59  ;;  %4237 = vmatpush3.bf16.msra.mxu0 %v4234_v0 }
  0x86   : > { %1063 = vmatmul.mubr.f32.gmra.mrb[46].mxu1 %v5129_v53 }
  0x87   : > { %1067 = vmatprep.mubr.f32.mxu1 %v5158_v4 }
  0x88   : > { %923 = vmatmul.mubr.f32.gmra.mrb[48].mxu0 %v5138_v56 }
  0x89   : > { %927 = vmatprep.mubr.f32.mxu0 %v5156_v2 }
  0x8a   : > { %1068 = vmatmul.mubr.f32.gmra.mrb[48].mxu1 %v5140_v57 }
  0x8b   : > { %1072 = vmatprep.mubr.f32.mxu1 %v5168_v8 }
  0x8c   : > { %928 = vmatmul.mubr.f32.gmra.mrb[50].mxu0 %v5148_v61 }
  0x8d   : > { %932 = vmatprep.mubr.f32.mxu0 %v5166_v6 }
  0x8e   : > { %1073 = vmatmul.mubr.f32.gmra.mrb[50].mxu1 %v5150_v1 }
  0x8f   : > { %1077 = vmatprep.mubr.f32.mxu1 %v5178_v11 }
  0x90   : > { %933 = vmatmul.mubr.f32.gmra.mrb[52].mxu0 %v5158_v4 }
  0x91   : > { %937 = vmatprep.mubr.f32.mxu0 %v5176_v10 }
  0x92   : > { %1078 = vmatmul.mubr.f32.gmra.mrb[52].mxu1 %v5160_v5 }
  0x93   : > { %1082 = vmatprep.mubr.f32.mxu1 %v5188_v15 }
  0x94   : > { %938 = vmatmul.mubr.f32.gmra.mrb[54].mxu0 %v5168_v8 }
  0x95   : > { %942 = vmatprep.mubr.f32.mxu0 %v5186_v14 }
  0x96   : > { %1083 = vmatmul.mubr.f32.gmra.mrb[54].mxu1 %v5170_v9 }
  0x97   : > { %1087 = vmatprep.mubr.f32.mxu1 %v367_v19 }
  0x98   : > { %943 = vmatmul.mubr.f32.gmra.mrb[56].mxu0 %v5178_v11 }
  0x99   : > { %947 = vmatprep.mubr.f32.mxu0 %v5196_v20 }
  0x9a   : > { %1088 = vmatmul.mubr.f32.gmra.mrb[56].mxu1 %v5180_v12 }
  0x9b   : > { %1092 = vmatprep.mubr.f32.mxu1 %v368_v21 }
  0x9c   : > { %948 = vmatmul.mubr.f32.gmra.mrb[58].mxu0 %v5188_v15 }
  0x9d   : > { %952 = vmatprep.mubr.f32.mxu0 %v369_v34 }
  0x9e   : > { %1093 = vmatmul.mubr.f32.gmra.mrb[58].mxu1 %v5190_v16 }
  0x9f   : > { %1097 = vmatprep.mubr.f32.mxu1 %v373_v35 }
  0xa0   : > { %953 = vmatmul.mubr.f32.gmra.mrb[60].mxu0 %v367_v19 }
  0xa1   : > { %957 = vmatprep.mubr.f32.mxu0 %v370_v37 }
  0xa2   : > { %1098 = vmatmul.mubr.f32.gmra.mrb[60].mxu1 %v4557_v7  ;;  %v375_v7 = vld [vmem:[#allocation2 + $0x92] sm:$0xff] }
  0xa3   : > { %1102 = vmatprep.mubr.f32.mxu1 %v374_v38 }
  0xa4   : > { %958 = vmatmul.mubr.f32.gmra.mrb[62].mxu0 %v368_v21 }
  0xa5   : > { %3966 = vmatprep.mubr.f32.mxu0 %v4996_v45  ;;  %v376_v45 = vld [vmem:[#allocation2 + $0x9a] sm:$0xff] }
  0xa6   : > { %1103 = vmatmul.mubr.f32.gmra.mrb[62].mxu1 %v5298_v39 }
  0xa8   : > { %3967 = vmatmul.mubr.f32.vlgmr.msra.gmra.mrb[64].mxu0 %v5024_v58 }
  0xa9   : > { %3969 = vmatprep.mubr.f32.mxu0 %v5067_v18  ;;  %v5316_v18 = vld [vmem:[%s6869_s2] ss:$0 sm:$0xff] }
  0xac   : > { %3970 = vmatmul.mubr.f32.gmra.mrb[66].mxu0 %v5101_v36 }
  0xad   : > { %3972 = vmatprep.mubr.f32.mxu0 %v5125_v50 }
  0xb0   : > { %3973 = vmatmul.mubr.f32.gmra.mrb[68].mxu0 %v5136_v55 }
  0xb1   : > { %3975 = vmatprep.mubr.f32.mxu0 %v5146_v59 }
  0xb4   : > { %3976 = vmatmul.mubr.f32.gmra.mrb[70].mxu0 %v5156_v2 }
  0xb5   : > { %3978 = vmatprep.mubr.f32.mxu0 %v5166_v6 }
  0xb8   : > { %3979 = vmatmul.mubr.f32.gmra.mrb[72].mxu0 %v5176_v10 }
  0xb9   : > { %3981 = vmatprep.mubr.f32.mxu0 %v5186_v14 }
  0xbc   : > { %3982 = vmatmul.mubr.f32.gmra.mrb[74].mxu0 %v5196_v20 }
  0xbd   : > { %3984 = vmatprep.mubr.f32.mxu0 %v369_v34 }
  0xc0   : > { %3985 = vmatmul.mubr.f32.gmra.mrb[76].mxu0 %v370_v37 }
  0xc1   : > { %3987 = vmatprep.mubr.f32.mxu0 %v375_v7 }
  0xc4   : > { %3988 = vmatmul.mubr.f32.gmra.mrb[78].mxu0 %v376_v45 }
  0xfb   : > { %v3242_v58 = vpop.f32.mrb[0].mxu0 }
  0xfc   : > { %v3243_v36 = vpop.f32.mrb[1].mxu0 }
  0xfd   : > { %v3322_v40 = vpop.f32.mrb[0].mxu1  ;;  %v3244_v41 = vadd.f32 %v3243_v36, %v3242_v58 }
  0xfe   : > { %v3323_v42 = vpop.f32.mrb[1].mxu1 }
  0xff   : > { %v3324_v43 = vadd.f32 %v3323_v42, %v3322_v40  ;;  %v595_v44 = vadd.f32 %v3244_v41, %v5316_v18  ;;  %v3245_v48 = vpop.f32.mrb[2].mxu0 }
 0x100   : > { %v3246_v49 = vpop.f32.mrb[3].mxu0 }
 0x101   : > { %v3325_v50 = vpop.f32.mrb[2].mxu1  ;;  %v5319_v51 = vadd.f32 %v3324_v43, %v595_v44  ;;  %v3247_v52 = vadd.f32 %v3246_v49, %v3245_v48 }
 0x102   : > { %v3326_v53 = vpop.f32.mrb[3].mxu1 }
 0x103   : > { %v3327_v54 = vadd.f32 %v3326_v53, %v3325_v50  ;;  %v600_v55 = vadd.f32 %v3247_v52, %v5316_v18  ;;  %v3248_v56 = vpop.f32.mrb[4].mxu0 }
 0x104   : > { %v3249_v57 = vpop.f32.mrb[5].mxu0 }
 0x105   : > { %v3328_v59 = vpop.f32.mrb[4].mxu1  ;;  %v5322_v61 = vadd.f32 %v3327_v54, %v600_v55  ;;  %v3250_v1 = vadd.f32 %v3249_v57, %v3248_v56 }
 0x106   : > { %v3329_v2 = vpop.f32.mrb[5].mxu1 }
 0x107   : > { %v3330_v4 = vadd.f32 %v3329_v2, %v3328_v59  ;;  %v605_v5 = vadd.f32 %v3250_v1, %v5316_v18  ;;  %v3251_v6 = vpop.f32.mrb[6].mxu0 }
 0x108   : > { %v3252_v8 = vpop.f32.mrb[7].mxu0 }
 0x109   : > { %v3331_v9 = vpop.f32.mrb[6].mxu1  ;;  %v5325_v10 = vadd.f32 %v3330_v4, %v605_v5  ;;  %v3253_v11 = vadd.f32 %v3252_v8, %v3251_v6 }
 0x10a   : > { %v3332_v12 = vpop.f32.mrb[7].mxu1 }
 0x10b   : > { %v3333_v14 = vadd.f32 %v3332_v12, %v3331_v9  ;;  %v610_v15 = vadd.f32 %v3253_v11, %v5316_v18  ;;  %v3254_v16 = vpop.f32.mrb[8].mxu0 }
 0x10c   : > { %v3255_v20 = vpop.f32.mrb[9].mxu0 }
 0x10d   : > { %v3334_v23 = vpop.f32.mrb[8].mxu1  ;;  %v5328_v24 = vadd.f32 %v3333_v14, %v610_v15  ;;  %v3256_v25 = vadd.f32 %v3255_v20, %v3254_v16 }
 0x10e   : > { %v3335_v28 = vpop.f32.mrb[9].mxu1 }
 0x10f   : > { %v3336_v29 = vadd.f32 %v3335_v28, %v3334_v23  ;;  %v615_v13 = vadd.f32 %v3256_v25, %v5316_v18  ;;  %v3257_v60 = vpop.f32.mrb[10].mxu0 }
 0x110   : > { %v3258_v30 = vpop.f32.mrb[11].mxu0 }
 0x111   : > { %v3337_v63 = vpop.f32.mrb[10].mxu1  ;;  %v5331_v3 = vadd.f32 %v3336_v29, %v615_v13  ;;  %v3259_v22 = vadd.f32 %v3258_v30, %v3257_v60 }
 0x112   : > { %v3338_v17 = vpop.f32.mrb[11].mxu1 }
 0x113   : > { %v3339_v26 = vadd.f32 %v3338_v17, %v3337_v63  ;;  %v620_v31 = vadd.f32 %v3259_v22, %v5316_v18  ;;  %v3260_v27 = vpop.f32.mrb[12].mxu0 }
 0x114   : > { %v3261_v46 = vpop.f32.mrb[13].mxu0 }
 0x115   : > { %v3340_v32 = vpop.f32.mrb[12].mxu1  ;;  %v5334_v47 = vadd.f32 %v3339_v26, %v620_v31  ;;  %v3262_v62 = vadd.f32 %v3261_v46, %v3260_v27 }
 0x116   : > { %v3341_v33 = vpop.f32.mrb[13].mxu1 }
 0x117   : > { %v3342_v0 = vadd.f32 %v3341_v33, %v3340_v32  ;;  %v625_v19 = vadd.f32 %v3262_v62, %v5316_v18  ;;  %v3263_v21 = vpop.f32.mrb[14].mxu0 }
 0x118   : > { %v3264_v34 = vpop.f32.mrb[15].mxu0 }
 0x119   : > { %v3343_v35 = vpop.f32.mrb[14].mxu1  ;;  %v5337_v37 = vadd.f32 %v3342_v0, %v625_v19  ;;  %v3265_v38 = vadd.f32 %v3264_v34, %v3263_v21 }
 0x11a   : > { %v3344_v7 = vpop.f32.mrb[15].mxu1 }
 0x11b   : > { %v3345_v45 = vadd.f32 %v3344_v7, %v3343_v35  ;;  %v630_v58 = vadd.f32 %v3265_v38, %v5316_v18  ;;  %v3266_v36 = vpop.f32.mrb[16].mxu0 }
 0x11c   : > { %v3267_v40 = vpop.f32.mrb[17].mxu0 }
 0x11d   : > { %v3346_v41 = vpop.f32.mrb[16].mxu1  ;;  %v5340_v42 = vadd.f32 %v3345_v45, %v630_v58  ;;  %v3268_v43 = vadd.f32 %v3267_v40, %v3266_v36 }
 0x11e   : > { %v3347_v44 = vpop.f32.mrb[17].mxu1 }
 0x11f   : > { %v3348_v48 = vadd.f32 %v3347_v44, %v3346_v41  ;;  %v635_v49 = vadd.f32 %v3268_v43, %v5316_v18  ;;  %v3269_v50 = vpop.f32.mrb[18].mxu0 }
 0x120   : > { %v3270_v52 = vpop.f32.mrb[19].mxu0 }
 0x121   : > { %v3349_v53 = vpop.f32.mrb[18].mxu1  ;;  %v5343_v54 = vadd.f32 %v3348_v48, %v635_v49  ;;  %v3271_v55 = vadd.f32 %v3270_v52, %v3269_v50 }
 0x122   : > { %v3350_v56 = vpop.f32.mrb[19].mxu1 }
 0x123   : > { %v3351_v57 = vadd.f32 %v3350_v56, %v3349_v53  ;;  %v640_v59 = vadd.f32 %v3271_v55, %v5316_v18  ;;  %v3272_v1 = vpop.f32.mrb[20].mxu0 }
 0x124   : > { %v3273_v2 = vpop.f32.mrb[21].mxu0 }
 0x125   : > { %v3352_v4 = vpop.f32.mrb[20].mxu1  ;;  %v5346_v5 = vadd.f32 %v3351_v57, %v640_v59  ;;  %v3274_v6 = vadd.f32 %v3273_v2, %v3272_v1 }
 0x126   : > { %v3353_v8 = vpop.f32.mrb[21].mxu1 }
 0x127   : > { %v3354_v9 = vadd.f32 %v3353_v8, %v3352_v4  ;;  %v645_v11 = vadd.f32 %v3274_v6, %v5316_v18  ;;  %v3275_v12 = vpop.f32.mrb[22].mxu0 }
 0x128   : > { %v3276_v14 = vpop.f32.mrb[23].mxu0 }
 0x129   : > { %v3355_v15 = vpop.f32.mrb[22].mxu1  ;;  %v5349_v16 = vadd.f32 %v3354_v9, %v645_v11  ;;  %v3277_v20 = vadd.f32 %v3276_v14, %v3275_v12 }
 0x12a   : > { %v3356_v23 = vpop.f32.mrb[23].mxu1 }
 0x12b   : > { %v3357_v25 = vadd.f32 %v3356_v23, %v3355_v15  ;;  %v650_v28 = vadd.f32 %v3277_v20, %v5316_v18  ;;  %v3278_v29 = vpop.f32.mrb[24].mxu0 }
 0x12c   : > { %v3279_v13 = vpop.f32.mrb[25].mxu0 }
 0x12d   : > { %v3358_v60 = vpop.f32.mrb[24].mxu1  ;;  %v5352_v30 = vadd.f32 %v3357_v25, %v650_v28  ;;  %v3280_v63 = vadd.f32 %v3279_v13, %v3278_v29 }
 0x12e   : > { %v3359_v22 = vpop.f32.mrb[25].mxu1 }
 0x12f   : > { %v3360_v17 = vadd.f32 %v3359_v22, %v3358_v60  ;;  %v655_v26 = vadd.f32 %v3280_v63, %v5316_v18  ;;  %v3281_v31 = vpop.f32.mrb[26].mxu0 }
 0x130   : > { %v3282_v27 = vpop.f32.mrb[27].mxu0 }
 0x131   : > { %v3361_v46 = vpop.f32.mrb[26].mxu1  ;;  %v5355_v32 = vadd.f32 %v3360_v17, %v655_v26  ;;  %v3283_v62 = vadd.f32 %v3282_v27, %v3281_v31 }
 0x132   : > { %v3362_v33 = vpop.f32.mrb[27].mxu1 }
 0x133   : > { %v3363_v0 = vadd.f32 %v3362_v33, %v3361_v46  ;;  %v660_v19 = vadd.f32 %v3283_v62, %v5316_v18  ;;  %v3284_v21 = vpop.f32.mrb[28].mxu0 }
 0x134   : > { %v3285_v34 = vpop.f32.mrb[29].mxu0 }
 0x135   : > { %v3364_v35 = vpop.f32.mrb[28].mxu1  ;;  %v5358_v38 = vadd.f32 %v3363_v0, %v660_v19  ;;  %v3286_v7 = vadd.f32 %v3285_v34, %v3284_v21 }
 0x136   : > { %v3365_v45 = vpop.f32.mrb[29].mxu1 }
 0x137   : > { %v3366_v58 = vadd.f32 %v3365_v45, %v3364_v35  ;;  %v665_v36 = vadd.f32 %v3286_v7, %v5316_v18  ;;  %v3287_v40 = vpop.f32.mrb[30].mxu0 }
 0x138   : > { %v3288_v41 = vpop.f32.mrb[31].mxu0 }
 0x139   : > { %v3367_v43 = vpop.f32.mrb[30].mxu1  ;;  %v5361_v44 = vadd.f32 %v3366_v58, %v665_v36  ;;  %v3289_v48 = vadd.f32 %v3288_v41, %v3287_v40 }
 0x13a   : > { %v3368_v49 = vpop.f32.mrb[31].mxu1 }
 0x13b   : > { %v3369_v50 = vadd.f32 %v3368_v49, %v3367_v43  ;;  %v670_v52 = vadd.f32 %v3289_v48, %v5316_v18  ;;  %v3402_v53 = vpop.f32.mrb[32].mxu0 }
 0x13c   : > { %v3403_v55 = vpop.f32.mrb[33].mxu0 }
 0x13d   : > { %v3482_v56 = vpop.f32.mrb[32].mxu1  ;;  %v5364_v57 = vadd.f32 %v3369_v50, %v670_v52  ;;  %v3404_v59 = vadd.f32 %v3403_v55, %v3402_v53 }
 0x13e   : > { %v3483_v1 = vpop.f32.mrb[33].mxu1 }
 0x13f   : > { %v3484_v2 = vadd.f32 %v3483_v1, %v3482_v56  ;;  %v885_v4 = vadd.f32 %v3404_v59, %v5319_v51  ;;  %v3405_v6 = vpop.f32.mrb[34].mxu0 }
 0x140   : > { %v3406_v8 = vpop.f32.mrb[35].mxu0 }
 0x141   : > { %v3485_v9 = vpop.f32.mrb[34].mxu1  ;;  %v3407_v11 = vadd.f32 %v3406_v8, %v3405_v6  ;;  %v5367_v14 = vadd.f32 %v3484_v2, %v885_v4 }
 0x142   : > { %v3486_v12 = vpop.f32.mrb[35].mxu1 }
 0x143   : > { %v3487_v15 = vadd.f32 %v3486_v12, %v3485_v9  ;;  %v890_v18 = vadd.f32 %v3407_v11, %v5322_v61  ;;  %v3408_v20 = vpop.f32.mrb[36].mxu0 }
 0x144   : > { %v3409_v23 = vpop.f32.mrb[37].mxu0 }
 0x145   : > { %v3488_v25 = vpop.f32.mrb[36].mxu1  ;;  %v3410_v28 = vadd.f32 %v3409_v23, %v3408_v20  ;;  %v5370_v13 = vadd.f32 %v3487_v15, %v890_v18 }
 0x146   : > { %v3489_v29 = vpop.f32.mrb[37].mxu1 }
 0x147   : > { %v3490_v60 = vadd.f32 %v3489_v29, %v3488_v25  ;;  %v895_v51 = vadd.f32 %v3410_v28, %v5325_v10  ;;  %v3411_v63 = vpop.f32.mrb[38].mxu0 }
 0x148   : > { %v3412_v22 = vpop.f32.mrb[39].mxu0 }
 0x149   : > { %v3491_v17 = vpop.f32.mrb[38].mxu1  ;;  %v3413_v26 = vadd.f32 %v3412_v22, %v3411_v63  ;;  %v5373_v27 = vadd.f32 %v3490_v60, %v895_v51 }
 0x14a   : > { %v3492_v31 = vpop.f32.mrb[39].mxu1 }
 0x14b   : > { %v3493_v46 = vadd.f32 %v3492_v31, %v3491_v17  ;;  %v900_v61 = vadd.f32 %v3413_v26, %v5328_v24  ;;  %v3414_v62 = vpop.f32.mrb[40].mxu0 }
 0x14c   : > { %v3415_v33 = vpop.f32.mrb[41].mxu0 }
 0x14d   : > { %v3494_v0 = vpop.f32.mrb[40].mxu1  ;;  %v3416_v19 = vadd.f32 %v3415_v33, %v3414_v62  ;;  %v5376_v34 = vadd.f32 %v3493_v46, %v900_v61 }
 0x14e   : > { %v3495_v21 = vpop.f32.mrb[41].mxu1 }
 0x14f   : > { %v3496_v35 = vadd.f32 %v3495_v21, %v3494_v0  ;;  %v905_v10 = vadd.f32 %v3416_v19, %v5331_v3  ;;  %v3417_v7 = vpop.f32.mrb[42].mxu0 }
 0x150   : > { %v3418_v45 = vpop.f32.mrb[43].mxu0 }
 0x151   : > { %v3497_v58 = vpop.f32.mrb[42].mxu1  ;;  %v3419_v36 = vadd.f32 %v3418_v45, %v3417_v7  ;;  %v5379_v41 = vadd.f32 %v3496_v35, %v905_v10 }
 0x152   : > { %v3498_v40 = vpop.f32.mrb[43].mxu1 }
 0x153   : > { %v3499_v43 = vadd.f32 %v3498_v40, %v3497_v58  ;;  %v910_v24 = vadd.f32 %v3419_v36, %v5334_v47  ;;  %v3420_v48 = vpop.f32.mrb[44].mxu0 }
 0x154   : > { %v3421_v49 = vpop.f32.mrb[45].mxu0 }
 0x155   : > { %v3500_v50 = vpop.f32.mrb[44].mxu1  ;;  %v3422_v52 = vadd.f32 %v3421_v49, %v3420_v48  ;;  %v5382_v55 = vadd.f32 %v3499_v43, %v910_v24 }
 0x156   : > { %v3501_v53 = vpop.f32.mrb[45].mxu1 }
 0x157   : > { %v3502_v56 = vadd.f32 %v3501_v53, %v3500_v50  ;;  %v915_v3 = vadd.f32 %v3422_v52, %v5337_v37  ;;  %v3423_v59 = vpop.f32.mrb[46].mxu0 }
 0x158   : > { %v3424_v1 = vpop.f32.mrb[47].mxu0 }
 0x159   : > { %v3503_v2 = vpop.f32.mrb[46].mxu1  ;;  %v3425_v4 = vadd.f32 %v3424_v1, %v3423_v59  ;;  %v5385_v8 = vadd.f32 %v3502_v56, %v915_v3 }
 0x15a   : > { %v3504_v6 = vpop.f32.mrb[47].mxu1 }
 0x15b   : > { %v3505_v9 = vadd.f32 %v3504_v6, %v3503_v2  ;;  %v920_v47 = vadd.f32 %v3425_v4, %v5340_v42  ;;  %v3426_v11 = vpop.f32.mrb[48].mxu0 }
 0x15c   : > { %v3427_v12 = vpop.f32.mrb[49].mxu0 }
 0x15d   : > { %v3506_v15 = vpop.f32.mrb[48].mxu1  ;;  %v3428_v18 = vadd.f32 %v3427_v12, %v3426_v11  ;;  %v5388_v23 = vadd.f32 %v3505_v9, %v920_v47 }
 0x15e   : > { %v3507_v20 = vpop.f32.mrb[49].mxu1 }
 0x15f   : > { %v3508_v25 = vadd.f32 %v3507_v20, %v3506_v15  ;;  %v925_v37 = vadd.f32 %v3428_v18, %v5343_v54  ;;  %v3429_v28 = vpop.f32.mrb[50].mxu0 }
 0x160   : > { %v3430_v29 = vpop.f32.mrb[51].mxu0 }
 0x161   : > { %v3509_v60 = vpop.f32.mrb[50].mxu1  ;;  %v3431_v51 = vadd.f32 %v3430_v29, %v3429_v28  ;;  %v5391_v22 = vadd.f32 %v3508_v25, %v925_v37 }
 0x162   : > { %v3510_v63 = vpop.f32.mrb[51].mxu1 }
 0x163   : > { %v3511_v17 = vadd.f32 %v3510_v63, %v3509_v60  ;;  %v930_v42 = vadd.f32 %v3431_v51, %v5346_v5  ;;  %v3432_v26 = vpop.f32.mrb[52].mxu0 }
 0x164   : > { %v3433_v31 = vpop.f32.mrb[53].mxu0 }
 0x165   : > { %v3512_v46 = vpop.f32.mrb[52].mxu1  ;;  %v3434_v61 = vadd.f32 %v3433_v31, %v3432_v26  ;;  %v5394_v33 = vadd.f32 %v3511_v17, %v930_v42 }
 0x166   : > { %v3513_v62 = vpop.f32.mrb[53].mxu1 }
 0x167   : > { %v3514_v0 = vadd.f32 %v3513_v62, %v3512_v46  ;;  %v935_v54 = vadd.f32 %v3434_v61, %v5349_v16  ;;  %v3435_v19 = vpop.f32.mrb[54].mxu0 }
 0x168   : > { %v3436_v21 = vpop.f32.mrb[55].mxu0 }
 0x169   : > { %v3515_v35 = vpop.f32.mrb[54].mxu1  ;;  %v3437_v10 = vadd.f32 %v3436_v21, %v3435_v19  ;;  %v5397_v45 = vadd.f32 %v3514_v0, %v935_v54 }
 0x16a   : > { %v3516_v7 = vpop.f32.mrb[55].mxu1 }
 0x16b   : > { %v3517_v58 = vadd.f32 %v3516_v7, %v3515_v35  ;;  %v940_v5 = vadd.f32 %v3437_v10, %v5352_v30  ;;  %v3438_v36 = vpop.f32.mrb[56].mxu0 }
 0x16c   : > { %v3439_v40 = vpop.f32.mrb[57].mxu0 }
 0x16d   : > { %v3518_v43 = vpop.f32.mrb[56].mxu1  ;;  %v3440_v24 = vadd.f32 %v3439_v40, %v3438_v36  ;;  %v1085_v49 = vadd.f32 %v3517_v58, %v940_v5 }
 0x16e   : > { %v3519_v48 = vpop.f32.mrb[57].mxu1 }
 0x16f   : > { %v3520_v50 = vadd.f32 %v3519_v48, %v3518_v43  ;;  %v945_v52 = vadd.f32 %v3440_v24, %v5355_v32  ;;  %v3441_v16 = vpop.f32.mrb[58].mxu0 }
 0x170   : > { %v3442_v53 = vpop.f32.mrb[59].mxu0 }
 0x171   : > { %v3521_v56 = vpop.f32.mrb[58].mxu1  ;;  %v3443_v3 = vadd.f32 %v3442_v53, %v3441_v16  ;;  %v1090_v1 = vadd.f32 %v3520_v50, %v945_v52 }
 0x172   : > { %v3522_v59 = vpop.f32.mrb[59].mxu1 }
 0x173   : > { %v3523_v2 = vadd.f32 %v3522_v59, %v3521_v56  ;;  %v950_v4 = vadd.f32 %v3443_v3, %v5358_v38  ;;  %v3444_v6 = vpop.f32.mrb[60].mxu0  ;;  %v1691_v56 = vld [vmem:[%s6870_s3 + $0x80] sm:$0xff]  ;;  %v1692_v3 = vld [vmem:[%s6870_s3 + $0x88] sm:$0xff] }
 0x174   : > { %v3445_v30 = vpop.f32.mrb[61].mxu0  ;;  %v1675_v59 = vld [vmem:[%s6870_s3] sm:$0xff] }
 0x175   : > { %v3524_v9 = vpop.f32.mrb[60].mxu1  ;;  %v3446_v47 = vadd.f32 %v3445_v30, %v3444_v6  ;;  %v1095_v12 = vadd.f32 %v3523_v2, %v950_v4  ;;  %v1676_v2 = vld [vmem:[%s6870_s3 + $0x8] sm:$0xff]  ;;  %v1693_v4 = vld [vmem:[%s6870_s3 + $0x90] sm:$0xff]  ;;  %v1694_v6 = vld [vmem:[%s6870_s3 + $0x98] sm:$0xff] }
 0x176   : > { %v3525_v11 = vpop.f32.mrb[61].mxu1  ;;  %v4240_v30 = vpack.c.bf16 %v1676_v2, %v1675_v59 }
 0x177   : > { %v3526_v15 = vadd.f32 %v3525_v11, %v3524_v9  ;;  %v955_v18 = vadd.f32 %v3446_v47, %v5361_v44  ;;  %v3447_v20 = vpop.f32.mrb[62].mxu0  ;;  %v4242_v9 = vpack.c.bf16 %v1694_v6, %v1693_v4  ;;  %v1677_v47 = vld [vmem:[%s6870_s3 + $0x10] sm:$0xff]  ;;  %v1678_v11 = vld [vmem:[%s6870_s3 + $0x18] sm:$0xff]  ;;  %v1723_v4 = vld [vmem:[%s6870_s3 + $0x180] sm:$0xff] }
 0x178   : > { %v3448_v32 = vpop.f32.mrb[63].mxu0 }
 0x179   : > { %v3527_v25 = vpop.f32.mrb[62].mxu1  ;;  %v3449_v37 = vadd.f32 %v3448_v32, %v3447_v20  ;;  %v1100_v29 = vadd.f32 %v3526_v15, %v955_v18  ;;  %v1696_v15 = vld [vmem:[%s6870_s3 + $0xa8] sm:$0xff]  ;;  %v4244_v18 = vpack.c.bf16 %v1678_v11, %v1677_v47  ;;  %v1679_v32 = vld [vmem:[%s6870_s3 + $0x20] sm:$0xff] }
 0x17a   : > { %v3528_v28 = vpop.f32.mrb[63].mxu1  ;;  %v1707_v47 = vld [vmem:[%s6870_s3 + $0x100] sm:$0xff]  ;;  %v1708_v11 = vld [vmem:[%s6870_s3 + $0x108] sm:$0xff] }
 0x17b   : > { %v3529_v60 = vadd.f32 %v3528_v28, %v3527_v25  ;;  %v960_v51 = vadd.f32 %v3449_v37, %v5364_v57  ;;  %v3968_v63 = vpop.f32.mrb[64].mxu0  ;;  %v1680_v25 = vld [vmem:[%s6870_s3 + $0x28] sm:$0xff] }
 0x17c   : > { %v5405_v38 = vadd.f32 %v3968_v63, %v5370_v13  ;;  %v1174_v17 = vpop.f32.mrb[65].mxu0  ;;  %v4248_v37 = vpack.c.bf16 %v1680_v25, %v1679_v32  ;;  %v1681_v32 = vld [vmem:[%s6870_s3 + $0x30] sm:$0xff]  ;;  %v1682_v25 = vld [vmem:[%s6870_s3 + $0x38] sm:$0xff] }
 0x17d   : > { %v5408_v42 = vadd.f32 %v1174_v17, %v5367_v14  ;;  %v1105_v26 = vadd.f32 %v3529_v60, %v960_v51 }
 0x17e   : > { %v1257_v2 = vsel %vm1253_vm1, %v5405_v38, 0.0 }
 0x17f   : > { %v3971_v44 = vpop.f32.mrb[66].mxu0  ;;  %v1254_v31 = vsel %vm1253_vm1, %v5408_v42, 0.0 }
 0x180   : > { %v5413_v46 = vadd.f32 %v3971_v44, %v5376_v34  ;;  %v1184_v61 = vpop.f32.mrb[67].mxu0  ;;  %1255 = vadd.xlane.f32.xlu0 %v1254_v31 }
 0x181   : > { %v5416_v57 = vadd.f32 %v1184_v61, %v5373_v27 }
 0x183   : > { %v3974_v13 = vpop.f32.mrb[68].mxu0  ;;  %v1260_v62 = vsel %vm1253_vm1, %v5416_v57, 0.0 }
 0x184   : > { %v5421_v14 = vadd.f32 %v3974_v13, %v5382_v55  ;;  %v1194_v0 = vpop.f32.mrb[69].mxu0  ;;  %1261 = vadd.xlane.f32.xlu0 %v1260_v62 }
 0x185   : > { %v5424_v54 = vadd.f32 %v1194_v0, %v5379_v41 }
 0x187   : > { %v3977_v19 = vpop.f32.mrb[70].mxu0  ;;  %v1266_v34 = vsel %vm1253_vm1, %v5424_v54, 0.0 }
 0x188   : > { %v5429_v21 = vadd.f32 %v3977_v19, %v5388_v23  ;;  %v1204_v27 = vpop.f32.mrb[71].mxu0  ;;  %1267 = vadd.xlane.f32.xlu1 %v1266_v34 }
 0x189   : > { %v5432_v35 = vadd.f32 %v1204_v27, %v5385_v8 }
 0x18b   : > { %v3980_v10 = vpop.f32.mrb[72].mxu0  ;;  %v1272_v55 = vsel %vm1253_vm1, %v5432_v35, 0.0 }
 0x18c   : > { %v5437_v7 = vadd.f32 %v3980_v10, %v5394_v33  ;;  %v1214_v41 = vpop.f32.mrb[73].mxu0  ;;  %1273 = vadd.xlane.f32.xlu1 %v1272_v55 }
 0x18d   : > { %v5440_v58 = vadd.f32 %v1214_v41, %v5391_v22 }
 0x18e   : > { %v1281_v6 = vsel %vm1253_vm1, %v5437_v7, 0.0 }
 0x18f   : > { %v3983_v5 = vpop.f32.mrb[74].mxu0  ;;  %v1278_v23 = vsel %vm1253_vm1, %v5440_v58, 0.0 }
 0x190   : > { %v5444_v36 = vadd.f32 %v3983_v5, %v1085_v49  ;;  %v1224_v8 = vpop.f32.mrb[75].mxu0  ;;  %1279 = vadd.xlane.f32.xlu0 %v1278_v23 }
 0x191   : > { %v5447_v40 = vadd.f32 %v1224_v8, %v5397_v45 }
 0x193   : > { %v3986_v43 = vpop.f32.mrb[76].mxu0  ;;  %v1284_v33 = vsel %vm1253_vm1, %v5447_v40, 0.0 }
 0x194   : > { %v5451_v24 = vadd.f32 %v3986_v43, %v1095_v12  ;;  %v1234_v48 = vpop.f32.mrb[77].mxu0  ;;  %1285 = vadd.xlane.f32.xlu1 %v1284_v33  ;;  %v1695_v12 = vld [vmem:[%s6870_s3 + $0xa0] sm:$0xff] }
 0x195   : > { %v5453_v22 = vadd.f32 %v1234_v48, %v1090_v1  ;;  %v4238_v1 = vpack.c.bf16 %v1692_v3, %v1691_v56  ;;  %v4246_v20 = vpack.c.bf16 %v1696_v15, %v1695_v12  ;;  %v4272_v12 = vpack.c.bf16 %v1708_v11, %v1707_v47  ;;  %v1697_v15 = vld [vmem:[%s6870_s3 + $0xb0] sm:$0xff]  ;;  %v1687_v47 = vld [vmem:[%s6870_s3 + $0x60] sm:$0xff]  ;;  %v1688_v11 = vld [vmem:[%s6870_s3 + $0x68] sm:$0xff] }
 0x197   : > { %v3989_v50 = vpop.f32.mrb[78].mxu0  ;;  %v1290_v49 = vsel %vm1253_vm1, %v5453_v22, 0.0  ;;  %4239 = vmatprep.subr.bf16.mxu1 %v4238_v1 }
 0x198   : > { %v5457_v52 = vadd.f32 %v3989_v50, %v1105_v26  ;;  %v1244_v16 = vpop.f32.mrb[79].mxu0  ;;  %1291 = vadd.xlane.f32.xlu0 %v1290_v49  ;;  %4241 = vmatpush3.bf16.msra.mxu1 %v4240_v30  ;;  %v1263_v30 = vsel %vm1253_vm1, %v5413_v46, 0.0 }
 0x199   : > { %v5459_v45 = vadd.f32 %v1244_v16, %v1100_v29  ;;  %4243 = vmatprep.subr.bf16.mxu1 %v4242_v9 }
 0x19b   : > { %v1296_v53 = vsel %vm1253_vm1, %v5459_v45, 0.0 }
 0x19c   : > { %1297 = vadd.xlane.f32.xlu1 %v1296_v53  ;;  %4245 = vmatpush3.bf16.msra.mxu1 %v4244_v18  ;;  %v1698_v18 = vld [vmem:[%s6870_s3 + $0xb8] sm:$0xff] }
 0x19d   : > { %4247 = vmatprep.subr.bf16.mxu1 %v4246_v20  ;;  %v4250_v20 = vpack.c.bf16 %v1698_v18, %v1697_v15  ;;  %v4264_v15 = vpack.c.bf16 %v1688_v11, %v1687_v47  ;;  %v1732_v18 = vld [vmem:[%s6870_s3 + $0x1c8] sm:$0xff] }
 0x19e   : > { %v1760_v47 = vld [vmem:[%s6870_s3 + $0x2a8] sm:$0xff] }
 0x1a0   : > { %4249 = vmatpush3.bf16.msra.mxu1 %v4248_v37  ;;  %v1725_v37 = vld [vmem:[%s6870_s3 + $0x190] sm:$0xff] }
 0x1a1   : > { %4251 = vmatprep.subr.bf16.mxu1 %v4250_v20  ;;  %v1715_v20 = vld [vmem:[%s6870_s3 + $0x140] sm:$0xff] }
 0x20d   : > { %v1256_v28 = vpop.xlane.xlu0 %1255 }
 0x20e   : > { %v1303_v29 = vmul.f32 0.03125, %v1256_v28  ;;  %v1287_v28 = vsel %vm1253_vm1, %v5444_v36, 0.0 }
 0x210   : > { %v5500_v60 = vsub.f32 %v5408_v42, %v1303_v29  ;;  %v1269_v29 = vsel %vm1253_vm1, %v5421_v14, 0.0 }
 0x211   : > { %v1262_v51 = vpop.xlane.xlu0 %1261 }
 0x212   : > { %v1305_v63 = vmul.f32 0.03125, %v1262_v51  ;;  %v1335_v17 = vmul.f32 %v5500_v60, %v5500_v60  ;;  %v4252_v51 = vpack.c.bf16 %v1682_v25, %v1681_v32  ;;  %v1716_v32 = vld [vmem:[%s6870_s3 + $0x148] sm:$0xff] }
 0x214   : > { %v5505_v26 = vsub.f32 %v5416_v57, %v1305_v63  ;;  %v1351_v44 = vsel %vm1253_vm1, %v1335_v17, 0.0  ;;  %v1726_v63 = vld [vmem:[%s6870_s3 + $0x198] sm:$0xff]  ;;  %v1709_v17 = vld [vmem:[%s6870_s3 + $0x110] sm:$0xff]  ;;  %4253 = vmatpush3.bf16.msra.mxu1 %v4252_v51 }
 0x215   : > { %v1268_v31 = vpop.xlane.xlu1 %1267  ;;  %1352 = vadd.xlane.f32.xlu0 %v1351_v44  ;;  %v1710_v44 = vld [vmem:[%s6870_s3 + $0x118] sm:$0xff] }
 0x216   : > { %v1307_v61 = vmul.f32 0.03125, %v1268_v31  ;;  %v1337_v13 = vmul.f32 %v5505_v26, %v5505_v26  ;;  %v4274_v31 = vpack.c.bf16 %v1726_v63, %v1725_v37  ;;  %v4288_v37 = vpack.c.bf16 %v1716_v32, %v1715_v20  ;;  %v1689_v63 = vld [vmem:[%s6870_s3 + $0x70] sm:$0xff]  ;;  %v1762_v32 = vld [vmem:[%s6870_s3 + $0x2b8] sm:$0xff] }
 0x217   : > { %v1761_v20 = vld [vmem:[%s6870_s3 + $0x2b0] sm:$0xff] }
 0x218   : > { %v5511_v62 = vsub.f32 %v5424_v54, %v1307_v61  ;;  %v1357_v42 = vsel %vm1253_vm1, %v1337_v13, 0.0  ;;  %v4276_v61 = vpack.c.bf16 %v1710_v44, %v1709_v17  ;;  %v1699_v13 = vld [vmem:[%s6870_s3 + $0xc0] sm:$0xff]  ;;  %v1690_v17 = vld [vmem:[%s6870_s3 + $0x78] sm:$0xff]  ;;  %v1733_v44 = vld [vmem:[%s6870_s3 + $0x1d0] sm:$0xff] }
 0x219   : > { %v1274_v0 = vpop.xlane.xlu1 %1273  ;;  %1358 = vadd.xlane.f32.xlu1 %v1357_v42  ;;  %v1700_v42 = vld [vmem:[%s6870_s3 + $0xc8] sm:$0xff] }
 0x21a   : > { %v1309_v19 = vmul.f32 0.03125, %v1274_v0  ;;  %v1339_v57 = vmul.f32 %v5511_v62, %v5511_v62  ;;  %v4254_v0 = vpack.c.bf16 %v1700_v42, %v1699_v13  ;;  %v1717_v13 = vld [vmem:[%s6870_s3 + $0x150] sm:$0xff]  ;;  %v1718_v42 = vld [vmem:[%s6870_s3 + $0x158] sm:$0xff] }
 0x21c   : > { %v5517_v34 = vsub.f32 %v5432_v35, %v1309_v19  ;;  %v1363_v27 = vsel %vm1253_vm1, %v1339_v57, 0.0  ;;  %v1683_v19 = vld [vmem:[%s6870_s3 + $0x40] sm:$0xff]  ;;  %v1684_v57 = vld [vmem:[%s6870_s3 + $0x48] sm:$0xff]  ;;  %4255 = vmatprep.subr.bf16.mxu1 %v4254_v0 }
 0x21d   : > { %1364 = vadd.xlane.f32.xlu0 %v1363_v27  ;;  %v1280_v10 = vpop.xlane.xlu0 %1279  ;;  %v1727_v27 = vld [vmem:[%s6870_s3 + $0x1a0] sm:$0xff] }
 0x21e   : > { %v1311_v55 = vmul.f32 0.03125, %v1280_v10  ;;  %v1341_v54 = vmul.f32 %v5517_v34, %v5517_v34  ;;  %v1293_v10 = vsel %vm1253_vm1, %v5451_v24, 0.0 }
 0x220   : > { %v5523_v41 = vsub.f32 %v5440_v58, %v1311_v55  ;;  %v1369_v5 = vsel %vm1253_vm1, %v1341_v54, 0.0  ;;  %v1275_v55 = vsel %vm1253_vm1, %v5429_v21, 0.0  ;;  %v4256_v54 = vpack.c.bf16 %v1684_v57, %v1683_v19  ;;  %v1631_v57 = vld [vmem:[#allocation2 + $0x1] sm:$0xff] }
 0x221   : > { %v1286_v23 = vpop.xlane.xlu1 %1285  ;;  %1370 = vadd.xlane.f32.xlu1 %v1369_v5  ;;  %v1728_v5 = vld [vmem:[%s6870_s3 + $0x1a8] sm:$0xff]  ;;  %v4292_v19 = vpack.c.bf16 %v1718_v42, %v1717_v13  ;;  %1890 = vmatprep.mubr.f32.mxu1 %v1631_v57  ;;  %v1747_v42 = vld [vmem:[%s6870_s3 + $0x240] sm:$0xff]  ;;  %v1766_v57 = vld [vmem:[%s6870_s3 + $0x2d8] sm:$0xff] }
 0x222   : > { %v1313_v8 = vmul.f32 0.03125, %v1286_v23  ;;  %v1343_v35 = vmul.f32 %v5523_v41, %v5523_v41  ;;  %v1711_v23 = vld [vmem:[%s6870_s3 + $0x120] sm:$0xff]  ;;  %4257 = vmatpush3.bf16.msra.mxu1 %v4256_v54 }
 0x223   : > { %v1719_v54 = vld [vmem:[%s6870_s3 + $0x160] sm:$0xff] }
 0x224   : > { %v5529_v43 = vsub.f32 %v5447_v40, %v1313_v8  ;;  %v1375_v33 = vsel %vm1253_vm1, %v1343_v35, 0.0  ;;  %v1712_v8 = vld [vmem:[%s6870_s3 + $0x128] sm:$0xff]  ;;  %v4278_v35 = vpack.c.bf16 %v1728_v5, %v1727_v27  ;;  %v1735_v27 = vld [vmem:[%s6870_s3 + $0x1e0] sm:$0xff] }
 0x225   : > { %1376 = vadd.xlane.f32.xlu0 %v1375_v33  ;;  %v1292_v48 = vpop.xlane.xlu0 %1291  ;;  %v4280_v33 = vpack.c.bf16 %v1712_v8, %v1711_v23  ;;  %v1720_v5 = vld [vmem:[%s6870_s3 + $0x168] sm:$0xff] }
 0x226   : > { %v1315_v50 = vmul.f32 0.03125, %v1292_v48  ;;  %v1345_v58 = vmul.f32 %v5529_v43, %v5529_v43  ;;  %v1701_v48 = vld [vmem:[%s6870_s3 + $0xd0] sm:$0xff]  ;;  %v4296_v23 = vpack.c.bf16 %v1720_v5, %v1719_v54  ;;  %v1750_v54 = vld [vmem:[%s6870_s3 + $0x258] sm:$0xff] }
 0x227   : > { %v1632_v8 = vld [vmem:[#allocation2 + $0x9] sm:$0xff] }
 0x228   : > { %v5535_v49 = vsub.f32 %v5453_v22, %v1315_v50  ;;  %v1381_v16 = vsel %vm1253_vm1, %v1345_v58, 0.0  ;;  %v1702_v50 = vld [vmem:[%s6870_s3 + $0xd8] sm:$0xff] }
 0x229   : > { %v1298_v53 = vpop.xlane.xlu1 %1297  ;;  %1382 = vadd.xlane.f32.xlu1 %v1381_v16  ;;  %v4258_v58 = vpack.c.bf16 %v1702_v50, %v1701_v48  ;;  %v1685_v16 = vld [vmem:[%s6870_s3 + $0x50] sm:$0xff] }
 0x22a   : > { %v1317_v56 = vmul.f32 0.03125, %v1298_v53  ;;  %v1347_v40 = vmul.f32 %v5535_v49, %v5535_v49  ;;  %v1686_v53 = vld [vmem:[%s6870_s3 + $0x58] sm:$0xff]  ;;  %v1721_v50 = vld [vmem:[%s6870_s3 + $0x170] sm:$0xff] }
 0x22b   : > { %4259 = vmatprep.subr.bf16.mxu1 %v4258_v58 }
 0x22c   : > { %v5541_v3 = vsub.f32 %v5459_v45, %v1317_v56  ;;  %v1387_v59 = vsel %vm1253_vm1, %v1347_v40, 0.0  ;;  %v1724_v45 = vld [vmem:[%s6870_s3 + $0x188] sm:$0xff]  ;;  %v1729_v56 = vld [vmem:[%s6870_s3 + $0x1b0] sm:$0xff]  ;;  %v1299_v40 = vsel %vm1253_vm1, %v5457_v52, 0.0 }
 0x22d   : > { %1388 = vadd.xlane.f32.xlu0 %v1387_v59  ;;  %v4270_v9 = vpack.c.bf16 %v1724_v45, %v1723_v4  ;;  %v4260_v59 = vpack.c.bf16 %v1686_v53, %v1685_v16  ;;  %v5720_v16 = vld [vmem:[#allocation2] sm:$0xff] }
 0x22e   : > { %v1349_v1 = vmul.f32 %v5541_v3, %v5541_v3  ;;  %v1755_v53 = vld [vmem:[%s6870_s3 + $0x280] sm:$0xff] }
 0x22f   : > { %4271 = vmatprep.subr.bf16.mxu0 %v4270_v9  ;;  %4261 = vmatpush3.bf16.msra.mxu1 %v4260_v59 }
 0x230   : > { %v1393_v22 = vsel %vm1253_vm1, %v1349_v1, 0.0  ;;  %4273 = vmatpush3.bf16.msra.mxu0 %v4272_v12  ;;  %v1730_v1 = vld [vmem:[%s6870_s3 + $0x1b8] sm:$0xff]  ;;  %v1731_v12 = vld [vmem:[%s6870_s3 + $0x1c0] sm:$0xff] }
 0x231   : > { %1394 = vadd.xlane.f32.xlu1 %v1393_v22  ;;  %1258 = vadd.xlane.f32.xlu0 %v1257_v2  ;;  %v1713_v22 = vld [vmem:[%s6870_s3 + $0x130] sm:$0xff]  ;;  %v1714_v2 = vld [vmem:[%s6870_s3 + $0x138] sm:$0xff]  ;;  %v4282_v4 = vpack.c.bf16 %v1730_v1, %v1729_v56  ;;  %v4286_v25 = vpack.c.bf16 %v1732_v18, %v1731_v12  ;;  %v1756_v56 = vld [vmem:[%s6870_s3 + $0x288] sm:$0xff] }
 0x232   : > { %4275 = vmatprep.subr.bf16.mxu0 %v4274_v31  ;;  %v4284_v45 = vpack.c.bf16 %v1714_v2, %v1713_v22  ;;  %v4268_v31 = vpack.c.bf16 %v1690_v17, %v1689_v63  ;;  %v4302_v59 = vpack.c.bf16 %v1756_v56, %v1755_v53  ;;  %v1740_v1 = vld [vmem:[%s6870_s3 + $0x208] sm:$0xff]  ;;  %v1757_v22 = vld [vmem:[%s6870_s3 + $0x290] sm:$0xff]  ;;  %v1758_v2 = vld [vmem:[%s6870_s3 + $0x298] sm:$0xff] }
 0x233   : > { %v1744_v18 = vld [vmem:[%s6870_s3 + $0x228] sm:$0xff]  ;;  %v1787_v17 = vld [vmem:[%s6870_s3 + $0x380] sm:$0xff]  ;;  %v1753_v56 = vld [vmem:[%s6870_s3 + $0x270] sm:$0xff] }
 0x234   : > { %4277 = vmatpush3.bf16.msra.mxu0 %v4276_v61  ;;  %v1734_v61 = vld [vmem:[%s6870_s3 + $0x1d8] sm:$0xff]  ;;  %v1764_v63 = vld [vmem:[%s6870_s3 + $0x2c8] sm:$0xff] }
 0x235   : > { %1282 = vadd.xlane.f32.xlu1 %v1281_v6  ;;  %1264 = vadd.xlane.f32.xlu0 %v1263_v30  ;;  %v1703_v6 = vld [vmem:[%s6870_s3 + $0xe0] sm:$0xff]  ;;  %v1704_v30 = vld [vmem:[%s6870_s3 + $0xe8] sm:$0xff]  ;;  %v4290_v0 = vpack.c.bf16 %v1734_v61, %v1733_v44 }
 0x236   : > { %4279 = vmatprep.subr.bf16.mxu0 %v4278_v35  ;;  %v4262_v9 = vpack.c.bf16 %v1704_v30, %v1703_v6  ;;  %v1737_v35 = vld [vmem:[%s6870_s3 + $0x1f0] sm:$0xff]  ;;  %v1742_v30 = vld [vmem:[%s6870_s3 + $0x218] sm:$0xff]  ;;  %v1788_v44 = vld [vmem:[%s6870_s3 + $0x388] sm:$0xff] }
 0x237   : > { %v1741_v6 = vld [vmem:[%s6870_s3 + $0x210] sm:$0xff] }
 0x238   : > { %4281 = vmatpush3.bf16.msra.mxu0 %v4280_v33  ;;  %4263 = vmatprep.subr.bf16.mxu1 %v4262_v9  ;;  %v1738_v33 = vld [vmem:[%s6870_s3 + $0x1f8] sm:$0xff]  ;;  %v1759_v9 = vld [vmem:[%s6870_s3 + $0x2a0] sm:$0xff]  ;;  %v4308_v11 = vpack.c.bf16 %v1742_v30, %v1741_v6 }
 0x239   : > { %1288 = vadd.xlane.f32.xlu1 %v1287_v28  ;;  %1270 = vadd.xlane.f32.xlu0 %v1269_v29  ;;  %v1705_v28 = vld [vmem:[%s6870_s3 + $0xf0] sm:$0xff]  ;;  %v1706_v29 = vld [vmem:[%s6870_s3 + $0xf8] sm:$0xff]  ;;  %v4298_v48 = vpack.c.bf16 %v1738_v33, %v1737_v35  ;;  %v4310_v12 = vpack.c.bf16 %v1760_v47, %v1759_v9  ;;  %v1751_v33 = vld [vmem:[%s6870_s3 + $0x260] sm:$0xff] }
 0x23a   : > { %4283 = vmatprep.subr.bf16.mxu0 %v4282_v4  ;;  %4265 = vmatpush3.bf16.msra.mxu1 %v4264_v15  ;;  %v4266_v51 = vpack.c.bf16 %v1706_v29, %v1705_v28  ;;  %v1743_v15 = vld [vmem:[%s6870_s3 + $0x220] sm:$0xff]  ;;  %v1745_v28 = vld [vmem:[%s6870_s3 + $0x230] sm:$0xff]  ;;  %v1746_v29 = vld [vmem:[%s6870_s3 + $0x238] sm:$0xff] }
 0x23b   : > { %v4316_v61 = vpack.c.bf16 %v1746_v29, %v1745_v28 }
 0x23c   : > { %4285 = vmatpush3.bf16.msra.mxu0 %v4284_v45  ;;  %4267 = vmatprep.subr.bf16.mxu1 %v4266_v51  ;;  %v4306_v45 = vpack.c.bf16 %v1758_v2, %v1757_v22  ;;  %v1763_v51 = vld [vmem:[%s6870_s3 + $0x2c0] sm:$0xff]  ;;  %v1804_v22 = vld [vmem:[%s6870_s3 + $0x408] sm:$0xff] }
 0x23d   : > { %1294 = vadd.xlane.f32.xlu1 %v1293_v10  ;;  %1276 = vadd.xlane.f32.xlu0 %v1275_v55  ;;  %v1736_v10 = vld [vmem:[%s6870_s3 + $0x1e8] sm:$0xff]  ;;  %v4318_v13 = vpack.c.bf16 %v1764_v63, %v1763_v51 }
 0x23e   : > { %4287 = vmatprep.subr.bf16.mxu0 %v4286_v25  ;;  %4269 = vmatpush3.bf16.msra.mxu1 %v4268_v31  ;;  %v4294_v55 = vpack.c.bf16 %v1736_v10, %v1735_v27  ;;  %v4312_v25 = vpack.c.bf16 %v1744_v18, %v1743_v15  ;;  %v4334_v31 = vpack.c.bf16 %v1788_v44, %v1787_v17 }
 0x23f   : > { %4303 = vmatprep.subr.bf16.mxu1 %v4302_v59 }
 0x240   : > { %4289 = vmatpush3.bf16.msra.mxu0 %v4288_v37  ;;  %v4314_v37 = vpack.c.bf16 %v1762_v32, %v1761_v20 }
 0x241   : > { %1300 = vadd.xlane.f32.xlu1 %v1299_v40  ;;  %4291 = vmatprep.subr.bf16.mxu0 %v4290_v0  ;;  %v1739_v40 = vld [vmem:[%s6870_s3 + $0x200] sm:$0xff]  ;;  %v1748_v0 = vld [vmem:[%s6870_s3 + $0x248] sm:$0xff] }
 0x242   : > { %1891 = vmatmul.mubr.f32.vlgmr.msra.gmra.mrb[64].mxu1 %v5298_v39  ;;  %v1722_v39 = vld [vmem:[%s6870_s3 + $0x178] sm:$0xff]  ;;  %v4304_v4 = vpack.c.bf16 %v1740_v1, %v1739_v40  ;;  %v4320_v27 = vpack.c.bf16 %v1748_v0, %v1747_v42  ;;  %v1803_v1 = vld [vmem:[%s6870_s3 + $0x400] sm:$0xff] }
 0x243   : > { %1895 = vmatprep.mubr.f32.mxu1 %v1632_v8  ;;  %v4300_v58 = vpack.c.bf16 %v1722_v39, %v1721_v50  ;;  %v1768_v8 = vld [vmem:[%s6870_s3 + $0x2e8] sm:$0xff]  ;;  %v1769_v39 = vld [vmem:[%s6870_s3 + $0x2f0] sm:$0xff]  ;;  %v1754_v40 = vld [vmem:[%s6870_s3 + $0x278] sm:$0xff]  ;;  %v5831_v2 = vpack.c.bf16 %v1804_v22, %v1803_v1 }
 0x244   : > { %4293 = vmatpush3.bf16.msra.mxu0 %v4292_v19  ;;  %4305 = vmatpush3.bf16.msra.mxu1 %v4304_v4  ;;  %v1765_v19 = vld [vmem:[%s6870_s3 + $0x2d0] sm:$0xff]  ;;  %v4332_v59 = vpack.c.bf16 %v1754_v40, %v1753_v56 }
 0x245   : > { %4295 = vmatprep.subr.bf16.mxu0 %v4294_v55  ;;  %4307 = vmatprep.subr.bf16.mxu1 %v4306_v45  ;;  %v4322_v10 = vpack.c.bf16 %v1766_v57, %v1765_v19  ;;  %v1749_v55 = vld [vmem:[%s6870_s3 + $0x250] sm:$0xff] }
 0x246   : > { %1896 = vmatmul.mubr.f32.gmra.mrb[66].mxu1 %v5720_v16  ;;  %v4324_v5 = vpack.c.bf16 %v1750_v54, %v1749_v55 }
 0x248   : > { %4297 = vmatpush3.bf16.msra.mxu0 %v4296_v23  ;;  %4309 = vmatpush3.bf16.msra.mxu1 %v4308_v11  ;;  %v1767_v23 = vld [vmem:[%s6870_s3 + $0x2e0] sm:$0xff] }
 0x249   : > { %4299 = vmatprep.subr.bf16.mxu0 %v4298_v48  ;;  %4311 = vmatprep.subr.bf16.mxu1 %v4310_v12  ;;  %v4326_v35 = vpack.c.bf16 %v1768_v8, %v1767_v23  ;;  %v1752_v48 = vld [vmem:[%s6870_s3 + $0x268] sm:$0xff] }
 0x24a   : > { %v4328_v50 = vpack.c.bf16 %v1752_v48, %v1751_v33 }
 0x24c   : > { %4301 = vmatpush3.bf16.msra.mxu0 %v4300_v58  ;;  %4313 = vmatpush3.bf16.msra.mxu1 %v4312_v25  ;;  %v1770_v58 = vld [vmem:[%s6870_s3 + $0x2f8] sm:$0xff] }
 0x24d   : > { %4315 = vmatprep.subr.bf16.mxu1 %v4314_v37  ;;  %4335 = vmatprep.subr.bf16.mxu0 %v4334_v31  ;;  %v4330_v53 = vpack.c.bf16 %v1770_v58, %v1769_v39 }
 0x250   : > { %4317 = vmatpush3.bf16.msra.mxu1 %v4316_v61 }
 0x251   : > { %4319 = vmatprep.subr.bf16.mxu1 %v4318_v13 }
 0x254   : > { %4321 = vmatpush3.bf16.msra.mxu1 %v4320_v27 }
 0x255   : > { %4323 = vmatprep.subr.bf16.mxu1 %v4322_v10 }
 0x258   : > { %4325 = vmatpush3.bf16.msra.mxu1 %v4324_v5 }
 0x259   : > { %4327 = vmatprep.subr.bf16.mxu1 %v4326_v35 }
 0x25c   : > { %4329 = vmatpush3.bf16.msra.mxu1 %v4328_v50 }
 0x25d   : > { %4331 = vmatprep.subr.bf16.mxu1 %v4330_v53 }
 0x260   : > { %4333 = vmatpush3.bf16.msra.mxu1 %v4332_v59 }
 0x261   : > { %4367 = vmatprep.subr.bf16.mxu1 %v5831_v2 }
 0x2a2   : > { %v1353_v4 = vpop.xlane.xlu0 %1352 }
 0x2a3   : > { %v1399_v45 = vmul.f32 0.03125, %v1353_v4 }
 0x2a5   : > { %v1415_v6 = vadd.f32 1e-05, %v1399_v45 }
 0x2a6   : > { %v1359_v30 = vpop.xlane.xlu1 %1358 }
 0x2a7   : > { %4419 = vrsqrt.f32 %v1415_v6  ;;  %v1401_v9 = vmul.f32 0.03125, %v1359_v30 }
 0x2a9   : > { %v1417_v47 = vadd.f32 1e-05, %v1401_v9 }
 0x2aa   : > { %v1365_v11 = vpop.xlane.xlu0 %1364 }
 0x2ab   : > { %4421 = vrsqrt.f32 %v1417_v47  ;;  %v1403_v12 = vmul.f32 0.03125, %v1365_v11 }
 0x2ad   : > { %v1419_v15 = vadd.f32 1e-05, %v1403_v12 }
 0x2ae   : > { %v1371_v18 = vpop.xlane.xlu1 %1370 }
 0x2af   : > { %4423 = vrsqrt.f32 %v1419_v15  ;;  %v1405_v20 = vmul.f32 0.03125, %v1371_v18 }
 0x2b1   : > { %v4420_v32 = vpop.eup %4419  ;;  %v1421_v25 = vadd.f32 1e-05, %v1405_v20 }
 0x2b2   : > { %v1447_v37 = vmul.f32 %v4420_v32, %v5500_v60  ;;  %v1377_v28 = vpop.xlane.xlu0 %1376 }
 0x2b3   : > { %4425 = vrsqrt.f32 %v1421_v25  ;;  %v1407_v29 = vmul.f32 0.03125, %v1377_v28 }
 0x2b4   : > { %v1479_v51 = vmul.f32 0.044715, %v1447_v37  ;;  %v1463_v32 = vmul.f32 0.5, %v1447_v37 }
 0x2b5   : > { %v4422_v63 = vpop.eup %4421  ;;  %v1423_v17 = vadd.f32 1e-05, %v1407_v29 }
 0x2b6   : > { %v1495_v44 = vmul.f32 %v1479_v51, %v1447_v37  ;;  %v1449_v31 = vmul.f32 %v4422_v63, %v5505_v26  ;;  %v1383_v61 = vpop.xlane.xlu1 %1382 }
 0x2b7   : > { %4427 = vrsqrt.f32 %v1423_v17  ;;  %v1409_v13 = vmul.f32 0.03125, %v1383_v61 }
 0x2b8   : > { %v1511_v42 = vmul.f32 %v1495_v44, %v1447_v37  ;;  %v1481_v0 = vmul.f32 0.044715, %v1449_v31 }
 0x2b9   : > { %v4424_v19 = vpop.eup %4423  ;;  %v1425_v57 = vadd.f32 1e-05, %v1409_v13 }
 0x2ba   : > { %v1527_v27 = vadd.f32 %v1511_v42, %v1447_v37  ;;  %v1497_v10 = vmul.f32 %v1481_v0, %v1449_v31  ;;  %v5837_v60 = vmul.f32 %v4424_v19, %v5511_v62  ;;  %v1389_v55 = vpop.xlane.xlu0 %1388  ;;  %v1465_v37 = vmul.f32 0.5, %v1449_v31 }
 0x2bb   : > { %4429 = vrsqrt.f32 %v1425_v57  ;;  %v1411_v54 = vmul.f32 0.03125, %v1389_v55 }
 0x2bc   : > { %v1543_v5 = vmul.f32 0.7978846, %v1527_v27  ;;  %v1513_v23 = vmul.f32 %v1497_v10, %v1449_v31  ;;  %v1483_v8 = vmul.f32 0.044715, %v5837_v60 }
 0x2bd   : > { %v4426_v26 = vpop.eup %4425  ;;  %v1427_v35 = vadd.f32 1e-05, %v1411_v54 }
 0x2be   : > { %4431 = vtanh.f32 %v1543_v5  ;;  %v1529_v33 = vadd.f32 %v1513_v23, %v1449_v31  ;;  %v1499_v48 = vmul.f32 %v1483_v8, %v5837_v60  ;;  %v5842_v50 = vmul.f32 %v4426_v26, %v5517_v34  ;;  %v1395_v39 = vpop.xlane.xlu1 %1394  ;;  %v1771_v23 = vld [vmem:[%s6870_s3 + $0x300] sm:$0xff] }
 0x2bf   : > { %4433 = vrsqrt.f32 %v1427_v35  ;;  %v1413_v62 = vmul.f32 0.03125, %v1395_v39  ;;  %v1467_v31 = vmul.f32 0.5, %v5837_v60  ;;  %v1789_v35 = vld [vmem:[%s6870_s3 + $0x390] sm:$0xff] }
 0x2c0   : > { %v1545_v58 = vmul.f32 0.7978846, %v1529_v33  ;;  %v1515_v53 = vmul.f32 %v1499_v48, %v5837_v60  ;;  %v1485_v56 = vmul.f32 0.044715, %v5842_v50  ;;  %v1647_v48 = vld [vmem:[#allocation2 + $0x2] sm:$0xff] }
 0x2c1   : > { %v4428_v40 = vpop.eup %4427  ;;  %v1429_v59 = vadd.f32 1e-05, %v1413_v62 }
 0x2c2   : > { %4435 = vtanh.f32 %v1545_v58  ;;  %v1531_v1 = vadd.f32 %v1515_v53, %v5837_v60  ;;  %v1501_v22 = vmul.f32 %v1485_v56, %v5842_v50  ;;  %v5849_v4 = vmul.f32 %v4428_v40, %v5523_v41  ;;  %v1790_v60 = vld [vmem:[%s6870_s3 + $0x398] sm:$0xff] }
 0x2c3   : > { %4437 = vrsqrt.f32 %v1429_v59  ;;  %v5902_v40 = vld [vmem:[#allocation2 + $0x19] sm:$0xff] }
 0x2c4   : > { %v1547_v34 = vmul.f32 0.7978846, %v1531_v1  ;;  %v1517_v45 = vmul.f32 %v1501_v22, %v5842_v50  ;;  %v1487_v6 = vmul.f32 0.044715, %v5849_v4  ;;  %v1469_v1 = vmul.f32 0.5, %v5842_v50 }
 0x2c5   : > { %v4430_v30 = vpop.eup %4429 }
 0x2c6   : > { %4439 = vtanh.f32 %v1547_v34  ;;  %v1533_v9 = vadd.f32 %v1517_v45, %v5842_v50  ;;  %v1503_v47 = vmul.f32 %v1487_v6, %v5849_v4  ;;  %v5856_v11 = vmul.f32 %v4430_v30, %v5529_v43  ;;  %v1773_v45 = vld [vmem:[%s6870_s3 + $0x310] sm:$0xff]  ;;  %v1774_v6 = vld [vmem:[%s6870_s3 + $0x318] sm:$0xff]  ;;  %v1791_v50 = vld [vmem:[%s6870_s3 + $0x3a0] sm:$0xff] }
 0x2c7   : > { %v4338_v34 = vpack.c.bf16 %v1790_v60, %v1789_v35  ;;  %v1779_v35 = vld [vmem:[%s6870_s3 + $0x340] sm:$0xff] }
 0x2c8   : > { %v4432_v12 = vpop.eup %4431  ;;  %v1549_v15 = vmul.f32 0.7978846, %v1533_v9  ;;  %v1519_v41 = vmul.f32 %v1503_v47, %v5849_v4  ;;  %v1489_v18 = vmul.f32 0.044715, %v5856_v11  ;;  %v1792_v47 = vld [vmem:[%s6870_s3 + $0x3a8] sm:$0xff] }
 0x2c9   : > { %v4434_v20 = vpop.eup %4433  ;;  %v1575_v25 = vadd.f32 1.0, %v4432_v12 }
 0x2ca   : > { %4441 = vtanh.f32 %v1549_v15  ;;  %v1535_v28 = vadd.f32 %v1519_v41, %v5849_v4  ;;  %v1505_v29 = vmul.f32 %v1489_v18, %v5856_v11  ;;  %v5863_v51 = vmul.f32 %v4434_v20, %v5535_v49  ;;  %v1775_v20 = vld [vmem:[%s6870_s3 + $0x320] sm:$0xff] }
 0x2cb   : > { %v5865_v63 = vmul.f32 %v1575_v25, %v1463_v32  ;;  %v4340_v18 = vpack.c.bf16 %v1774_v6, %v1773_v45  ;;  %v1471_v32 = vmul.f32 0.5, %v5849_v4  ;;  %v1794_v4 = vld [vmem:[%s6870_s3 + $0x3b8] sm:$0xff] }
 0x2cc   : > { %v4436_v43 = vpop.eup %4435  ;;  %v1551_v17 = vmul.f32 0.7978846, %v1535_v28  ;;  %v1521_v44 = vmul.f32 %v1505_v29, %v5856_v11  ;;  %v1491_v61 = vmul.f32 0.044715, %v5863_v51  ;;  %v4342_v29 = vpack.c.bf16 %v1792_v47, %v1791_v50  ;;  %v6001_v45 = vld [vmem:[#allocation2 + $0x39] sm:$0xff] }
 0x2cd   : > { %v4438_v13 = vpop.eup %4437  ;;  %1607 = vst.msk [vmem:[#allocation2 + $0x11] sm:$0xff] %vm1253_vm1, %v5865_v63  ;;  %v1577_v42 = vadd.f32 1.0, %v4436_v43  ;;  %v1776_v43 = vld [vmem:[%s6870_s3 + $0x328] sm:$0xff]  ;;  %v1475_v60 = vmul.f32 0.5, %v5863_v51 }
 0x2ce   : > { %4443 = vtanh.f32 %v1551_v17  ;;  %v1537_v0 = vadd.f32 %v1521_v44, %v5856_v11  ;;  %v1507_v49 = vmul.f32 %v1491_v61, %v5863_v51  ;;  %v5874_v19 = vmul.f32 %v4438_v13, %v5541_v3  ;;  %v1772_v3 = vld [vmem:[%s6870_s3 + $0x308] sm:$0xff]  ;;  %v1793_v17 = vld [vmem:[%s6870_s3 + $0x3b0] sm:$0xff] }
 0x2cf   : > { %v5876_v57 = vmul.f32 %v1577_v42, %v1465_v37  ;;  %v4336_v59 = vpack.c.bf16 %v1772_v3, %v1771_v23  ;;  %v5947_v42 = vld [vmem:[#allocation2 + $0x29] sm:$0xff] }
 0x2d0   : > { %v4440_v27 = vpop.eup %4439  ;;  %v1553_v10 = vmul.f32 0.7978846, %v1537_v0  ;;  %v1523_v55 = vmul.f32 %v1507_v49, %v5863_v51  ;;  %v1493_v54 = vmul.f32 0.044715, %v5874_v19  ;;  %v4344_v0 = vpack.c.bf16 %v1776_v43, %v1775_v20  ;;  %v1796_v23 = vld [vmem:[%s6870_s3 + $0x3c8] sm:$0xff] }
 0x2d1   : > { %1608 = vst.msk [vmem:[#allocation2 + $0x21] sm:$0xff] %vm1253_vm1, %v5876_v57  ;;  %v1579_v5 = vadd.f32 1.0, %v4440_v27  ;;  %v1473_v49 = vmul.f32 0.5, %v5856_v11  ;;  %v1795_v11 = vld [vmem:[%s6870_s3 + $0x3c0] sm:$0xff]  ;;  %v1800_v20 = vld [vmem:[%s6870_s3 + $0x3e8] sm:$0xff] }
 0x2d2   : > { %4445 = vtanh.f32 %v1553_v10  ;;  %v1539_v8 = vadd.f32 %v1523_v55, %v5863_v51  ;;  %v1509_v26 = vmul.f32 %v1493_v54, %v5874_v19  ;;  %v4346_v55 = vpack.c.bf16 %v1794_v4, %v1793_v17  ;;  %v1777_v54 = vld [vmem:[%s6870_s3 + $0x330] sm:$0xff]  ;;  %v1784_v17 = vld [vmem:[%s6870_s3 + $0x368] sm:$0xff] }
 0x2d3   : > { %v5897_v33 = vmul.f32 %v1579_v5, %v1467_v31  ;;  %v1778_v31 = vld [vmem:[%s6870_s3 + $0x338] sm:$0xff]  ;;  %v1801_v4 = vld [vmem:[%s6870_s3 + $0x3f0] sm:$0xff] }
 0x2d4   : > { %v4442_v39 = vpop.eup %4441  ;;  %v1555_v62 = vmul.f32 0.7978846, %v1539_v8  ;;  %v1525_v58 = vmul.f32 %v1509_v26, %v5874_v19  ;;  %v5900_v53 = vld [vmem:[#allocation2 + $0x11] sm:$0xff]  ;;  %v4348_v26 = vpack.c.bf16 %v1778_v31, %v1777_v54 }
 0x2d5   : > { %v1617_v56 = vld [vmem:[#allocation2 + $0x10] sm:$0xff]  ;;  %1609 = vst.msk [vmem:[#allocation2 + $0x31] sm:$0xff] %vm1253_vm1, %v5897_v33  ;;  %v1581_v22 = vadd.f32 1.0, %v4442_v39  ;;  %1900 = vmatprep.mubr.f32.mxu1 %v5900_v53  ;;  %v1618_v9 = vld [vmem:[#allocation2 + $0x18] sm:$0xff] }
 0x2d6   : > { %2035 = vmatprep.mubr.f32.mxu0 %v1617_v56  ;;  %4447 = vtanh.f32 %v1555_v62  ;;  %v1541_v30 = vadd.f32 %v1525_v58, %v5874_v19  ;;  %1901 = vmatmul.mubr.f32.gmra.mrb[68].mxu1 %v1617_v56  ;;  %v1648_v28 = vld [vmem:[#allocation2 + $0xa] sm:$0xff]  ;;  %v5952_v10 = vld [vmem:[#allocation2 + $0x12] sm:$0xff]  ;;  %v4350_v62 = vpack.c.bf16 %v1796_v23, %v1795_v11 }
 0x2d7   : > { %2036 = vmatmul.mubr.f32.vlgmr.msra.gmra.mrb[80].mxu0 %v1647_v48  ;;  %v5921_v12 = vmul.f32 %v1581_v22, %v1469_v1  ;;  %1905 = vmatprep.mubr.f32.mxu1 %v5902_v40  ;;  %v1780_v58 = vld [vmem:[%s6870_s3 + $0x348] sm:$0xff]  ;;  %v1797_v56 = vld [vmem:[%s6870_s3 + $0x3d0] sm:$0xff]  ;;  %v1798_v1 = vld [vmem:[%s6870_s3 + $0x3d8] sm:$0xff] }
 0x2d8   : > { %2040 = vmatprep.mubr.f32.mxu0 %v1618_v9  ;;  %v4444_v15 = vpop.eup %4443  ;;  %v1557_v41 = vmul.f32 0.7978846, %v1541_v30  ;;  %4337 = vmatpush3.bf16.msra.mxu0 %v4336_v59  ;;  %v5936_v44 = vld [vmem:[#allocation2 + $0x21] sm:$0xff]  ;;  %v4352_v6 = vpack.c.bf16 %v1780_v58, %v1779_v35  ;;  %v1477_v30 = vmul.f32 0.5, %v5874_v19  ;;  %v4354_v47 = vpack.c.bf16 %v1798_v1, %v1797_v56  ;;  %v1785_v11 = vld [vmem:[%s6870_s3 + $0x370] sm:$0xff]  ;;  %v1786_v23 = vld [vmem:[%s6870_s3 + $0x378] sm:$0xff] }
 0x2d9   : > { %1610 = vst.msk [vmem:[#allocation2 + $0x41] sm:$0xff] %vm1253_vm1, %v5921_v12  ;;  %v1583_v25 = vadd.f32 1.0, %v4444_v15  ;;  %4339 = vmatprep.subr.bf16.mxu0 %v4338_v34  ;;  %v5938_v61 = vld [vmem:[#allocation2 + $0x20] sm:$0xff]  ;;  %v5962_v5 = vld [vmem:[#allocation2 + $0x28] sm:$0xff]  ;;  %v1781_v15 = vld [vmem:[%s6870_s3 + $0x350] sm:$0xff] }
 0x2da   : > { %4449 = vtanh.f32 %v1557_v41  ;;  %1906 = vmatmul.mubr.f32.gmra.mrb[70].mxu1 %v1618_v9  ;;  %v5980_v39 = vld [vmem:[#allocation2 + $0x1a] sm:$0xff]  ;;  %v6006_v50 = vld [vmem:[#allocation2 + $0x22] sm:$0xff] }
 0x2db   : > { %2041 = vmatmul.mubr.f32.gmra.mrb[82].mxu0 %v1648_v28  ;;  %v5943_v13 = vmul.f32 %v1583_v25, %v1471_v32  ;;  %1910 = vmatprep.mubr.f32.mxu1 %v5936_v44  ;;  %v1782_v41 = vld [vmem:[%s6870_s3 + $0x358] sm:$0xff]  ;;  %v1799_v19 = vld [vmem:[%s6870_s3 + $0x3e0] sm:$0xff] }
 0x2dc   : > { %2045 = vmatprep.mubr.f32.mxu0 %v5938_v61  ;;  %v4446_v37 = vpop.eup %4445  ;;  %4341 = vmatpush3.bf16.msra.mxu0 %v4340_v18  ;;  %v5990_v59 = vld [vmem:[#allocation2 + $0x31] sm:$0xff]  ;;  %v4356_v25 = vpack.c.bf16 %v1782_v41, %v1781_v15  ;;  %v1783_v28 = vld [vmem:[%s6870_s3 + $0x360] sm:$0xff]  ;;  %v4358_v43 = vpack.c.bf16 %v1800_v20, %v1799_v19 }
 0x2dd   : > { %1611 = vst.msk [vmem:[#allocation2 + $0x51] sm:$0xff] %vm1253_vm1, %v5943_v13  ;;  %v1585_v27 = vadd.f32 1.0, %v4446_v37  ;;  %4343 = vmatprep.subr.bf16.mxu0 %v4342_v29  ;;  %v5992_v51 = vld [vmem:[#allocation2 + $0x30] sm:$0xff]  ;;  %v6016_v18 = vld [vmem:[#allocation2 + $0x38] sm:$0xff] }
 0x2de   : > { %1911 = vmatmul.mubr.f32.gmra.mrb[72].mxu1 %v5938_v61  ;;  %v6033_v29 = vld [vmem:[#allocation2 + $0x2a] sm:$0xff]  ;;  %v6054_v54 = vld [vmem:[#allocation2 + $0x32] sm:$0xff] }
 0x2df   : > { %2046 = vmatmul.mubr.f32.gmra.mrb[84].mxu0 %v5952_v10  ;;  %v5970_v3 = vmul.f32 %v1585_v27, %v1473_v49  ;;  %1915 = vmatprep.mubr.f32.mxu1 %v5947_v42  ;;  %v1802_v49 = vld [vmem:[%s6870_s3 + $0x3f8] sm:$0xff]  ;;  %v6052_v27 = vld [vmem:[#allocation2 + $0x49] sm:$0xff] }
 0x2e0   : > { %2050 = vmatprep.mubr.f32.mxu0 %v5962_v5  ;;  %v4448_v8 = vpop.eup %4447  ;;  %4345 = vmatpush3.bf16.msra.mxu0 %v4344_v0  ;;  %v6043_v37 = vld [vmem:[#allocation2 + $0x41] sm:$0xff]  ;;  %v4362_v31 = vpack.c.bf16 %v1802_v49, %v1801_v4  ;;  %v6118_v20 = vld [vmem:[#allocation2 + $0x79] sm:$0xff]  ;;  %v1805_v4 = vld [vmem:[%s6870_s3 + $0x410] sm:$0xff] }
 0x2e1   : > { %1612 = vst.msk [vmem:[#allocation2 + $0x61] sm:$0xff] %vm1253_vm1, %v5970_v3  ;;  %v1587_v48 = vadd.f32 1.0, %v4448_v8  ;;  %4347 = vmatprep.subr.bf16.mxu0 %v4346_v55  ;;  %v6045_v0 = vld [vmem:[#allocation2 + $0x40] sm:$0xff]  ;;  %v4360_v55 = vpack.c.bf16 %v1784_v17, %v1783_v28  ;;  %v6064_v8 = vld [vmem:[#allocation2 + $0x48] sm:$0xff]  ;;  %v1806_v49 = vld [vmem:[%s6870_s3 + $0x418] sm:$0xff] }
 0x2e2   : > { %1916 = vmatmul.mubr.f32.gmra.mrb[74].mxu1 %v5962_v5  ;;  %v6068_v35 = vld [vmem:[#allocation2 + $0x3a] sm:$0xff]  ;;  %v6080_v58 = vld [vmem:[#allocation2 + $0x42] sm:$0xff] }
 0x2e3   : > { %2051 = vmatmul.mubr.f32.gmra.mrb[86].mxu0 %v5980_v39  ;;  %v5997_v22 = vmul.f32 %v1587_v48, %v1475_v60  ;;  %1920 = vmatprep.mubr.f32.mxu1 %v5990_v59 }
 0x2e4   : > { %2055 = vmatprep.mubr.f32.mxu0 %v5992_v51  ;;  %v4450_v34 = vpop.eup %4449  ;;  %4349 = vmatpush3.bf16.msra.mxu0 %v4348_v26  ;;  %v4364_v26 = vpack.c.bf16 %v1786_v23, %v1785_v11  ;;  %v6072_v60 = vld [vmem:[#allocation2 + $0x51] sm:$0xff]  ;;  %v1807_v23 = vld [vmem:[%s6870_s3 + $0x420] sm:$0xff] }
 0x2e5   : > { %1613 = vst.msk [vmem:[#allocation2 + $0x71] sm:$0xff] %vm1253_vm1, %v5997_v22  ;;  %v1589_v9 = vadd.f32 1.0, %v4450_v34  ;;  %4351 = vmatprep.subr.bf16.mxu0 %v4350_v62  ;;  %v6074_v48 = vld [vmem:[#allocation2 + $0x50] sm:$0xff]  ;;  %v6078_v62 = vld [vmem:[#allocation2 + $0x59] sm:$0xff] }
 0x2e6   : > { %1921 = vmatmul.mubr.f32.gmra.mrb[76].mxu1 %v5992_v51  ;;  %v6084_v56 = vld [vmem:[#allocation2 + $0x58] sm:$0xff]  ;;  %v6088_v1 = vld [vmem:[#allocation2 + $0x4a] sm:$0xff] }
 0x2e7   : > { %2056 = vmatmul.mubr.f32.gmra.mrb[88].mxu0 %v6006_v50  ;;  %v6024_v32 = vmul.f32 %v1589_v9, %v1477_v30  ;;  %1925 = vmatprep.mubr.f32.mxu1 %v6001_v45  ;;  %v6098_v30 = vld [vmem:[#allocation2 + $0x69] sm:$0xff]  ;;  %v6100_v9 = vld [vmem:[#allocation2 + $0x52] sm:$0xff] }
 0x2e8   : > { %2060 = vmatprep.mubr.f32.mxu0 %v6016_v18  ;;  %4353 = vmatpush3.bf16.msra.mxu0 %v4352_v6  ;;  %v6092_v34 = vld [vmem:[#allocation2 + $0x61] sm:$0xff] }
 0x2e9   : > { %1614 = vst.msk [vmem:[#allocation2 + $0x81] sm:$0xff] %vm1253_vm1, %v6024_v32  ;;  %4355 = vmatprep.subr.bf16.mxu0 %v4354_v47  ;;  %v6094_v6 = vld [vmem:[#allocation2 + $0x60] sm:$0xff]  ;;  %v6104_v47 = vld [vmem:[#allocation2 + $0x68] sm:$0xff] }
 0x2ea   : > { %1926 = vmatmul.mubr.f32.gmra.mrb[78].mxu1 %v6016_v18  ;;  %v6108_v15 = vld [vmem:[#allocation2 + $0x5a] sm:$0xff] }
 0x2eb   : > { %2061 = vmatmul.mubr.f32.gmra.mrb[90].mxu0 %v6033_v29  ;;  %1930 = vmatprep.mubr.f32.mxu1 %v6043_v37 }
 0x2ec   : > { %2065 = vmatprep.mubr.f32.mxu0 %v6045_v0  ;;  %4357 = vmatpush3.bf16.msra.mxu0 %v4356_v25  ;;  %v6112_v41 = vld [vmem:[#allocation2 + $0x71] sm:$0xff]  ;;  %v6120_v25 = vld [vmem:[#allocation2 + $0x62] sm:$0xff] }
 0x2ed   : > { %4359 = vmatprep.subr.bf16.mxu0 %v4358_v43  ;;  %v6114_v19 = vld [vmem:[#allocation2 + $0x70] sm:$0xff]  ;;  %v6124_v28 = vld [vmem:[#allocation2 + $0x78] sm:$0xff] }
 0x2ee   : > { %1931 = vmatmul.mubr.f32.gmra.mrb[80].mxu1 %v6045_v0  ;;  %v6128_v43 = vld [vmem:[#allocation2 + $0x6a] sm:$0xff] }
 0x2ef   : > { %2066 = vmatmul.mubr.f32.gmra.mrb[92].mxu0 %v6054_v54  ;;  %1935 = vmatprep.mubr.f32.mxu1 %v6052_v27 }
 0x2f0   : > { %2070 = vmatprep.mubr.f32.mxu0 %v6064_v8  ;;  %4361 = vmatpush3.bf16.msra.mxu0 %v4360_v55  ;;  %v6132_v17 = vld [vmem:[#allocation2 + $0x80] sm:$0xff]  ;;  %v6142_v55 = vld [vmem:[#allocation2 + $0x72] sm:$0xff]  ;;  %v6146_v11 = vld [vmem:[#allocation2 + $0x88] sm:$0xff] }
 0x2f1   : > { %4363 = vmatprep.subr.bf16.mxu0 %v4362_v31  ;;  %v4370_v31 = vpack.c.bf16 %v1806_v49, %v1805_v4  ;;  %v1809_v4 = vld [vmem:[%s6870_s3 + $0x430] sm:$0xff]  ;;  %v1810_v49 = vld [vmem:[%s6870_s3 + $0x438] sm:$0xff] }
 0x2f2   : > { %1936 = vmatmul.mubr.f32.gmra.mrb[82].mxu1 %v6064_v8 }
 0x2f3   : > { %2071 = vmatmul.mubr.f32.gmra.mrb[94].mxu0 %v6068_v35  ;;  %1940 = vmatprep.mubr.f32.mxu1 %v6072_v60 }
 0x2f4   : > { %2075 = vmatprep.mubr.f32.mxu0 %v6074_v48  ;;  %4365 = vmatpush3.bf16.msra.mxu0 %v4364_v26  ;;  %v1808_v26 = vld [vmem:[%s6870_s3 + $0x428] sm:$0xff] }
 0x2f6   : > { %1941 = vmatmul.mubr.f32.gmra.mrb[84].mxu1 %v6074_v48 }
 0x2f7   : > { %2076 = vmatmul.mubr.f32.gmra.mrb[96].mxu0 %v6080_v58  ;;  %1945 = vmatprep.mubr.f32.mxu1 %v6078_v62 }
 0x2f8   : > { %2080 = vmatprep.mubr.f32.mxu0 %v6084_v56 }
 0x2fa   : > { %1946 = vmatmul.mubr.f32.gmra.mrb[86].mxu1 %v6084_v56 }
 0x2fb   : > { %2081 = vmatmul.mubr.f32.gmra.mrb[98].mxu0 %v6088_v1  ;;  %1950 = vmatprep.mubr.f32.mxu1 %v6092_v34 }
 0x2fc   : > { %2085 = vmatprep.mubr.f32.mxu0 %v6094_v6 }
 0x2fe   : > { %1951 = vmatmul.mubr.f32.gmra.mrb[88].mxu1 %v6094_v6 }
 0x2ff   : > { %2086 = vmatmul.mubr.f32.gmra.mrb[100].mxu0 %v6100_v9  ;;  %1955 = vmatprep.mubr.f32.mxu1 %v6098_v30 }
 0x300   : > { %2090 = vmatprep.mubr.f32.mxu0 %v6104_v47 }
 0x302   : > { %1956 = vmatmul.mubr.f32.gmra.mrb[90].mxu1 %v6104_v47 }
 0x303   : > { %2091 = vmatmul.mubr.f32.gmra.mrb[102].mxu0 %v6108_v15  ;;  %1960 = vmatprep.mubr.f32.mxu1 %v6112_v41 }
 0x304   : > { %2095 = vmatprep.mubr.f32.mxu0 %v6114_v19 }
 0x306   : > { %1961 = vmatmul.mubr.f32.gmra.mrb[92].mxu1 %v6114_v19 }
 0x307   : > { %2096 = vmatmul.mubr.f32.gmra.mrb[104].mxu0 %v6120_v25  ;;  %1965 = vmatprep.mubr.f32.mxu1 %v6118_v20 }
 0x308   : > { %2100 = vmatprep.mubr.f32.mxu0 %v6124_v28 }
 0x30a   : > { %1966 = vmatmul.mubr.f32.gmra.mrb[94].mxu1 %v6124_v28 }
 0x30b   : > { %2101 = vmatmul.mubr.f32.gmra.mrb[106].mxu0 %v6128_v43  ;;  %2180 = vmatprep.mubr.f32.mxu1 %v5952_v10  ;;  %v6157_v10 = vld [vmem:[#allocation2 + $0x7a] sm:$0xff] }
 0x30c   : > { %2105 = vmatprep.mubr.f32.mxu0 %v6132_v17 }
 0x30e   : > { %2181 = vmatmul.mubr.f32.vlgmr.msra.gmra.mrb[96].mxu1 %v5900_v53  ;;  %v4374_v53 = vpack.c.bf16 %v1808_v26, %v1807_v23 }
 0x30f   : > { %2106 = vmatmul.mubr.f32.gmra.mrb[108].mxu0 %v6142_v55  ;;  %2185 = vmatprep.mubr.f32.mxu1 %v5980_v39  ;;  %v1812_v39 = vld [vmem:[%s6870_s3 + $0x448] sm:$0xff] }
 0x310   : > { %2110 = vmatprep.mubr.f32.mxu0 %v6146_v11  ;;  %4369 = vmatpush3.bf16.msra.mxu1 %v5831_v2  ;;  %v4378_v2 = vpack.c.bf16 %v1810_v49, %v1809_v4 }
 0x311   : > { %4371 = vmatprep.subr.bf16.mxu1 %v4370_v31 }
 0x312   : > { %2186 = vmatmul.mubr.f32.gmra.mrb[98].mxu1 %v5902_v40  ;;  %v1811_v40 = vld [vmem:[%s6870_s3 + $0x440] sm:$0xff] }
 0x313   : > { %2111 = vmatmul.mubr.f32.gmra.mrb[110].mxu0 %v6157_v10  ;;  %2190 = vmatprep.mubr.f32.mxu1 %v6006_v50 }
 0x314   : > { %2325 = vmatprep.mubr.f32.mxu0 %v5936_v44  ;;  %4373 = vmatpush3.bf16.msra.mxu1 %v4370_v31  ;;  %v4382_v31 = vpack.c.bf16 %v1812_v39, %v1811_v40 }
 0x315   : > { %4375 = vmatprep.subr.bf16.mxu1 %v4374_v53 }
 0x316   : > { %2191 = vmatmul.mubr.f32.gmra.mrb[100].mxu1 %v5936_v44  ;;  %v1813_v44 = vld [vmem:[%s6870_s3 + $0x450] sm:$0xff] }
 0x317   : > { %2326 = vmatmul.mubr.f32.vlgmr.msra.gmra.mrb[112].mxu0 %v5938_v61  ;;  %2195 = vmatprep.mubr.f32.mxu1 %v6033_v29  ;;  %v1814_v61 = vld [vmem:[%s6870_s3 + $0x458] sm:$0xff] }
 0x318   : > { %2330 = vmatprep.mubr.f32.mxu0 %v5947_v42  ;;  %4377 = vmatpush3.bf16.msra.mxu1 %v4374_v53  ;;  %v4386_v23 = vpack.c.bf16 %v1814_v61, %v1813_v44  ;;  %v3594_v53 = vpop.f32.mrb[64].mxu1 }
 0x319   : > { %4379 = vmatprep.subr.bf16.mxu1 %v4378_v2  ;;  %v3595_v4 = vpop.f32.mrb[65].mxu1 }
 0x31a   : > { %2196 = vmatmul.mubr.f32.gmra.mrb[102].mxu1 %v5947_v42  ;;  %v1815_v42 = vld [vmem:[%s6870_s3 + $0x460] sm:$0xff]  ;;  %v6209_v49 = vadd.f32 %v3595_v4, %v3594_v53 }
 0x31b   : > { %2331 = vmatmul.mubr.f32.gmra.mrb[114].mxu0 %v5962_v5  ;;  %2200 = vmatprep.mubr.f32.mxu1 %v6054_v54  ;;  %v1816_v5 = vld [vmem:[%s6870_s3 + $0x468] sm:$0xff] }
 0x31c   : > { %2335 = vmatprep.mubr.f32.mxu0 %v5990_v59  ;;  %4381 = vmatpush3.bf16.msra.mxu1 %v4378_v2  ;;  %v4390_v26 = vpack.c.bf16 %v1816_v5, %v1815_v42  ;;  %v3597_v2 = vpop.f32.mrb[66].mxu1 }
 0x31d   : > { %4383 = vmatprep.subr.bf16.mxu1 %v4382_v31 }
 0x31e   : > { %2201 = vmatmul.mubr.f32.gmra.mrb[104].mxu1 %v5990_v59  ;;  %v1817_v59 = vld [vmem:[%s6870_s3 + $0x470] sm:$0xff] }
 0x31f   : > { %2336 = vmatmul.mubr.f32.gmra.mrb[116].mxu0 %v5992_v51  ;;  %2205 = vmatprep.mubr.f32.mxu1 %v6068_v35  ;;  %v1818_v51 = vld [vmem:[%s6870_s3 + $0x478] sm:$0xff] }
 0x320   : > { %2340 = vmatprep.mubr.f32.mxu0 %v6001_v45  ;;  %4385 = vmatpush3.bf16.msra.mxu1 %v4382_v31 }
 0x321   : > { %4387 = vmatprep.subr.bf16.mxu1 %v4386_v23 }
 0x322   : > { %2206 = vmatmul.mubr.f32.gmra.mrb[106].mxu1 %v6001_v45  ;;  %v4394_v45 = vpack.c.bf16 %v1818_v51, %v1817_v59 }
 0x323   : > { %2341 = vmatmul.mubr.f32.gmra.mrb[118].mxu0 %v6016_v18  ;;  %2210 = vmatprep.mubr.f32.mxu1 %v6080_v58  ;;  %v3598_v18 = vpop.f32.mrb[67].mxu1 }
 0x324   : > { %2345 = vmatprep.mubr.f32.mxu0 %v6043_v37  ;;  %4389 = vmatpush3.bf16.msra.mxu1 %v4386_v23  ;;  %v6215_v40 = vadd.f32 %v3598_v18, %v3597_v2 }
 0x325   : > { %4391 = vmatprep.subr.bf16.mxu1 %v4390_v26 }
 0x326   : > { %2211 = vmatmul.mubr.f32.gmra.mrb[108].mxu1 %v6043_v37  ;;  %v1667_v37 = vld [vmem:[#allocation2 + $0x82] sm:$0xff] }
 0x327   : > { %2346 = vmatmul.mubr.f32.gmra.mrb[120].mxu0 %v6045_v0  ;;  %2215 = vmatprep.mubr.f32.mxu1 %v6088_v1  ;;  %v1665_v0 = vld [vmem:[#allocation2 + $0x81] sm:$0xff] }
 0x328   : > { %2350 = vmatprep.mubr.f32.mxu0 %v6052_v27  ;;  %4393 = vmatpush3.bf16.msra.mxu1 %v4390_v26 }
 0x329   : > { %4395 = vmatprep.subr.bf16.mxu1 %v4394_v45 }
 0x32a   : > { %2216 = vmatmul.mubr.f32.gmra.mrb[110].mxu1 %v6052_v27  ;;  %v1668_v27 = vld [vmem:[#allocation2 + $0x8a] sm:$0xff] }
 0x32b   : > { %2351 = vmatmul.mubr.f32.gmra.mrb[122].mxu0 %v6064_v8  ;;  %2220 = vmatprep.mubr.f32.mxu1 %v6100_v9  ;;  %v1666_v8 = vld [vmem:[#allocation2 + $0x89] sm:$0xff] }
 0x32c   : > { %2355 = vmatprep.mubr.f32.mxu0 %v6072_v60  ;;  %4397 = vmatpush3.bf16.msra.mxu1 %v4394_v45 }
 0x32e   : > { %2221 = vmatmul.mubr.f32.gmra.mrb[112].mxu1 %v6072_v60  ;;  %v1671_v60 = vld [vmem:[#allocation2 + $0x91] sm:$0xff] }
 0x32f   : > { %2356 = vmatmul.mubr.f32.gmra.mrb[124].mxu0 %v6074_v48  ;;  %2225 = vmatprep.mubr.f32.mxu1 %v6108_v15  ;;  %v1672_v48 = vld [vmem:[#allocation2 + $0x99] sm:$0xff] }
 0x330   : > { %2360 = vmatprep.mubr.f32.mxu0 %v6078_v62 }
 0x332   : > { %2226 = vmatmul.mubr.f32.gmra.mrb[114].mxu1 %v6078_v62 }
 0x333   : > { %2361 = vmatmul.mubr.f32.gmra.mrb[126].mxu0 %v6084_v56  ;;  %2230 = vmatprep.mubr.f32.mxu1 %v6120_v25 }
 0x334   : > { %2365 = vmatprep.mubr.f32.mxu0 %v6092_v34 }
 0x336   : > { %2231 = vmatmul.mubr.f32.gmra.mrb[116].mxu1 %v6092_v34 }
 0x337   : > { %2366 = vmatmul.mubr.f32.gmra.mrb[128].mxu0 %v6094_v6  ;;  %2235 = vmatprep.mubr.f32.mxu1 %v6128_v43 }
 0x338   : > { %2370 = vmatprep.mubr.f32.mxu0 %v6098_v30 }
 0x33a   : > { %2236 = vmatmul.mubr.f32.gmra.mrb[118].mxu1 %v6098_v30 }
 0x33b   : > { %2371 = vmatmul.mubr.f32.gmra.mrb[130].mxu0 %v6104_v47  ;;  %2240 = vmatprep.mubr.f32.mxu1 %v6142_v55 }
 0x33c   : > { %2375 = vmatprep.mubr.f32.mxu0 %v6112_v41 }
 0x33e   : > { %2241 = vmatmul.mubr.f32.gmra.mrb[120].mxu1 %v6112_v41 }
 0x33f   : > { %2376 = vmatmul.mubr.f32.gmra.mrb[132].mxu0 %v6114_v19  ;;  %2245 = vmatprep.mubr.f32.mxu1 %v6157_v10 }
 0x340   : > { %2380 = vmatprep.mubr.f32.mxu0 %v6118_v20 }
 0x342   : > { %2246 = vmatmul.mubr.f32.gmra.mrb[122].mxu1 %v6118_v20 }
 0x343   : > { %2381 = vmatmul.mubr.f32.gmra.mrb[134].mxu0 %v6124_v28  ;;  %2250 = vmatprep.mubr.f32.mxu1 %v1667_v37 }
 0x344   : > { %2385 = vmatprep.mubr.f32.mxu0 %v1665_v0 }
 0x346   : > { %2251 = vmatmul.mubr.f32.gmra.mrb[124].mxu1 %v1665_v0 }
 0x347   : > { %2386 = vmatmul.mubr.f32.gmra.mrb[136].mxu0 %v6132_v17  ;;  %2255 = vmatprep.mubr.f32.mxu1 %v1668_v27 }
 0x348   : > { %2390 = vmatprep.mubr.f32.mxu0 %v1666_v8 }
 0x34a   : > { %2256 = vmatmul.mubr.f32.gmra.mrb[126].mxu1 %v1666_v8 }
 0x34b   : > { %2391 = vmatmul.mubr.f32.gmra.mrb[138].mxu0 %v6146_v11  ;;  %4022 = vmatprep.mubr.f32.mxu1 %v6006_v50  ;;  %v1674_v50 = vld [vmem:[#allocation2 + $0x9a] sm:$0xff] }
 0x34c   : > { %2395 = vmatprep.mubr.f32.mxu0 %v1671_v60 }
 0x34e   : > { %4023 = vmatmul.mubr.f32.vlgmr.msra.gmra.mrb[128].mxu1 %v6033_v29  ;;  %v6262_v29 = vld [vmem:[%s6871_s4] ss:$0 sm:$0xff] }
 0x34f   : > { %2396 = vmatmul.mubr.f32.gmra.mrb[140].mxu0 %v5720_v16  ;;  %4025 = vmatprep.mubr.f32.mxu1 %v6054_v54  ;;  %v1893_v56 = vadd.f32 %v6209_v49, %v6262_v29  ;;  %v1898_v41 = vadd.f32 %v6215_v40, %v6262_v29 }
 0x350   : > { %2400 = vmatprep.mubr.f32.mxu0 %v1672_v48 }
 0x352   : > { %4026 = vmatmul.mubr.f32.gmra.mrb[130].mxu1 %v6068_v35 }
 0x353   : > { %2401 = vmatmul.mubr.f32.gmra.mrb[142].mxu0 %v5720_v16  ;;  %4028 = vmatprep.mubr.f32.mxu1 %v6080_v58  ;;  %v1673_v16 = vld [vmem:[#allocation2 + $0x92] sm:$0xff] }
 0x356   : > { %4029 = vmatmul.mubr.f32.gmra.mrb[132].mxu1 %v6088_v1 }
 0x357   : > { %4031 = vmatprep.mubr.f32.mxu1 %v6100_v9 }
 0x35a   : > { %4032 = vmatmul.mubr.f32.gmra.mrb[134].mxu1 %v6108_v15 }
 0x35b   : > { %4034 = vmatprep.mubr.f32.mxu1 %v6120_v25 }
 0x35e   : > { %4035 = vmatmul.mubr.f32.gmra.mrb[136].mxu1 %v6128_v43 }
 0x35f   : > { %4037 = vmatprep.mubr.f32.mxu1 %v6142_v55 }
 0x362   : > { %4038 = vmatmul.mubr.f32.gmra.mrb[138].mxu1 %v6157_v10 }
 0x363   : > { %4040 = vmatprep.mubr.f32.mxu1 %v1667_v37 }
 0x366   : > { %4041 = vmatmul.mubr.f32.gmra.mrb[140].mxu1 %v1668_v27 }
 0x367   : > { %4043 = vmatprep.mubr.f32.mxu1 %v1673_v16 }
 0x36a   : > { %4044 = vmatmul.mubr.f32.gmra.mrb[142].mxu1 %v1674_v50 }
 0x3a9   : > { %v3600_v54 = vpop.f32.mrb[68].mxu1 }
 0x3aa   : > { %v3674_v35 = vpop.f32.mrb[80].mxu0  ;;  %v3601_v62 = vpop.f32.mrb[69].mxu1 }
 0x3ab   : > { %v3675_v58 = vpop.f32.mrb[81].mxu0  ;;  %v3602_v1 = vadd.f32 %v3601_v62, %v3600_v54 }
 0x3ac   : > { %v3676_v34 = vadd.f32 %v3675_v58, %v3674_v35 }
 0x3ad   : > { %v3603_v30 = vpop.f32.mrb[70].mxu1  ;;  %v1903_v11 = vadd.f32 %v3602_v1, %v6262_v29 }
 0x3ae   : > { %v6266_v6 = vadd.f32 %v3676_v34, %v1893_v56  ;;  %v3677_v9 = vpop.f32.mrb[82].mxu0  ;;  %v3604_v47 = vpop.f32.mrb[71].mxu1 }
 0x3af   : > { %v3678_v15 = vpop.f32.mrb[83].mxu0  ;;  %v3605_v19 = vadd.f32 %v3604_v47, %v3603_v30 }
 0x3b0   : > { %v3679_v20 = vadd.f32 %v3678_v15, %v3677_v9 }
 0x3b1   : > { %v3606_v28 = vpop.f32.mrb[72].mxu1  ;;  %v1908_v5 = vadd.f32 %v3605_v19, %v6262_v29 }
 0x3b2   : > { %v6270_v25 = vadd.f32 %v3679_v20, %v1898_v41  ;;  %v3680_v43 = vpop.f32.mrb[84].mxu0  ;;  %v3607_v17 = vpop.f32.mrb[73].mxu1 }
 0x3b3   : > { %v3681_v55 = vpop.f32.mrb[85].mxu0  ;;  %v3608_v10 = vadd.f32 %v3607_v17, %v3606_v28 }
 0x3b4   : > { %v3682_v39 = vadd.f32 %v3681_v55, %v3680_v43 }
 0x3b5   : > { %v3609_v44 = vpop.f32.mrb[74].mxu1  ;;  %v1913_v2 = vadd.f32 %v3608_v10, %v6262_v29 }
 0x3b6   : > { %v6273_v31 = vadd.f32 %v3682_v39, %v1903_v11  ;;  %v3683_v61 = vpop.f32.mrb[86].mxu0  ;;  %v3610_v23 = vpop.f32.mrb[75].mxu1 }
 0x3b7   : > { %v3684_v42 = vpop.f32.mrb[87].mxu0  ;;  %v3611_v26 = vadd.f32 %v3610_v23, %v3609_v44 }
 0x3b8   : > { %v3685_v53 = vadd.f32 %v3684_v42, %v3683_v61 }
 0x3b9   : > { %v3612_v51 = vpop.f32.mrb[76].mxu1  ;;  %v1918_v48 = vadd.f32 %v3611_v26, %v6262_v29 }
 0x3ba   : > { %v6276_v59 = vadd.f32 %v3685_v53, %v1908_v5  ;;  %v3686_v4 = vpop.f32.mrb[88].mxu0  ;;  %v3613_v49 = vpop.f32.mrb[77].mxu1 }
 0x3bb   : > { %v3687_v45 = vpop.f32.mrb[89].mxu0  ;;  %v3614_v18 = vadd.f32 %v3613_v49, %v3612_v51 }
 0x3bc   : > { %v3688_v40 = vadd.f32 %v3687_v45, %v3686_v4 }
 0x3bd   : > { %v3615_v0 = vpop.f32.mrb[78].mxu1  ;;  %v1923_v1 = vadd.f32 %v3614_v18, %v6262_v29 }
 0x3be   : > { %v6279_v37 = vadd.f32 %v3688_v40, %v1913_v2  ;;  %v3689_v27 = vpop.f32.mrb[90].mxu0  ;;  %v3616_v8 = vpop.f32.mrb[79].mxu1 }
 0x3bf   : > { %v3690_v60 = vpop.f32.mrb[91].mxu0  ;;  %v3617_v16 = vadd.f32 %v3616_v8, %v3615_v0 }
 0x3c0   : > { %v3691_v50 = vadd.f32 %v3690_v60, %v3689_v27 }
 0x3c1   : > { %v3618_v35 = vpop.f32.mrb[80].mxu1  ;;  %v1928_v20 = vadd.f32 %v3617_v16, %v6262_v29 }
 0x3c2   : > { %v6282_v54 = vadd.f32 %v3691_v50, %v1918_v48  ;;  %v3692_v62 = vpop.f32.mrb[92].mxu0  ;;  %v3619_v58 = vpop.f32.mrb[81].mxu1 }
 0x3c3   : > { %v3693_v56 = vpop.f32.mrb[93].mxu0  ;;  %v3620_v34 = vadd.f32 %v3619_v58, %v3618_v35 }
 0x3c4   : > { %v3694_v30 = vadd.f32 %v3693_v56, %v3692_v62 }
 0x3c5   : > { %v3621_v47 = vpop.f32.mrb[82].mxu1  ;;  %v1933_v44 = vadd.f32 %v3620_v34, %v6262_v29 }
 0x3c6   : > { %v6285_v9 = vadd.f32 %v3694_v30, %v1923_v1  ;;  %v3695_v15 = vpop.f32.mrb[94].mxu0  ;;  %v3622_v41 = vpop.f32.mrb[83].mxu1 }
 0x3c7   : > { %v3696_v19 = vpop.f32.mrb[95].mxu0  ;;  %v3623_v28 = vadd.f32 %v3622_v41, %v3621_v47 }
 0x3c8   : > { %v3697_v43 = vadd.f32 %v3696_v19, %v3695_v15 }
 0x3c9   : > { %v3624_v55 = vpop.f32.mrb[84].mxu1  ;;  %v1938_v4 = vadd.f32 %v3623_v28, %v6262_v29 }
 0x3ca   : > { %v6288_v17 = vadd.f32 %v3697_v43, %v1928_v20  ;;  %v3698_v11 = vpop.f32.mrb[96].mxu0  ;;  %v3625_v10 = vpop.f32.mrb[85].mxu1 }
 0x3cb   : > { %v3699_v39 = vpop.f32.mrb[97].mxu0  ;;  %v3626_v61 = vadd.f32 %v3625_v10, %v3624_v55 }
 0x3cc   : > { %v3700_v23 = vadd.f32 %v3699_v39, %v3698_v11 }
 0x3cd   : > { %v3627_v5 = vpop.f32.mrb[86].mxu1  ;;  %v1943_v8 = vadd.f32 %v3626_v61, %v6262_v29 }
 0x3ce   : > { %v6291_v42 = vadd.f32 %v3700_v23, %v1933_v44  ;;  %v3701_v26 = vpop.f32.mrb[98].mxu0  ;;  %v3628_v53 = vpop.f32.mrb[87].mxu1 }
 0x3cf   : > { %v3702_v51 = vpop.f32.mrb[99].mxu0  ;;  %v3629_v49 = vadd.f32 %v3628_v53, %v3627_v5 }
 0x3d0   : > { %v3703_v45 = vadd.f32 %v3702_v51, %v3701_v26 }
 0x3d1   : > { %v3630_v18 = vpop.f32.mrb[88].mxu1  ;;  %v1948_v56 = vadd.f32 %v3629_v49, %v6262_v29 }
 0x3d2   : > { %v6294_v2 = vadd.f32 %v3703_v45, %v1938_v4  ;;  %v3704_v40 = vpop.f32.mrb[100].mxu0  ;;  %v3631_v0 = vpop.f32.mrb[89].mxu1 }
 0x3d3   : > { %v3705_v27 = vpop.f32.mrb[101].mxu0  ;;  %v3632_v60 = vadd.f32 %v3631_v0, %v3630_v18 }
 0x3d4   : > { %v3706_v48 = vadd.f32 %v3705_v27, %v3704_v40 }
 0x3d5   : > { %v3633_v50 = vpop.f32.mrb[90].mxu1  ;;  %v1953_v20 = vadd.f32 %v3632_v60, %v6262_v29 }
 0x3d6   : > { %v6297_v16 = vadd.f32 %v3706_v48, %v1943_v8  ;;  %v3707_v35 = vpop.f32.mrb[102].mxu0  ;;  %v3634_v62 = vpop.f32.mrb[91].mxu1 }
 0x3d7   : > { %v3708_v58 = vpop.f32.mrb[103].mxu0  ;;  %v3635_v1 = vadd.f32 %v3634_v62, %v3633_v50 }
 0x3d8   : > { %v3709_v34 = vadd.f32 %v3708_v58, %v3707_v35 }
 0x3d9   : > { %v3636_v47 = vpop.f32.mrb[92].mxu1  ;;  %v1958_v61 = vadd.f32 %v3635_v1, %v6262_v29 }
 0x3da   : > { %v6300_v30 = vadd.f32 %v3709_v34, %v1948_v56  ;;  %v3710_v15 = vpop.f32.mrb[104].mxu0  ;;  %v3637_v41 = vpop.f32.mrb[93].mxu1 }
 0x3db   : > { %v3711_v19 = vpop.f32.mrb[105].mxu0  ;;  %v3638_v28 = vadd.f32 %v3637_v41, %v3636_v47 }
 0x3dc   : > { %v3712_v43 = vadd.f32 %v3711_v19, %v3710_v15 }
 0x3dd   : > { %v3639_v11 = vpop.f32.mrb[94].mxu1  ;;  %v1963_v45 = vadd.f32 %v3638_v28, %v6262_v29 }
 0x3de   : > { %v6303_v55 = vadd.f32 %v3712_v43, %v1953_v20  ;;  %v3713_v10 = vpop.f32.mrb[106].mxu0  ;;  %v3640_v39 = vpop.f32.mrb[95].mxu1 }
 0x3df   : > { %v3714_v44 = vpop.f32.mrb[107].mxu0  ;;  %v3641_v23 = vadd.f32 %v3640_v39, %v3639_v11 }
 0x3e0   : > { %v3715_v5 = vadd.f32 %v3714_v44, %v3713_v10 }
 0x3e1   : > { %v3754_v51 = vpop.f32.mrb[96].mxu1  ;;  %v1968_v35 = vadd.f32 %v3641_v23, %v6262_v29 }
 0x3e2   : > { %v6306_v26 = vadd.f32 %v3715_v5, %v1958_v61  ;;  %v3716_v53 = vpop.f32.mrb[108].mxu0  ;;  %v3755_v49 = vpop.f32.mrb[97].mxu1 }
 0x3e3   : > { %v3717_v4 = vpop.f32.mrb[109].mxu0  ;;  %v3756_v40 = vadd.f32 %v3755_v49, %v3754_v51 }
 0x3e4   : > { %v3718_v18 = vadd.f32 %v3717_v4, %v3716_v53 }
 0x3e5   : > { %v2183_v27 = vadd.f32 %v3756_v40, %v6266_v6  ;;  %v3757_v60 = vpop.f32.mrb[98].mxu1 }
 0x3e6   : > { %v6309_v0 = vadd.f32 %v3718_v18, %v1963_v45  ;;  %v3719_v8 = vpop.f32.mrb[110].mxu0  ;;  %v3758_v50 = vpop.f32.mrb[99].mxu1 }
 0x3e7   : > { %v3720_v48 = vpop.f32.mrb[111].mxu0  ;;  %v3759_v58 = vadd.f32 %v3758_v50, %v3757_v60 }
 0x3e8   : > { %v3721_v62 = vadd.f32 %v3720_v48, %v3719_v8 }
 0x3e9   : > { %v2188_v1 = vadd.f32 %v3759_v58, %v6270_v25  ;;  %v3760_v34 = vpop.f32.mrb[100].mxu1 }
 0x3ea   : > { %v6313_v56 = vadd.f32 %v3721_v62, %v1968_v35  ;;  %v3834_v47 = vpop.f32.mrb[112].mxu0  ;;  %v3761_v15 = vpop.f32.mrb[101].mxu1 }
 0x3eb   : > { %v3835_v41 = vpop.f32.mrb[113].mxu0  ;;  %v3762_v19 = vadd.f32 %v3761_v15, %v3760_v34 }
 0x3ec   : > { %v3836_v20 = vadd.f32 %v3835_v41, %v3834_v47 }
 0x3ed   : > { %v2193_v6 = vadd.f32 %v3762_v19, %v6273_v31  ;;  %v3763_v28 = vpop.f32.mrb[102].mxu1 }
 0x3ee   : > { %v3837_v43 = vpop.f32.mrb[114].mxu0  ;;  %v6317_v11 = vadd.f32 %v3836_v20, %v2183_v27  ;;  %v3764_v10 = vpop.f32.mrb[103].mxu1 }
 0x3ef   : > { %v3838_v29 = vpop.f32.mrb[115].mxu0  ;;  %v3765_v39 = vadd.f32 %v3764_v10, %v3763_v28 }
 0x3f0   : > { %v3839_v44 = vadd.f32 %v3838_v29, %v3837_v43 }
 0x3f1   : > { %v2198_v61 = vadd.f32 %v3765_v39, %v6276_v59  ;;  %v3766_v23 = vpop.f32.mrb[104].mxu1 }
 0x3f2   : > { %v3840_v25 = vpop.f32.mrb[116].mxu0  ;;  %v6320_v5 = vadd.f32 %v3839_v44, %v2188_v1  ;;  %v3767_v53 = vpop.f32.mrb[105].mxu1 }
 0x3f3   : > { %v3841_v51 = vpop.f32.mrb[117].mxu0  ;;  %v3768_v4 = vadd.f32 %v3767_v53, %v3766_v23 }
 0x3f4   : > { %v3842_v49 = vadd.f32 %v3841_v51, %v3840_v25 }
 0x3f5   : > { %v2203_v31 = vadd.f32 %v3768_v4, %v6279_v37  ;;  %v3769_v45 = vpop.f32.mrb[106].mxu1 }
 0x3f6   : > { %v3843_v18 = vpop.f32.mrb[118].mxu0  ;;  %v6323_v40 = vadd.f32 %v3842_v49, %v2193_v6  ;;  %v3770_v27 = vpop.f32.mrb[107].mxu1 }
 0x3f7   : > { %v3844_v8 = vpop.f32.mrb[119].mxu0  ;;  %v3771_v60 = vadd.f32 %v3770_v27, %v3769_v45 }
 0x3f8   : > { %v3845_v48 = vadd.f32 %v3844_v8, %v3843_v18 }
 0x3f9   : > { %v2208_v59 = vadd.f32 %v3771_v60, %v6282_v54  ;;  %v3772_v50 = vpop.f32.mrb[108].mxu1 }
 0x3fa   : > { %v3846_v35 = vpop.f32.mrb[120].mxu0  ;;  %v6326_v62 = vadd.f32 %v3845_v48, %v2198_v61  ;;  %v3773_v58 = vpop.f32.mrb[109].mxu1 }
 0x3fb   : > { %v3847_v1 = vpop.f32.mrb[121].mxu0  ;;  %v3774_v34 = vadd.f32 %v3773_v58, %v3772_v50 }
 0x3fc   : > { %v3848_v47 = vadd.f32 %v3847_v1, %v3846_v35 }
 0x3fd   : > { %v2213_v37 = vadd.f32 %v3774_v34, %v6285_v9  ;;  %v3775_v15 = vpop.f32.mrb[110].mxu1 }
 0x3fe   : > { %v3849_v41 = vpop.f32.mrb[122].mxu0  ;;  %v6329_v19 = vadd.f32 %v3848_v47, %v2203_v31  ;;  %v3776_v20 = vpop.f32.mrb[111].mxu1 }
 0x3ff   : > { %v3850_v6 = vpop.f32.mrb[123].mxu0  ;;  %v3777_v28 = vadd.f32 %v3776_v20, %v3775_v15 }
 0x400   : > { %v3851_v43 = vadd.f32 %v3850_v6, %v3849_v41 }
 0x401   : > { %v2218_v54 = vadd.f32 %v3777_v28, %v6288_v17  ;;  %v3778_v10 = vpop.f32.mrb[112].mxu1 }
 0x402   : > { %v3852_v29 = vpop.f32.mrb[124].mxu0  ;;  %v6332_v39 = vadd.f32 %v3851_v43, %v2208_v59  ;;  %v3779_v44 = vpop.f32.mrb[113].mxu1 }
 0x403   : > { %v3853_v61 = vpop.f32.mrb[125].mxu0  ;;  %v3780_v23 = vadd.f32 %v3779_v44, %v3778_v10 }
 0x404   : > { %v3854_v25 = vadd.f32 %v3853_v61, %v3852_v29 }
 0x405   : > { %v2223_v9 = vadd.f32 %v3780_v23, %v6291_v42  ;;  %v3781_v53 = vpop.f32.mrb[114].mxu1 }
 0x406   : > { %v3855_v51 = vpop.f32.mrb[126].mxu0  ;;  %v6335_v4 = vadd.f32 %v3854_v25, %v2213_v37  ;;  %v3782_v49 = vpop.f32.mrb[115].mxu1 }
 0x407   : > { %v3856_v31 = vpop.f32.mrb[127].mxu0  ;;  %v3783_v45 = vadd.f32 %v3782_v49, %v3781_v53 }
 0x408   : > { %v3857_v18 = vadd.f32 %v3856_v31, %v3855_v51 }
 0x409   : > { %v2228_v17 = vadd.f32 %v3783_v45, %v6294_v2  ;;  %v3784_v27 = vpop.f32.mrb[116].mxu1 }
 0x40a   : > { %v3858_v8 = vpop.f32.mrb[128].mxu0  ;;  %v6338_v60 = vadd.f32 %v3857_v18, %v2218_v54  ;;  %v3785_v48 = vpop.f32.mrb[117].mxu1 }
 0x40b   : > { %v3859_v59 = vpop.f32.mrb[129].mxu0  ;;  %v3786_v50 = vadd.f32 %v3785_v48, %v3784_v27 }
 0x40c   : > { %v3860_v35 = vadd.f32 %v3859_v59, %v3858_v8 }
 0x40d   : > { %v2233_v42 = vadd.f32 %v3786_v50, %v6297_v16  ;;  %v3787_v58 = vpop.f32.mrb[118].mxu1 }
 0x40e   : > { %v3861_v1 = vpop.f32.mrb[130].mxu0  ;;  %v6341_v34 = vadd.f32 %v3860_v35, %v2223_v9  ;;  %v3788_v47 = vpop.f32.mrb[119].mxu1 }
 0x40f   : > { %v3862_v37 = vpop.f32.mrb[131].mxu0  ;;  %v3789_v15 = vadd.f32 %v3788_v47, %v3787_v58 }
 0x410   : > { %v3863_v41 = vadd.f32 %v3862_v37, %v3861_v1 }
 0x411   : > { %v2238_v2 = vadd.f32 %v3789_v15, %v6300_v30  ;;  %v3790_v20 = vpop.f32.mrb[120].mxu1 }
 0x412   : > { %v3864_v6 = vpop.f32.mrb[132].mxu0  ;;  %v6344_v28 = vadd.f32 %v3863_v41, %v2228_v17  ;;  %v3791_v43 = vpop.f32.mrb[121].mxu1 }
 0x413   : > { %v3865_v54 = vpop.f32.mrb[133].mxu0  ;;  %v3792_v10 = vadd.f32 %v3791_v43, %v3790_v20 }
 0x414   : > { %v3866_v29 = vadd.f32 %v3865_v54, %v3864_v6 }
 0x415   : > { %v2243_v16 = vadd.f32 %v3792_v10, %v6303_v55  ;;  %v3793_v44 = vpop.f32.mrb[122].mxu1 }
 0x416   : > { %v3867_v61 = vpop.f32.mrb[134].mxu0  ;;  %v6347_v23 = vadd.f32 %v3866_v29, %v2233_v42  ;;  %v3794_v25 = vpop.f32.mrb[123].mxu1 }
 0x417   : > { %v3868_v9 = vpop.f32.mrb[135].mxu0  ;;  %v3795_v53 = vadd.f32 %v3794_v25, %v3793_v44 }
 0x418   : > { %v3869_v51 = vadd.f32 %v3868_v9, %v3867_v61 }
 0x419   : > { %v2248_v30 = vadd.f32 %v3795_v53, %v6306_v26  ;;  %v3796_v49 = vpop.f32.mrb[124].mxu1 }
 0x41a   : > { %v3870_v31 = vpop.f32.mrb[136].mxu0  ;;  %v2383_v45 = vadd.f32 %v3869_v51, %v2238_v2  ;;  %v3797_v18 = vpop.f32.mrb[125].mxu1 }
 0x41b   : > { %v3871_v17 = vpop.f32.mrb[137].mxu0  ;;  %v3798_v27 = vadd.f32 %v3797_v18, %v3796_v49  ;;  %v1259_v18 = vpop.xlane.xlu0 %1258 }
 0x41c   : > { %v3872_v8 = vadd.f32 %v3871_v17, %v3870_v31 }
 0x41d   : > { %v2253_v48 = vadd.f32 %v3798_v27, %v6309_v0  ;;  %v3799_v55 = vpop.f32.mrb[126].mxu1 }
 0x41e   : > { %v3873_v59 = vpop.f32.mrb[138].mxu0  ;;  %v6351_v50 = vadd.f32 %v3872_v8, %v2243_v16  ;;  %v3800_v35 = vpop.f32.mrb[127].mxu1 }
 0x41f   : > { %v3874_v42 = vpop.f32.mrb[139].mxu0  ;;  %v3801_v58 = vadd.f32 %v3800_v35, %v3799_v55 }
 0x420   : > { %v3875_v1 = vadd.f32 %v3874_v42, %v3873_v59 }
 0x421   : > { %v2258_v47 = vadd.f32 %v3801_v58, %v6313_v56  ;;  %v4024_v37 = vpop.f32.mrb[128].mxu1  ;;  %v1304_v58 = vmul.f32 0.03125, %v1259_v18 }
 0x422   : > { %v3876_v26 = vpop.f32.mrb[140].mxu0  ;;  %v2393_v15 = vadd.f32 %v3875_v1, %v2248_v30  ;;  %v6355_v41 = vadd.f32 %v4024_v37, %v6320_v5  ;;  %v2472_v20 = vpop.f32.mrb[129].mxu1 }
 0x423   : > { %v3877_v2 = vpop.f32.mrb[141].mxu0  ;;  %v6358_v0 = vadd.f32 %v2472_v20, %v6317_v11 }
 0x424   : > { %v3878_v6 = vadd.f32 %v3877_v2, %v3876_v26  ;;  %v2554_v43 = vsel %vm1253_vm1, %v6355_v41, 0.0 }
 0x425   : > { %v4027_v10 = vpop.f32.mrb[130].mxu1  ;;  %2555 = vadd.xlane.f32.xlu0 %v2554_v43  ;;  %v2551_v11 = vsel %vm1253_vm1, %v6358_v0, 0.0 }
 0x426   : > { %v3879_v54 = vpop.f32.mrb[142].mxu0  ;;  %v2398_v29 = vadd.f32 %v3878_v6, %v2253_v48  ;;  %v6363_v56 = vadd.f32 %v4027_v10, %v6326_v62  ;;  %v2482_v44 = vpop.f32.mrb[131].mxu1 }
 0x427   : > { %v3880_v16 = vpop.f32.mrb[143].mxu0  ;;  %v6366_v61 = vadd.f32 %v2482_v44, %v6323_v40 }
 0x428   : > { %v3881_v5 = vadd.f32 %v3880_v16, %v3879_v54  ;;  %v2560_v62 = vsel %vm1253_vm1, %v6363_v56, 0.0  ;;  %v1283_v16 = vpop.xlane.xlu1 %1282 }
 0x429   : > { %v4030_v25 = vpop.f32.mrb[132].mxu1  ;;  %2552 = vadd.xlane.f32.xlu0 %v2551_v11  ;;  %v1312_v18 = vmul.f32 0.03125, %v1283_v16 }
 0x42a   : > { %v2403_v9 = vadd.f32 %v3881_v5, %v2258_v47  ;;  %v6371_v53 = vadd.f32 %v4030_v25, %v6332_v39  ;;  %v2492_v51 = vpop.f32.mrb[133].mxu1  ;;  %v2557_v39 = vsel %vm1253_vm1, %v6366_v61, 0.0 }
 0x42b   : > { %v6374_v30 = vadd.f32 %v2492_v51, %v6329_v19 }
 0x42c   : > { %v2566_v55 = vsel %vm1253_vm1, %v6371_v53, 0.0 }
 0x42d   : > { %v4033_v49 = vpop.f32.mrb[134].mxu1  ;;  %2561 = vadd.xlane.f32.xlu0 %v2560_v62  ;;  %v2563_v1 = vsel %vm1253_vm1, %v6374_v30, 0.0 }
 0x42e   : > { %v6379_v40 = vadd.f32 %v4033_v49, %v6338_v60  ;;  %v2502_v31 = vpop.f32.mrb[135].mxu1 }
 0x42f   : > { %v6382_v17 = vadd.f32 %v2502_v31, %v6335_v4  ;;  %v1265_v4 = vpop.xlane.xlu0 %1264  ;;  %v1289_v31 = vpop.xlane.xlu1 %1288 }
 0x430   : > { %v2572_v25 = vsel %vm1253_vm1, %v6379_v40, 0.0 }
 0x431   : > { %v4036_v27 = vpop.f32.mrb[136].mxu1  ;;  %2558 = vadd.xlane.f32.xlu0 %v2557_v39  ;;  %v2569_v43 = vsel %vm1253_vm1, %v6382_v17, 0.0 }
 0x432   : > { %v6387_v19 = vadd.f32 %v4036_v27, %v6344_v28  ;;  %v2512_v8 = vpop.f32.mrb[137].mxu1 }
 0x433   : > { %v6390_v48 = vadd.f32 %v2512_v8, %v6341_v34  ;;  %v1271_v2 = vpop.xlane.xlu0 %1270 }
 0x434   : > { %v2578_v60 = vsel %vm1253_vm1, %v6387_v19, 0.0  ;;  %v1308_v5 = vmul.f32 0.03125, %v1271_v2 }
 0x435   : > { %v4039_v59 = vpop.f32.mrb[138].mxu1  ;;  %2579 = vadd.xlane.f32.xlu1 %v2578_v60  ;;  %2567 = vadd.xlane.f32.xlu0 %v2566_v55  ;;  %v2575_v34 = vsel %vm1253_vm1, %v6390_v48, 0.0  ;;  %v1314_v60 = vmul.f32 0.03125, %v1289_v31  ;;  %v1295_v55 = vpop.xlane.xlu1 %1294 }
 0x436   : > { %v6396_v35 = vadd.f32 %v4039_v59, %v2383_v45  ;;  %v2522_v42 = vpop.f32.mrb[139].mxu1  ;;  %v6408_v45 = vsub.f32 %v5405_v38, %v1304_v58 }
 0x437   : > { %v6399_v28 = vadd.f32 %v2522_v42, %v6347_v23  ;;  %v1306_v23 = vmul.f32 0.03125, %v1265_v4  ;;  %v1277_v51 = vpop.xlane.xlu0 %1276  ;;  %v6447_v4 = vsub.f32 %v5437_v7, %v1312_v18  ;;  %v6455_v58 = vsub.f32 %v5444_v36, %v1314_v60 }
 0x438   : > { %v2584_v6 = vsel %vm1253_vm1, %v6396_v35, 0.0  ;;  %v1310_v62 = vmul.f32 0.03125, %v1277_v51 }
 0x439   : > { %v4042_v47 = vpop.f32.mrb[140].mxu1  ;;  %2576 = vadd.xlane.f32.xlu1 %v2575_v34  ;;  %2564 = vadd.xlane.f32.xlu0 %v2563_v1  ;;  %v6424_v44 = vsub.f32 %v5413_v46, %v1306_v23  ;;  %v2581_v11 = vsel %vm1253_vm1, %v6399_v28, 0.0  ;;  %v1316_v34 = vmul.f32 0.03125, %v1295_v55  ;;  %v1346_v36 = vmul.f32 %v6455_v58, %v6455_v58 }
 0x43a   : > { %v6405_v26 = vadd.f32 %v4042_v47, %v2393_v15  ;;  %v2532_v37 = vpop.f32.mrb[141].mxu1  ;;  %v6439_v39 = vsub.f32 %v5429_v21, %v1310_v62  ;;  %v1344_v47 = vmul.f32 %v6447_v4, %v6447_v4 }
 0x43b   : > { %v6411_v20 = vadd.f32 %v2532_v37, %v6351_v50  ;;  %v1336_v50 = vmul.f32 %v6408_v45, %v6408_v45  ;;  %v1338_v49 = vmul.f32 %v6424_v44, %v6424_v44  ;;  %v1301_v37 = vpop.xlane.xlu1 %1300  ;;  %v6463_v2 = vsub.f32 %v5451_v24, %v1316_v34 }
 0x43c   : > { %v2590_v46 = vsel %vm1253_vm1, %v6405_v26, 0.0  ;;  %v1342_v42 = vmul.f32 %v6439_v39, %v6439_v39  ;;  %v1318_v23 = vmul.f32 0.03125, %v1301_v37 }
 0x43d   : > { %v4045_v54 = vpop.f32.mrb[142].mxu1  ;;  %2585 = vadd.xlane.f32.xlu1 %v2584_v6  ;;  %2570 = vadd.xlane.f32.xlu0 %v2569_v43  ;;  %v2587_v27 = vsel %vm1253_vm1, %v6411_v20, 0.0  ;;  %v1378_v6 = vsel %vm1253_vm1, %v1344_v47, 0.0 }
 0x43e   : > { %v6417_v15 = vadd.f32 %v4045_v54, %v2403_v9  ;;  %v2542_v10 = vpop.f32.mrb[143].mxu1  ;;  %v1354_v9 = vsel %vm1253_vm1, %v1336_v50, 0.0  ;;  %v1372_v7 = vsel %vm1253_vm1, %v1342_v42, 0.0  ;;  %v6469_v43 = vsub.f32 %v5457_v52, %v1318_v23 }
 0x43f   : > { %v6419_v38 = vadd.f32 %v2542_v10, %v2398_v29  ;;  %v6432_v29 = vsub.f32 %v5421_v14, %v1308_v5  ;;  %v1360_v14 = vsel %vm1253_vm1, %v1338_v49, 0.0  ;;  %v1384_v54 = vsel %vm1253_vm1, %v1346_v36, 0.0 }
 0x440   : > { %v2596_v1 = vsel %vm1253_vm1, %v6417_v15, 0.0  ;;  %v1348_v10 = vmul.f32 %v6463_v2, %v6463_v2  ;;  %v1350_v24 = vmul.f32 %v6469_v43, %v6469_v43 }
 0x441   : > { %2582 = vadd.xlane.f32.xlu1 %v2581_v11  ;;  %2573 = vadd.xlane.f32.xlu0 %v2572_v25  ;;  %v1340_v8 = vmul.f32 %v6432_v29, %v6432_v29  ;;  %v2593_v59 = vsel %vm1253_vm1, %v6419_v38, 0.0 }
 0x442   : > { %v1390_v16 = vsel %vm1253_vm1, %v1348_v10, 0.0  ;;  %v1396_v50 = vsel %vm1253_vm1, %v1350_v24, 0.0 }
 0x443   : > { %v1366_v21 = vsel %vm1253_vm1, %v1340_v8, 0.0 }
 0x445   : > { %2591 = vadd.xlane.f32.xlu1 %v2590_v46  ;;  %1355 = vadd.xlane.f32.xlu0 %v1354_v9 }
 0x449   : > { %2588 = vadd.xlane.f32.xlu1 %v2587_v27  ;;  %1361 = vadd.xlane.f32.xlu0 %v1360_v14 }
 0x44d   : > { %2594 = vadd.xlane.f32.xlu1 %v2593_v59  ;;  %1367 = vadd.xlane.f32.xlu0 %v1366_v21 }
 0x451   : > { %2597 = vadd.xlane.f32.xlu1 %v2596_v1  ;;  %1373 = vadd.xlane.f32.xlu0 %v1372_v7 }
 0x455   : > { %1379 = vadd.xlane.f32.xlu1 %v1378_v6 }
 0x459   : > { %1385 = vadd.xlane.f32.xlu1 %v1384_v54 }
 0x45d   : > { %1391 = vadd.xlane.f32.xlu1 %v1390_v16 }
 0x461   : > { %1397 = vadd.xlane.f32.xlu1 %v1396_v50 }
 0x4b2   : > { %v2556_v5 = vpop.xlane.xlu0 %2555 }
 0x4b3   : > { %v2600_v11 = vmul.f32 0.03125, %v2556_v5 }
 0x4b5   : > { %v6479_v52 = vsub.f32 %v6355_v41, %v2600_v11 }
 0x4b6   : > { %v2553_v25 = vpop.xlane.xlu0 %2552 }
 0x4b7   : > { %v2599_v51 = vmul.f32 0.03125, %v2553_v25  ;;  %v2632_v9 = vmul.f32 %v6479_v52, %v6479_v52 }
 0x4b9   : > { %v6484_v62 = vsub.f32 %v6358_v0, %v2599_v51  ;;  %v2650_v46 = vsel %vm1253_vm1, %v2632_v9, 0.0 }
 0x4ba   : > { %2651 = vadd.xlane.f32.xlu0 %v2650_v46  ;;  %v2562_v49 = vpop.xlane.xlu0 %2561 }
 0x4bb   : > { %v2602_v31 = vmul.f32 0.03125, %v2562_v49  ;;  %v2631_v18 = vmul.f32 %v6484_v62, %v6484_v62 }
 0x4bd   : > { %v6490_v27 = vsub.f32 %v6363_v56, %v2602_v31  ;;  %v2647_v41 = vsel %vm1253_vm1, %v2631_v18, 0.0 }
 0x4be   : > { %2648 = vadd.xlane.f32.xlu0 %v2647_v41  ;;  %v2559_v14 = vpop.xlane.xlu0 %2558 }
 0x4bf   : > { %v2601_v8 = vmul.f32 0.03125, %v2559_v14  ;;  %v2634_v0 = vmul.f32 %v6490_v27, %v6490_v27 }
 0x4c1   : > { %v6496_v60 = vsub.f32 %v6366_v61, %v2601_v8  ;;  %v2656_v55 = vsel %vm1253_vm1, %v2634_v0, 0.0 }
 0x4c2   : > { %v2580_v59 = vpop.xlane.xlu1 %2579  ;;  %2657 = vadd.xlane.f32.xlu0 %v2656_v55  ;;  %v2568_v21 = vpop.xlane.xlu0 %2567 }
 0x4c3   : > { %v2608_v42 = vmul.f32 0.03125, %v2580_v59  ;;  %v2604_v34 = vmul.f32 0.03125, %v2568_v21  ;;  %v2633_v56 = vmul.f32 %v6496_v60, %v6496_v60 }
 0x4c5   : > { %v6502_v1 = vsub.f32 %v6387_v19, %v2608_v42  ;;  %v6505_v7 = vsub.f32 %v6371_v53, %v2604_v34  ;;  %v2653_v47 = vsel %vm1253_vm1, %v2633_v56, 0.0 }
 0x4c6   : > { %v2577_v61 = vpop.xlane.xlu1 %2576  ;;  %2654 = vadd.xlane.f32.xlu0 %v2653_v47  ;;  %v2565_v37 = vpop.xlane.xlu0 %2564 }
 0x4c7   : > { %v2607_v23 = vmul.f32 0.03125, %v2577_v61  ;;  %v2603_v6 = vmul.f32 0.03125, %v2565_v37  ;;  %v2640_v36 = vmul.f32 %v6502_v1, %v6502_v1  ;;  %v2636_v54 = vmul.f32 %v6505_v7, %v6505_v7 }
 0x4c9   : > { %v6513_v10 = vsub.f32 %v6390_v48, %v2607_v23  ;;  %v6516_v19 = vsub.f32 %v6374_v30, %v2603_v6  ;;  %v2674_v53 = vsel %vm1253_vm1, %v2640_v36, 0.0  ;;  %v2662_v16 = vsel %vm1253_vm1, %v2636_v54, 0.0 }
 0x4ca   : > { %v2586_v24 = vpop.xlane.xlu1 %2585  ;;  %2675 = vadd.xlane.f32.xlu1 %v2674_v53  ;;  %2663 = vadd.xlane.f32.xlu0 %v2662_v16  ;;  %v2571_v50 = vpop.xlane.xlu0 %2570 }
 0x4cb   : > { %v2610_v5 = vmul.f32 0.03125, %v2586_v24  ;;  %v2605_v11 = vmul.f32 0.03125, %v2571_v50  ;;  %v2639_v25 = vmul.f32 %v6513_v10, %v6513_v10  ;;  %v2635_v48 = vmul.f32 %v6516_v19, %v6516_v19 }
 0x4cd   : > { %v6525_v51 = vsub.f32 %v6396_v35, %v2610_v5  ;;  %v6528_v30 = vsub.f32 %v6382_v17, %v2605_v11  ;;  %v2671_v9 = vsel %vm1253_vm1, %v2639_v25, 0.0  ;;  %v2659_v46 = vsel %vm1253_vm1, %v2635_v48, 0.0  ;;  %v2920_v48 = vld [vmem:[%s6872_s5 + $0x8] sm:$0xff] }
 0x4ce   : > { %v2583_v49 = vpop.xlane.xlu1 %2582  ;;  %2672 = vadd.xlane.f32.xlu1 %v2671_v9  ;;  %2660 = vadd.xlane.f32.xlu0 %v2659_v46  ;;  %v2574_v31 = vpop.xlane.xlu0 %2573 }
 0x4cf   : > { %v2609_v18 = vmul.f32 0.03125, %v2583_v49  ;;  %v2606_v41 = vmul.f32 0.03125, %v2574_v31  ;;  %v2642_v14 = vmul.f32 %v6525_v51, %v6525_v51  ;;  %v2637_v35 = vmul.f32 %v6528_v30, %v6528_v30  ;;  %v2922_v49 = vld [vmem:[%s6872_s5 + $0x18] sm:$0xff] }
 0x4d1   : > { %v6537_v8 = vsub.f32 %v6399_v28, %v2609_v18  ;;  %v6540_v17 = vsub.f32 %v6379_v40, %v2606_v41  ;;  %v2680_v0 = vsel %vm1253_vm1, %v2642_v14, 0.0  ;;  %v2665_v55 = vsel %vm1253_vm1, %v2637_v35, 0.0 }
 0x4d2   : > { %v2592_v59 = vpop.xlane.xlu1 %2591  ;;  %2681 = vadd.xlane.f32.xlu1 %v2680_v0  ;;  %2666 = vadd.xlane.f32.xlu0 %v2665_v55  ;;  %v1356_v18 = vpop.xlane.xlu0 %1355 }
 0x4d3   : > { %v2612_v21 = vmul.f32 0.03125, %v2592_v59  ;;  %v2641_v42 = vmul.f32 %v6537_v8, %v6537_v8  ;;  %v2638_v34 = vmul.f32 %v6540_v17, %v6540_v17  ;;  %v1400_v14 = vmul.f32 0.03125, %v1356_v18 }
 0x4d5   : > { %v6549_v28 = vsub.f32 %v6405_v26, %v2612_v21  ;;  %v2677_v40 = vsel %vm1253_vm1, %v2641_v42, 0.0  ;;  %v2668_v56 = vsel %vm1253_vm1, %v2638_v34, 0.0  ;;  %v1416_v35 = vadd.f32 1e-05, %v1400_v14 }
 0x4d6   : > { %v2589_v47 = vpop.xlane.xlu1 %2588  ;;  %2678 = vadd.xlane.f32.xlu1 %v2677_v40  ;;  %2669 = vadd.xlane.f32.xlu0 %v2668_v56  ;;  %v1362_v41 = vpop.xlane.xlu0 %1361 }
 0x4d7   : > { %v2611_v61 = vmul.f32 0.03125, %v2589_v47  ;;  %v2644_v37 = vmul.f32 %v6549_v28, %v6549_v28  ;;  %v1402_v0 = vmul.f32 0.03125, %v1362_v41  ;;  %4451 = vrsqrt.f32 %v1416_v35 }
 0x4d9   : > { %v6556_v23 = vsub.f32 %v6411_v20, %v2611_v61  ;;  %v2686_v6 = vsel %vm1253_vm1, %v2644_v37, 0.0  ;;  %v1418_v59 = vadd.f32 1e-05, %v1402_v0 }
 0x4da   : > { %2687 = vadd.xlane.f32.xlu1 %v2686_v6  ;;  %v2595_v36 = vpop.xlane.xlu1 %2594  ;;  %v1368_v55 = vpop.xlane.xlu0 %1367 }
 0x4db   : > { %v2613_v26 = vmul.f32 0.03125, %v2595_v36  ;;  %v2643_v54 = vmul.f32 %v6556_v23, %v6556_v23  ;;  %v1404_v21 = vmul.f32 0.03125, %v1368_v55  ;;  %4453 = vrsqrt.f32 %v1418_v59 }
 0x4dd   : > { %v6562_v53 = vsub.f32 %v6419_v38, %v2613_v26  ;;  %v2683_v16 = vsel %vm1253_vm1, %v2643_v54, 0.0  ;;  %v2919_v38 = vld [vmem:[%s6872_s5] sm:$0xff]  ;;  %v1420_v34 = vadd.f32 1e-05, %v1404_v21 }
 0x4de   : > { %2684 = vadd.xlane.f32.xlu1 %v2683_v16  ;;  %v2598_v24 = vpop.xlane.xlu1 %2597  ;;  %v4398_v9 = vpack.c.bf16 %v2920_v48, %v2919_v38  ;;  %v1374_v42 = vpop.xlane.xlu0 %1373 }
 0x4df   : > { %v2614_v50 = vmul.f32 0.03125, %v2598_v24  ;;  %v2645_v20 = vmul.f32 %v6562_v53, %v6562_v53  ;;  %v1406_v40 = vmul.f32 0.03125, %v1374_v42  ;;  %4455 = vrsqrt.f32 %v1420_v34 }
 0x4e0   : > { %4399 = vmatprep.subr.bf16.mxu0 %v4398_v9  ;;  %4406 = vmatprep.subr.bf16.mxu1 %v4398_v9 }
 0x4e1   : > { %v6568_v5 = vsub.f32 %v6417_v15, %v2614_v50  ;;  %v2689_v11 = vsel %vm1253_vm1, %v2645_v20, 0.0  ;;  %4401 = vmatpush3.bf16.msra.mxu0 %v4398_v9  ;;  %4408 = vmatpush3.bf16.msra.mxu1 %v4398_v9  ;;  %v2921_v15 = vld [vmem:[%s6872_s5 + $0x10] sm:$0xff]  ;;  %v4452_v47 = vpop.eup %4451  ;;  %v1422_v61 = vadd.f32 1e-05, %v1406_v40 }
 0x4e2   : > { %2690 = vadd.xlane.f32.xlu1 %v2689_v11  ;;  %v4402_v31 = vpack.c.bf16 %v2922_v49, %v2921_v15  ;;  %v1380_v56 = vpop.xlane.xlu1 %1379  ;;  %v6587_v6 = vmul.f32 %v4452_v47, %v6408_v45 }
 0x4e3   : > { %v2646_v25 = vmul.f32 %v6568_v5, %v6568_v5  ;;  %v1408_v37 = vmul.f32 0.03125, %v1380_v56  ;;  %4457 = vrsqrt.f32 %v1422_v61 }
 0x4e4   : > { %4403 = vmatprep.subr.bf16.mxu0 %v4402_v31  ;;  %4407 = vmatprep.subr.bf16.mxu1 %v4402_v31  ;;  %v1480_v24 = vmul.f32 0.044715, %v6587_v6 }
 0x4e5   : > { %v2692_v46 = vsel %vm1253_vm1, %v2646_v25, 0.0  ;;  %4405 = vmatpush3.bf16.msra.mxu0 %v4402_v31  ;;  %4409 = vmatpush3.bf16.msra.mxu1 %v4402_v31  ;;  %v4454_v26 = vpop.eup %4453  ;;  %v1424_v54 = vadd.f32 1e-05, %v1408_v37 }
 0x4e6   : > { %2693 = vadd.xlane.f32.xlu1 %v2692_v46  ;;  %v1386_v36 = vpop.xlane.xlu1 %1385  ;;  %v6591_v50 = vmul.f32 %v4454_v26, %v6424_v44  ;;  %v1496_v38 = vmul.f32 %v1480_v24, %v6587_v6 }
 0x4e7   : > { %v1410_v16 = vmul.f32 0.03125, %v1386_v36  ;;  %4459 = vrsqrt.f32 %v1424_v54 }
 0x4e8   : > { %v1482_v48 = vmul.f32 0.044715, %v6591_v50  ;;  %v1512_v15 = vmul.f32 %v1496_v38, %v6587_v6 }
 0x4e9   : > { %v4456_v20 = vpop.eup %4455  ;;  %v1426_v11 = vadd.f32 1e-05, %v1410_v16 }
 0x4ea   : > { %v1392_v25 = vpop.xlane.xlu1 %1391  ;;  %v6596_v45 = vmul.f32 %v4456_v20, %v6432_v29  ;;  %v1498_v49 = vmul.f32 %v1482_v48, %v6591_v50  ;;  %v1528_v14 = vadd.f32 %v1512_v15, %v6587_v6 }
 0x4eb   : > { %v1412_v9 = vmul.f32 0.03125, %v1392_v25  ;;  %4461 = vrsqrt.f32 %v1426_v11 }
 0x4ec   : > { %v1484_v18 = vmul.f32 0.044715, %v6596_v45  ;;  %v1514_v35 = vmul.f32 %v1498_v49, %v6591_v50  ;;  %v1544_v42 = vmul.f32 0.7978846, %v1528_v14 }
 0x4ed   : > { %v4458_v46 = vpop.eup %4457  ;;  %v1428_v31 = vadd.f32 1e-05, %v1412_v9 }
 0x4ee   : > { %v6601_v44 = vmul.f32 %v4458_v46, %v6439_v39  ;;  %v1398_v0 = vpop.xlane.xlu1 %1397  ;;  %v1500_v59 = vmul.f32 %v1484_v18, %v6596_v45  ;;  %v1530_v34 = vadd.f32 %v1514_v35, %v6591_v50 }
 0x4ef   : > { %4463 = vrsqrt.f32 %v1428_v31  ;;  %v1414_v56 = vmul.f32 0.03125, %v1398_v0 }
 0x4f0   : > { %v1486_v21 = vmul.f32 0.044715, %v6601_v44  ;;  %v1546_v16 = vmul.f32 0.7978846, %v1530_v34 }
 0x4f1   : > { %v4460_v41 = vpop.eup %4459  ;;  %v1430_v24 = vadd.f32 1e-05, %v1414_v56 }
 0x4f2   : > { %v6607_v29 = vmul.f32 %v4460_v41, %v6447_v4  ;;  %v1516_v4 = vmul.f32 %v1500_v59, %v6596_v45  ;;  %v1502_v36 = vmul.f32 %v1486_v21, %v6601_v44  ;;  %v1464_v21 = vmul.f32 0.5, %v6587_v6 }
 0x4f3   : > { %v6639_v6 = vmul.f32 0.5, %v6596_v45 }
 0x4f4   : > { %v1488_v61 = vmul.f32 0.044715, %v6607_v29  ;;  %v1532_v38 = vadd.f32 %v1516_v4, %v6596_v45  ;;  %v1518_v48 = vmul.f32 %v1502_v36, %v6601_v44  ;;  %v6636_v36 = vmul.f32 0.5, %v6591_v50 }
 0x4f5   : > { %v4462_v40 = vpop.eup %4461 }
 0x4f6   : > { %v6616_v54 = vmul.f32 %v4462_v40, %v6455_v58  ;;  %v1504_v11 = vmul.f32 %v1488_v61, %v6607_v29  ;;  %v1548_v18 = vmul.f32 0.7978846, %v1532_v38  ;;  %v1534_v41 = vadd.f32 %v1518_v48, %v6601_v44 }
 0x4f8   : > { %v1490_v15 = vmul.f32 0.044715, %v6616_v54  ;;  %v1520_v49 = vmul.f32 %v1504_v11, %v6607_v29  ;;  %v6643_v11 = vmul.f32 0.5, %v6607_v29 }
 0x4f9   : > { %v4464_v46 = vpop.eup %4463 }
 0x4fa   : > { %v6625_v14 = vmul.f32 %v4464_v46, %v6463_v2  ;;  %v1506_v0 = vmul.f32 %v1490_v15, %v6616_v54 }
 0x547   : > { %v2652_v55 = vpop.xlane.xlu0 %2651 }
 0x548   : > { %v2696_v39 = vmul.f32 0.03125, %v2652_v55 }
 0x54a   : > { %v2712_v47 = vadd.f32 1e-05, %v2696_v39 }
 0x54b   : > { %v2649_v37 = vpop.xlane.xlu0 %2648 }
 0x54c   : > { %4465 = vrsqrt.f32 %v2712_v47  ;;  %v2695_v26 = vmul.f32 0.03125, %v2649_v37  ;;  %v1550_v47 = vmul.f32 0.7978846, %v1534_v41  ;;  %v1492_v37 = vmul.f32 0.044715, %v6625_v14 }
 0x54d   : > { %4467 = vtanh.f32 %v1544_v42  ;;  %v1536_v42 = vadd.f32 %v1520_v49, %v6607_v29 }
 0x54e   : > { %v2711_v20 = vadd.f32 1e-05, %v2695_v26  ;;  %v1508_v49 = vmul.f32 %v1492_v37, %v6625_v14 }
 0x54f   : > { %v2658_v25 = vpop.xlane.xlu0 %2657  ;;  %v1552_v46 = vmul.f32 0.7978846, %v1536_v42 }
 0x550   : > { %4469 = vrsqrt.f32 %v2711_v20  ;;  %v2698_v9 = vmul.f32 0.03125, %v2658_v25  ;;  %v1524_v37 = vmul.f32 %v1508_v49, %v6625_v14 }
 0x551   : > { %4471 = vtanh.f32 %v1546_v16 }
 0x552   : > { %4473 = vrsqrt.f32 %v1430_v24  ;;  %v2714_v58 = vadd.f32 1e-05, %v2698_v9  ;;  %v1540_v49 = vadd.f32 %v1524_v37, %v6625_v14 }
 0x553   : > { %v2655_v31 = vpop.xlane.xlu0 %2654 }
 0x554   : > { %4475 = vrsqrt.f32 %v2714_v58  ;;  %v2697_v35 = vmul.f32 0.03125, %v2655_v31 }
 0x555   : > { %4477 = vtanh.f32 %v1548_v18 }
 0x556   : > { %v4466_v55 = vpop.eup %4465  ;;  %v2713_v59 = vadd.f32 1e-05, %v2697_v35 }
 0x557   : > { %v4468_v39 = vpop.eup %4467  ;;  %v6631_v34 = vmul.f32 %v4466_v55, %v6479_v52  ;;  %v2676_v40 = vpop.xlane.xlu1 %2675  ;;  %v1522_v52 = vmul.f32 %v1506_v0, %v6616_v54 }
 0x558   : > { %v2664_v56 = vpop.xlane.xlu0 %2663  ;;  %4479 = vrsqrt.f32 %v2713_v59  ;;  %v2704_v2 = vmul.f32 0.03125, %v2676_v40  ;;  %v1576_v20 = vadd.f32 1.0, %v4468_v39 }
 0x559   : > { %v2700_v61 = vmul.f32 0.03125, %v2664_v56  ;;  %v2776_v4 = vmul.f32 0.044715, %v6631_v34  ;;  %4481 = vtanh.f32 %v1550_v47  ;;  %v1538_v18 = vadd.f32 %v1522_v52, %v6616_v54 }
 0x55a   : > { %v4470_v26 = vpop.eup %4469  ;;  %v2720_v16 = vadd.f32 1e-05, %v2704_v2  ;;  %v6653_v0 = vmul.f32 %v1576_v20, %v1464_v21 }
 0x55b   : > { %v2716_v24 = vadd.f32 1e-05, %v2700_v61  ;;  %v4472_v25 = vpop.eup %4471  ;;  %v2792_v38 = vmul.f32 %v2776_v4, %v6631_v34  ;;  %v6647_v48 = vmul.f32 %v4470_v26, %v6484_v62  ;;  %v2673_v50 = vpop.xlane.xlu1 %2672  ;;  %v1554_v52 = vmul.f32 0.7978846, %v1538_v18 }
 0x55c   : > { %v2661_v9 = vpop.xlane.xlu0 %2660  ;;  %v4474_v45 = vpop.eup %4473  ;;  %4483 = vrsqrt.f32 %v2720_v16  ;;  %v2703_v15 = vmul.f32 0.03125, %v2673_v50  ;;  %v1578_v55 = vadd.f32 1.0, %v4472_v25 }
 0x55d   : > { %v2699_v58 = vmul.f32 0.03125, %v2661_v9  ;;  %v2808_v31 = vmul.f32 %v2792_v38, %v6631_v34  ;;  %4485 = vrsqrt.f32 %v2716_v24  ;;  %v2775_v29 = vmul.f32 0.044715, %v6647_v48 }
 0x55e   : > { %v4476_v41 = vpop.eup %4475  ;;  %v2719_v62 = vadd.f32 1e-05, %v2703_v15  ;;  %v6656_v59 = vmul.f32 %v4474_v45, %v6469_v43 }
 0x55f   : > { %v2715_v35 = vadd.f32 1e-05, %v2699_v58  ;;  %v2824_v39 = vadd.f32 %v2808_v31, %v6631_v34  ;;  %v6660_v42 = vmul.f32 %v4476_v41, %v6490_v27  ;;  %v2682_v40 = vpop.xlane.xlu1 %2681  ;;  %v2791_v47 = vmul.f32 %v2775_v29, %v6647_v48  ;;  %v4478_v21 = vpop.eup %4477 }
 0x560   : > { %v2667_v56 = vpop.xlane.xlu0 %2666  ;;  %4487 = vrsqrt.f32 %v2719_v62  ;;  %v2706_v2 = vmul.f32 0.03125, %v2682_v40  ;;  %v1494_v9 = vmul.f32 0.044715, %v6656_v59  ;;  %v1580_v29 = vadd.f32 1.0, %v4478_v21 }
 0x561   : > { %v2701_v61 = vmul.f32 0.03125, %v2667_v56  ;;  %4489 = vrsqrt.f32 %v2715_v35  ;;  %v2807_v4 = vmul.f32 %v2791_v47, %v6647_v48  ;;  %v2840_v43 = vmul.f32 0.7978846, %v2824_v39 }
 0x562   : > { %v4480_v26 = vpop.eup %4479  ;;  %v2722_v16 = vadd.f32 1e-05, %v2706_v2  ;;  %v2778_v27 = vmul.f32 0.044715, %v6660_v42  ;;  %4491 = vtanh.f32 %v1552_v46  ;;  %v1510_v2 = vmul.f32 %v1494_v9, %v6656_v59 }
 0x563   : > { %v2717_v24 = vadd.f32 1e-05, %v2701_v61  ;;  %v6667_v20 = vmul.f32 %v4480_v26, %v6496_v60  ;;  %v2679_v25 = vpop.xlane.xlu1 %2678  ;;  %v2823_v50 = vadd.f32 %v2807_v4, %v6647_v48  ;;  %4493 = vtanh.f32 %v2840_v43  ;;  %v6673_v31 = vpop.eup %4481 }
 0x564   : > { %v2670_v38 = vpop.xlane.xlu0 %2669  ;;  %v2705_v45 = vmul.f32 0.03125, %v2679_v25  ;;  %v2794_v58 = vmul.f32 %v2778_v27, %v6660_v42  ;;  %v1556_v21 = vmul.f32 0.7978846, %v1540_v49 }
 0x565   : > { %v2702_v15 = vmul.f32 0.03125, %v2670_v38  ;;  %4495 = vrsqrt.f32 %v2717_v24  ;;  %v2839_v46 = vmul.f32 0.7978846, %v2823_v50  ;;  %v2777_v60 = vmul.f32 0.044715, %v6667_v20 }
 0x566   : > { %v4484_v18 = vpop.eup %4483  ;;  %4497 = vrsqrt.f32 %v2722_v16  ;;  %v2721_v41 = vadd.f32 1e-05, %v2705_v45  ;;  %v2810_v35 = vmul.f32 %v2794_v58, %v6660_v42  ;;  %v6689_v24 = vmul.f32 %v1578_v55, %v6636_v36 }
 0x567   : > { %v2718_v62 = vadd.f32 1e-05, %v2702_v15  ;;  %v4486_v39 = vpop.eup %4485  ;;  %v6678_v40 = vmul.f32 %v4484_v18, %v6502_v1  ;;  %v2688_v56 = vpop.xlane.xlu1 %2687  ;;  %4499 = vtanh.f32 %v2839_v46  ;;  %v2793_v47 = vmul.f32 %v2777_v60, %v6667_v20 }
 0x568   : > { %4501 = vrsqrt.f32 %v2721_v41  ;;  %v2708_v61 = vmul.f32 0.03125, %v2688_v56  ;;  %v2826_v37 = vadd.f32 %v2810_v35, %v6660_v42  ;;  %v6685_v43 = vmul.f32 %v4486_v39, %v6505_v7 }
 0x569   : > { %v2784_v4 = vmul.f32 0.044715, %v6678_v40  ;;  %4503 = vrsqrt.f32 %v2718_v62  ;;  %v2809_v1 = vmul.f32 %v2793_v47, %v6667_v20  ;;  %v6697_v45 = vmul.f32 %v1580_v29, %v6639_v6 }
 0x56a   : > { %v4488_v26 = vpop.eup %4487  ;;  %v2724_v16 = vadd.f32 1e-05, %v2708_v61  ;;  %v2842_v27 = vmul.f32 0.7978846, %v2826_v37  ;;  %4505 = vtanh.f32 %v1554_v52  ;;  %v6705_v55 = vmul.f32 %v1510_v2, %v6656_v59 }
 0x56b   : > { %v4490_v25 = vpop.eup %4489  ;;  %v2800_v38 = vmul.f32 %v2784_v4, %v6678_v40  ;;  %v6693_v50 = vmul.f32 %v4488_v26, %v6513_v10  ;;  %v2685_v9 = vpop.xlane.xlu1 %2684  ;;  %v2825_v7 = vadd.f32 %v2809_v1, %v6667_v20  ;;  %4507 = vtanh.f32 %v1556_v21 }
 0x56c   : > { %v6699_v15 = vpop.eup %4491  ;;  %v6702_v58 = vmul.f32 %v4490_v25, %v6516_v19  ;;  %v2707_v36 = vmul.f32 0.03125, %v2685_v9  ;;  %4509 = vtanh.f32 %v2842_v27  ;;  %v2780_v46 = vmul.f32 0.044715, %v6685_v43 }
 0x56d   : > { %v4494_v52 = vpop.eup %4493  ;;  %v2816_v10 = vmul.f32 %v2800_v38, %v6678_v40  ;;  %v2841_v49 = vmul.f32 0.7978846, %v2825_v7  ;;  %4511 = vrsqrt.f32 %v2724_v16  ;;  %v2760_v62 = vmul.f32 0.5, %v6631_v34 }
 0x56e   : > { %v2723_v6 = vadd.f32 1e-05, %v2707_v36  ;;  %v2872_v60 = vadd.f32 1.0, %v4494_v52  ;;  %v2779_v29 = vmul.f32 0.044715, %v6702_v58  ;;  %v2759_v47 = vmul.f32 0.5, %v6647_v48 }
 0x56f   : > { %v4496_v18 = vpop.eup %4495  ;;  %v2832_v19 = vadd.f32 %v2816_v10, %v6678_v40  ;;  %v2691_v41 = vpop.xlane.xlu1 %2690  ;;  %4513 = vtanh.f32 %v2841_v49  ;;  %v2783_v35 = vmul.f32 0.044715, %v6693_v50  ;;  %v2762_v2 = vmul.f32 0.5, %v6660_v42 }
 0x570   : > { %v4498_v39 = vpop.eup %4497  ;;  %4515 = vrsqrt.f32 %v2723_v6  ;;  %v2709_v56 = vmul.f32 0.03125, %v2691_v41  ;;  %v2795_v37 = vmul.f32 %v2779_v29, %v6702_v58  ;;  %v2796_v4 = vmul.f32 %v2780_v46, %v6685_v43 }
 0x571   : > { %v4500_v61 = vpop.eup %4499  ;;  %v2799_v21 = vmul.f32 %v2783_v35, %v6693_v50  ;;  %v2848_v1 = vmul.f32 0.7978846, %v2832_v19  ;;  %v6719_v34 = vmul.f32 %v4496_v18, %v6528_v30  ;;  %v2888_v25 = vmul.f32 %v2872_v60, %v2760_v62 }
 0x572   : > { %v4502_v26 = vpop.eup %4501  ;;  %v2725_v16 = vadd.f32 1e-05, %v2709_v56  ;;  %v2871_v27 = vadd.f32 1.0, %v4500_v61  ;;  %v2811_v9 = vmul.f32 %v2795_v37, %v6702_v58  ;;  %v2812_v36 = vmul.f32 %v2796_v4, %v6685_v43 }
 0x573   : > { %v4504_v38 = vpop.eup %4503  ;;  %v6722_v48 = vmul.f32 %v4502_v26, %v6537_v8  ;;  %v2694_v42 = vpop.xlane.xlu1 %2693  ;;  %v2815_v7 = vmul.f32 %v2799_v21, %v6693_v50  ;;  %v6738_v29 = vmul.f32 %v4498_v39, %v6525_v51  ;;  %v2904_v62 = vadd.f32 %v2888_v25, %v6653_v0 }
 0x574   : > { %v6727_v52 = vpop.eup %4505  ;;  %v6730_v10 = vmul.f32 %v4504_v38, %v6540_v17  ;;  %4517 = vrsqrt.f32 %v2725_v16  ;;  %v2710_v30 = vmul.f32 0.03125, %v2694_v42  ;;  %v2887_v49 = vmul.f32 %v2871_v27, %v2759_v47 }
 0x575   : > { %v2827_v46 = vadd.f32 %v2811_v9, %v6702_v58  ;;  %v2831_v8 = vadd.f32 %v2815_v7, %v6693_v50  ;;  %v2828_v6 = vadd.f32 %v2812_v36, %v6685_v43  ;;  %4519 = vtanh.f32 %v2848_v1  ;;  %v6735_v60 = vpop.eup %4507 }
 0x576   : > { %v2726_v18 = vadd.f32 1e-05, %v2710_v30  ;;  %v2903_v19 = vadd.f32 %v2887_v49, %v5865_v63  ;;  %v2781_v17 = vmul.f32 0.044715, %v6719_v34  ;;  %v4510_v41 = vpop.eup %4509  ;;  %v2782_v51 = vmul.f32 0.044715, %v6730_v10 }
 0x577   : > { %v2843_v35 = vmul.f32 0.7978846, %v2827_v46  ;;  %v2847_v56 = vmul.f32 0.7978846, %v2831_v8  ;;  %v2844_v47 = vmul.f32 0.7978846, %v2828_v6  ;;  %v4512_v61 = vpop.eup %4511  ;;  %v6751_v4 = vadd.f32 %v6705_v55, %v6656_v59 }
 0x578   : > { %4521 = vrsqrt.f32 %v2726_v18  ;;  %4054 = vmatprep.mubr.msk.f32.mxu0 %vm1253_vm1, %v2903_v19  ;;  %v2874_v37 = vadd.f32 1.0, %v4510_v41  ;;  %v2797_v21 = vmul.f32 %v2781_v17, %v6719_v34  ;;  %v2761_v63 = vmul.f32 0.5, %v6667_v20 }
 0x579   : > { %v4514_v39 = vpop.eup %4513  ;;  %4055 = vmatmul.mubr.msk.f32.vlgmr.msra.gmra.mrb[144].mxu0 %vm1253_vm1, %v2904_v62  ;;  %4523 = vtanh.f32 %v2843_v35  ;;  %v2785_v0 = vmul.f32 0.044715, %v6722_v48  ;;  %v2798_v38 = vmul.f32 %v2782_v51, %v6730_v10  ;;  %v6760_v42 = vmul.f32 %v4512_v61, %v6549_v28 }
 0x57a   : > { %v4516_v1 = vpop.eup %4515  ;;  %v2873_v26 = vadd.f32 1.0, %v4514_v39  ;;  %v2890_v16 = vmul.f32 %v2874_v37, %v2762_v2  ;;  %4525 = vtanh.f32 %v2847_v56  ;;  %v2813_v27 = vmul.f32 %v2797_v21, %v6719_v34 }
 0x57b   : > { %v6755_v25 = vmul.f32 %v4516_v1, %v6556_v23  ;;  %4527 = vtanh.f32 %v2844_v47  ;;  %v2801_v20 = vmul.f32 %v2785_v0, %v6722_v48  ;;  %v2786_v7 = vmul.f32 0.044715, %v6738_v29 }
 0x57c   : > { %v2889_v9 = vmul.f32 %v2873_v26, %v2761_v63  ;;  %v2829_v55 = vadd.f32 %v2813_v27, %v6719_v34  ;;  %v1584_v2 = vadd.f32 1.0, %v6699_v15  ;;  %v2814_v36 = vmul.f32 %v2798_v38, %v6730_v10 }
 0x57d   : > { %v2817_v23 = vmul.f32 %v2801_v20, %v6722_v48  ;;  %v2787_v30 = vmul.f32 0.044715, %v6755_v25  ;;  %v2906_v8 = vadd.f32 %v2890_v16, %v6689_v24  ;;  %v2802_v6 = vmul.f32 %v2786_v7, %v6738_v29 }
 0x57e   : > { %v4518_v49 = vpop.eup %4517  ;;  %v2905_v46 = vadd.f32 %v2889_v9, %v5876_v57  ;;  %v2845_v28 = vmul.f32 0.7978846, %v2829_v55  ;;  %v2830_v15 = vadd.f32 %v2814_v36, %v6730_v10  ;;  %v2768_v62 = vmul.f32 0.5, %v6678_v40 }
 0x57f   : > { %v4520_v18 = vpop.eup %4519  ;;  %v6772_v19 = vmul.f32 %v4518_v49, %v6562_v53  ;;  %v2833_v17 = vadd.f32 %v2817_v23, %v6722_v48  ;;  %v2803_v41 = vmul.f32 %v2787_v30, %v6755_v25  ;;  %v2818_v57 = vmul.f32 %v2802_v6, %v6738_v29 }
 0x580   : > { %4057 = vmatprep.mubr.msk.f32.mxu0 %vm1253_vm1, %v2905_v46  ;;  %4529 = vtanh.f32 %v2845_v28  ;;  %v2788_v24 = vmul.f32 0.044715, %v6760_v42  ;;  %v2764_v53 = vmul.f32 0.5, %v6685_v43  ;;  %v2846_v35 = vmul.f32 0.7978846, %v2830_v15 }
 0x581   : > { %4058 = vmatmul.mubr.msk.f32.gmra.mrb[146].mxu0 %vm1253_vm1, %v2906_v8  ;;  %v2849_v56 = vmul.f32 0.7978846, %v2833_v17  ;;  %v2819_v47 = vmul.f32 %v2803_v41, %v6755_v25  ;;  %v2880_v37 = vadd.f32 1.0, %v4520_v18  ;;  %v2834_v21 = vadd.f32 %v2818_v57, %v6738_v29 }
 0x582   : > { %v4522_v61 = vpop.eup %4521  ;;  %v2804_v51 = vmul.f32 %v2788_v24, %v6760_v42  ;;  %v2789_v40 = vmul.f32 0.044715, %v6772_v19  ;;  %v2763_v63 = vmul.f32 0.5, %v6702_v58  ;;  %v2767_v0 = vmul.f32 0.5, %v6693_v50 }
 0x583   : > { %v4524_v39 = vpop.eup %4523  ;;  %4531 = vtanh.f32 %v2846_v35  ;;  %v2835_v43 = vadd.f32 %v2819_v47, %v6755_v25  ;;  %v6791_v26 = vmul.f32 %v4522_v61, %v6568_v5  ;;  %v2850_v27 = vmul.f32 0.7978846, %v2834_v21 }
 0x584   : > { %v4526_v1 = vpop.eup %4525  ;;  %v2875_v16 = vadd.f32 1.0, %v4524_v39  ;;  %4533 = vtanh.f32 %v2849_v56  ;;  %v2820_v55 = vmul.f32 %v2804_v51, %v6760_v42  ;;  %v2805_v7 = vmul.f32 %v2789_v40, %v6772_v19 }
 0x585   : > { %v4528_v38 = vpop.eup %4527  ;;  %v2879_v20 = vadd.f32 1.0, %v4526_v1  ;;  %v2851_v9 = vmul.f32 0.7978846, %v2835_v43  ;;  %v2896_v50 = vmul.f32 %v2880_v37, %v2768_v62  ;;  %4535 = vtanh.f32 %v2850_v27 }
 0x586   : > { %v2891_v58 = vmul.f32 %v2875_v16, %v2763_v63  ;;  %v2876_v36 = vadd.f32 1.0, %v4528_v38  ;;  %v2836_v30 = vadd.f32 %v2820_v55, %v6760_v42  ;;  %v2821_v5 = vmul.f32 %v2805_v7, %v6772_v19 }
 0x587   : > { %v2895_v23 = vmul.f32 %v2879_v20, %v2767_v0  ;;  %4537 = vtanh.f32 %v2851_v9  ;;  %v1600_v8 = vmul.f32 %v1584_v2, %v6643_v11  ;;  %v2790_v28 = vmul.f32 0.044715, %v6791_v26 }
 0x588   : > { %v2907_v49 = vadd.f32 %v2891_v58, %v5897_v33  ;;  %v2892_v46 = vmul.f32 %v2876_v36, %v2764_v53  ;;  %v2852_v18 = vmul.f32 0.7978846, %v2836_v30  ;;  %v2837_v15 = vadd.f32 %v2821_v5, %v6772_v19 }
 0x589   : > { %v2911_v6 = vadd.f32 %v2895_v23, %v5943_v13  ;;  %v2912_v62 = vadd.f32 %v2896_v50, %v1600_v8  ;;  %v1558_v57 = vmul.f32 0.7978846, %v6751_v4  ;;  %v2806_v33 = vmul.f32 %v2790_v28, %v6791_v26 }
 0x58a   : > { %v4530_v17 = vpop.eup %4529  ;;  %4060 = vmatprep.mubr.msk.f32.mxu0 %vm1253_vm1, %v2907_v49  ;;  %v2908_v41 = vadd.f32 %v2892_v46, %v6697_v45  ;;  %v2765_v11 = vmul.f32 0.5, %v6719_v34  ;;  %4539 = vtanh.f32 %v2852_v18  ;;  %v2853_v13 = vmul.f32 0.7978846, %v2837_v15 }
 0x58b   : > { %4066 = vmatprep.mubr.msk.f32.mxu1 %vm1253_vm1, %v2911_v6  ;;  %v2877_v2 = vadd.f32 1.0, %v4530_v17  ;;  %v1582_v24 = vadd.f32 1.0, %v6673_v31  ;;  %v2822_v45 = vmul.f32 %v2806_v33, %v6791_v26  ;;  %v1470_v4 = vmul.f32 0.5, %v6601_v44  ;;  %v3189_v17 = vld [vmem:[%s6873_s6] ss:$0 sm:$0xff] }
 0x58c   : > { %4061 = vmatmul.mubr.msk.f32.gmra.mrb[148].mxu0 %vm1253_vm1, %v2908_v41  ;;  %4067 = vmatmul.mubr.msk.f32.vlgmr.msra.gmra.mrb[144].mxu1 %vm1253_vm1, %v2912_v62  ;;  %4541 = vtanh.f32 %v2853_v13  ;;  %v2766_v47 = vmul.f32 0.5, %v6730_v10  ;;  %v2769_v21 = vmul.f32 0.5, %v6722_v48  ;;  %v1586_v31 = vadd.f32 1.0, %v6727_v52 }
 0x58d   : > { %v4532_v53 = vpop.eup %4531  ;;  %v2893_v35 = vmul.f32 %v2877_v2, %v2765_v11  ;;  %4543 = vtanh.f32 %v1558_v57  ;;  %v2838_v61 = vadd.f32 %v2822_v45, %v6791_v26  ;;  %v1598_v39 = vmul.f32 %v1582_v24, %v1470_v4 }
 0x58e   : > { %v4534_v56 = vpop.eup %4533  ;;  %v2878_v34 = vadd.f32 1.0, %v4532_v53  ;;  %v1474_v10 = vmul.f32 0.5, %v6616_v54  ;;  %v2770_v1 = vmul.f32 0.5, %v6738_v29  ;;  %v1588_v55 = vadd.f32 1.0, %v6735_v60 }
 0x58f   : > { %v2909_v37 = vadd.f32 %v2893_v35, %v5921_v12  ;;  %v2881_v51 = vadd.f32 1.0, %v4534_v56  ;;  %v4536_v40 = vpop.eup %4535  ;;  %v2854_v0 = vmul.f32 0.7978846, %v2838_v61  ;;  %v2771_v12 = vmul.f32 0.5, %v6755_v25 }
 0x590   : > { %v2894_v63 = vmul.f32 %v2878_v34, %v2766_v47  ;;  %v2882_v16 = vadd.f32 1.0, %v4536_v40  ;;  %v1602_v38 = vmul.f32 %v1586_v31, %v1474_v10  ;;  %v1476_v58 = vmul.f32 0.5, %v6625_v14 }
 0x591   : > { %v4538_v44 = vpop.eup %4537  ;;  %4063 = vmatprep.mubr.msk.f32.mxu0 %vm1253_vm1, %v2909_v37  ;;  %v2897_v43 = vmul.f32 %v2881_v51, %v2769_v21  ;;  %4545 = vtanh.f32 %v2854_v0  ;;  %v2772_v25 = vmul.f32 0.5, %v6760_v42  ;;  %v2773_v60 = vmul.f32 0.5, %v6772_v19 }
 0x592   : > { %v2910_v27 = vadd.f32 %v2894_v63, %v1598_v39  ;;  %v2883_v48 = vadd.f32 1.0, %v4538_v44  ;;  %v2898_v20 = vmul.f32 %v2882_v16, %v2770_v1  ;;  %v1604_v23 = vmul.f32 %v1588_v55, %v1476_v58 }
 0x593   : > { %v2913_v52 = vadd.f32 %v2897_v43, %v5970_v3  ;;  %v1478_v42 = vmul.f32 0.5, %v6656_v59  ;;  %v2774_v28 = vmul.f32 0.5, %v6791_v26 }
 0x594   : > { %4064 = vmatmul.mubr.msk.f32.gmra.mrb[150].mxu0 %vm1253_vm1, %v2910_v27  ;;  %v2899_v9 = vmul.f32 %v2883_v48, %v2771_v12  ;;  %v4540_v7 = vpop.eup %4539  ;;  %v2914_v54 = vadd.f32 %v2898_v20, %v1602_v38 }
 0x595   : > { %4069 = vmatprep.mubr.msk.f32.mxu1 %vm1253_vm1, %v2913_v52  ;;  %v2884_v36 = vadd.f32 1.0, %v4540_v7 }
 0x596   : > { %v2915_v29 = vadd.f32 %v2899_v9, %v5997_v22  ;;  %v4542_v50 = vpop.eup %4541  ;;  %4070 = vmatmul.mubr.msk.f32.gmra.mrb[146].mxu1 %vm1253_vm1, %v2914_v54 }
 0x597   : > { %v4544_v3 = vpop.eup %4543  ;;  %v2900_v30 = vmul.f32 %v2884_v36, %v2772_v25  ;;  %v2885_v5 = vadd.f32 1.0, %v4542_v50 }
 0x598   : > { %4072 = vmatprep.mubr.msk.f32.mxu1 %vm1253_vm1, %v2915_v29  ;;  %v1590_v22 = vadd.f32 1.0, %v4544_v3 }
 0x599   : > { %v2916_v49 = vadd.f32 %v2900_v30, %v1604_v23  ;;  %v2901_v46 = vmul.f32 %v2885_v5, %v2773_v60 }
 0x59a   : > { %v1606_v18 = vmul.f32 %v1590_v22, %v1478_v42 }
 0x59b   : > { %v4546_v8 = vpop.eup %4545  ;;  %4073 = vmatmul.mubr.msk.f32.gmra.mrb[148].mxu1 %vm1253_vm1, %v2916_v49  ;;  %v2917_v14 = vadd.f32 %v2901_v46, %v6024_v32 }
 0x59c   : > { %v2886_v6 = vadd.f32 1.0, %v4546_v8 }
 0x59d   : > { %4075 = vmatprep.mubr.msk.f32.mxu1 %vm1253_vm1, %v2917_v14 }
 0x59e   : > { %v2902_v15 = vmul.f32 %v2886_v6, %v2774_v28 }
 0x5a0   : > { %v2918_v19 = vadd.f32 %v2902_v15, %v1606_v18 }
 0x5a2   : > { %4076 = vmatmul.mubr.msk.f32.gmra.mrb[150].mxu1 %vm1253_vm1, %v2918_v19 }
 0x64c   : > { %v4056_v41 = vpop.f32.mrb[144].mxu0 }
 0x64d   : > { %v3044_v32 = vpop.f32.mrb[145].mxu0 }
 0x64e   : > { %v3045_v59 = vadd.f32 %v3189_v17, %v3044_v32 }
 0x650   : > { %3115 = vst.msk [vmem:[%s6846_s29] sm:$0xff] %vm301_vm0, %v3045_v59 }
 0x654   : > { %v4059_v26 = vpop.f32.mrb[146].mxu0 }
 0x655   : > { %v3053_v62 = vpop.f32.mrb[147].mxu0 }
 0x656   : > { %v3054_v57 = vadd.f32 %v3189_v17, %v3053_v62 }
 0x658   : > { %3116 = vst.msk [vmem:[%s6846_s29 + $0x8] sm:$0xff] %vm301_vm0, %v3054_v57 }
 0x65f   : > { %v4062_v33 = vpop.f32.mrb[148].mxu0  ;;  %v4068_v11 = vpop.f32.mrb[144].mxu1 }
 0x660   : > { %v3062_v2 = vpop.f32.mrb[149].mxu0  ;;  %v3080_v13 = vpop.f32.mrb[145].mxu1 }
 0x661   : > { %v3063_v24 = vadd.f32 %v3189_v17, %v3062_v2  ;;  %v3081_v45 = vadd.f32 %v3189_v17, %v3080_v13 }
 0x663   : > { %3117 = vst.msk [vmem:[%s6846_s29 + $0x10] sm:$0xff] %vm301_vm0, %v3063_v24  ;;  %3119 = vst.msk [vmem:[%s6846_s29 + $0x20] sm:$0xff] %vm301_vm0, %v3081_v45 }
 0x667   : > { %v4065_v53 = vpop.f32.mrb[150].mxu0 }
 0x668   : > { %v3071_v35 = vpop.f32.mrb[151].mxu0 }
 0x669   : > { %v3072_v4 = vadd.f32 %v3189_v17, %v3071_v35  ;;  %v4071_v56 = vpop.f32.mrb[146].mxu1 }
 0x66a   : > { %v3089_v47 = vpop.f32.mrb[147].mxu1 }
 0x66b   : > { %3118 = vst.msk [vmem:[%s6846_s29 + $0x18] sm:$0xff] %vm301_vm0, %v3072_v4  ;;  %v3090_v34 = vadd.f32 %v3189_v17, %v3089_v47 }
 0x66d   : > { %3120 = vst.msk [vmem:[%s6846_s29 + $0x28] sm:$0xff] %vm301_vm0, %v3090_v34 }
 0x66e   : > { %v4074_v61 = vpop.f32.mrb[148].mxu1 }
 0x66f   : > { %v3098_v37 = vpop.f32.mrb[149].mxu1 }
 0x670   : > { %v3099_v21 = vadd.f32 %v3189_v17, %v3098_v37 }
 0x672   : > { %3121 = vst.msk [vmem:[%s6846_s29 + $0x30] sm:$0xff] %vm301_vm0, %v3099_v21 }
 0x675   : > { %v4077_v51 = vpop.f32.mrb[150].mxu1 }
 0x676   : > { %v3107_v31 = vpop.f32.mrb[151].mxu1 }
 0x677   : > { %v3108_v40 = vadd.f32 %v3189_v17, %v3107_v31 }
 0x679   : > { %3122 = vst.msk [vmem:[%s6846_s29 + $0x38] sm:$0xff] %vm301_vm0, %v3108_v40 }
 0x67a PF: > { %s17_s24 = sadd.s32 1, %s4555_s24  }
 0x67b   : > { %p14_p4 = scmp.ge.s32.totalorder %s17_s24, 4  }
 0x67d   :  { %16 = sbr.rel (!%p14_p4) target bundleno = 1 (0x1), region = 78 }

</bundles_post_ra>
